<compile_context>
chip_gen: v5e
topology: v5e:2x2
jax: 0.10.0
libtpu: 0.0.40
codegen_flags: <defaults>
</compile_context>

<pallas_src>
import functools
import math

import jax
import jax.numpy as jnp
from jax.experimental import pallas as pl
from jax.experimental.pallas import tpu as pltpu

# Explicit scoped-VMEM budget: raises v5e's 16 MiB default, stays within the
# defaults / physical capacity of v6e (128 MiB) and v7x (64 MiB).
_VMEM_LIMIT_BYTES = 32 * 1024 * 1024


# ---------------------------------------------------------------------------
# tiling helpers
# ---------------------------------------------------------------------------
def _round_up(x, m):
    return ((x + m - 1) // m) * m


def _pick_tile(dim, target, align):
    """Largest multiple of `align` that divides `dim`, capped at `target`.

    Falls back to the full extent only when `dim` itself is not `align`-aligned
    (a full-extent block is always legal)."""
    if dim <= target or dim % align != 0:
        return dim
    t = (min(target, dim) // align) * align
    while dim % t != 0:
        t -= align
    return t


# ---------------------------------------------------------------------------
# fused matmul + bias (+ optional ReLU):  y = act(x @ w + b)
# ---------------------------------------------------------------------------
def _linear_kernel(x_ref, w_ref, b_ref, o_ref, acc_ref, *, activation):
    @pl.when(pl.program_id(2) == 0)
    def _():
        acc_ref[...] = jnp.zeros_like(acc_ref)

    acc_ref[...] += jnp.dot(x_ref[...].astype(jnp.bfloat16),
                            w_ref[...].astype(jnp.bfloat16),
                            preferred_element_type=jnp.float32)

    @pl.when(pl.program_id(2) == pl.num_programs(2) - 1)
    def _():
        y = acc_ref[...] + b_ref[...]            # f32 epilogue
        if activation == "relu":
            y = jnp.maximum(y, 0.0)
        o_ref[...] = y.astype(o_ref.dtype)


def pallas_linear(x, w, b, activation=None, *, tm=512, tn=512, tk=1024):
    """x: (M, K), w: (K, N), b: (N,)  ->  (M, N)."""
    M, K = x.shape
    K2, N = w.shape
    assert K == K2
    Mp = _round_up(M, 8)
    if Mp != M:
        x = jnp.pad(x, ((0, Mp - M), (0, 0)))
    tm = _pick_tile(Mp, tm, 8)
    tn = _pick_tile(N, tn, 128)
    tk = _pick_tile(K, tk, 128)
    grid = (Mp // tm, N // tn, K // tk)
    out = pl.pallas_call(
        functools.partial(_linear_kernel, activation=activation),
        out_shape=jax.ShapeDtypeStruct((Mp, N), x.dtype),
        grid=grid,
        in_specs=[
            pl.BlockSpec((tm, tk), lambda i, j, k: (i, k)),
            pl.BlockSpec((tk, tn), lambda i, j, k: (k, j)),
            pl.BlockSpec((1, tn), lambda i, j, k: (0, j)),
        ],
        out_specs=pl.BlockSpec((tm, tn), lambda i, j, k: (i, j)),
        scratch_shapes=[pltpu.VMEM((tm, tn), jnp.float32)],
        compiler_params=pltpu.CompilerParams(
            dimension_semantics=("parallel", "parallel", "arbitrary"),
            vmem_limit_bytes=_VMEM_LIMIT_BYTES),
        cost_estimate=pl.CostEstimate(
            flops=2 * Mp * N * K, transcendentals=0,
            bytes_accessed=4 * (Mp * K + K * N + Mp * N)),
    )(x, w, b.reshape(1, N))
    return out[:M] if Mp != M else out


# ---------------------------------------------------------------------------
# fused matmul + bias + residual-add + LayerNorm (post-norm encoder epilogue)
#   out = LayerNorm(x @ w + b + res)
# ---------------------------------------------------------------------------
def _linear_res_ln_kernel(x_ref, w_ref, b_ref, res_ref, g_ref, bln_ref, o_ref,
                          acc_ref, *, eps):
    @pl.when(pl.program_id(1) == 0)
    def _():
        acc_ref[...] = jnp.zeros_like(acc_ref)

    acc_ref[...] += jnp.dot(x_ref[...].astype(jnp.bfloat16),
                            w_ref[...].astype(jnp.bfloat16),
                            preferred_element_type=jnp.float32)

    @pl.when(pl.program_id(1) == pl.num_programs(1) - 1)
    def _():
        h = acc_ref[...] + b_ref[...] + res_ref[...].astype(jnp.float32)
        mean = jnp.mean(h, axis=-1, keepdims=True)
        var = jnp.mean(jnp.square(h - mean), axis=-1, keepdims=True)
        y = (h - mean) * jax.lax.rsqrt(var + eps)
        o_ref[...] = (y * g_ref[...] + bln_ref[...]).astype(o_ref.dtype)


def pallas_linear_add_ln(x, w, b, res, gamma, beta, *, eps=1e-5, tm=256, tk=1024):
    """LayerNorm(x @ w + b + res) over the last axis. x: (M, K), res: (M, N)."""
    M, K = x.shape
    K2, N = w.shape
    assert K == K2 and res.shape == (M, N)
    Mp = _round_up(M, 8)
    if Mp != M:
        pad = ((0, Mp - M), (0, 0))
        x, res = jnp.pad(x, pad), jnp.pad(res, pad)
    tm = _pick_tile(Mp, tm, 8)
    tk = _pick_tile(K, tk, 128)
    grid = (Mp // tm, K // tk)          # N kept full-extent (LN needs all columns)
    out = pl.pallas_call(
        functools.partial(_linear_res_ln_kernel, eps=eps),
        out_shape=jax.ShapeDtypeStruct((Mp, N), x.dtype),
        grid=grid,
        in_specs=[
            pl.BlockSpec((tm, tk), lambda i, k: (i, k)),
            pl.BlockSpec((tk, N), lambda i, k: (k, 0)),
            pl.BlockSpec((1, N), lambda i, k: (0, 0)),
            pl.BlockSpec((tm, N), lambda i, k: (i, 0)),
            pl.BlockSpec((1, N), lambda i, k: (0, 0)),
            pl.BlockSpec((1, N), lambda i, k: (0, 0)),
        ],
        out_specs=pl.BlockSpec((tm, N), lambda i, k: (i, 0)),
        scratch_shapes=[pltpu.VMEM((tm, N), jnp.float32)],
        compiler_params=pltpu.CompilerParams(
            dimension_semantics=("parallel", "arbitrary"),
            vmem_limit_bytes=_VMEM_LIMIT_BYTES),
        cost_estimate=pl.CostEstimate(
            flops=2 * Mp * N * K, transcendentals=0,
            bytes_accessed=4 * (Mp * K + K * N + 2 * Mp * N)),
    )(x, w, b.reshape(1, N), res, gamma.reshape(1, N), beta.reshape(1, N))
    return out[:M] if Mp != M else out


# ---------------------------------------------------------------------------
# multi-head attention, gridded over batch with lane-dense (1, S, E) blocks
# ---------------------------------------------------------------------------
def _mha_kernel(q_ref, k_ref, v_ref, o_ref, *, num_heads, scale):
    _, S, E = q_ref.shape
    Sk = k_ref.shape[1]
    Dh = E // num_heads
    q2 = q_ref[0].astype(jnp.bfloat16)           # (S, E)  lane-dense load
    k2 = k_ref[0].astype(jnp.bfloat16)           # (Sk, E)
    v2 = v_ref[0].astype(jnp.bfloat16)
    # TODO(synk): for very long S / very large word-token counts, switch to a
    # kv-tiled online-softmax (flash) path instead of full (S, Sk) scores.
    outs = []
    for h in range(num_heads):                   # static unroll; in-VMEM head split
        sl = slice(h * Dh, (h + 1) * Dh)
        s = jax.lax.dot_general(q2[:, sl], k2[:, sl], (((1,), (1,)), ((), ())),
                                preferred_element_type=jnp.float32) * scale
        m = jnp.max(s, axis=-1, keepdims=True)
        p = jnp.exp(s - m)                       # f32 softmax (v5e-friendly)
        p = p * pl.reciprocal(jnp.sum(p, axis=-1, keepdims=True), approx=True)
        outs.append(jnp.dot(p.astype(jnp.bfloat16), v2[:, sl],
                            preferred_element_type=jnp.float32))
    o = jnp.concatenate(outs, axis=-1)           # (S, E)  lane-dense store
    o_ref[...] = o.reshape(1, S, E).astype(o_ref.dtype)


def _mha_call(args, in_specs, B, S, E, num_heads, scale, dtype):
    return pl.pallas_call(
        functools.partial(_mha_kernel, num_heads=num_heads, scale=scale),
        out_shape=jax.ShapeDtypeStruct((B, S, E), dtype),
        grid=(B,),
        in_specs=in_specs,
        out_specs=pl.BlockSpec((1, S, E), lambda b: (b, 0, 0)),
        compiler_params=pltpu.CompilerParams(
            dimension_semantics=("parallel",),
            vmem_limit_bytes=_VMEM_LIMIT_BYTES),
    )(*args)


def pallas_self_attention(qkv, B, S, E, num_heads, scale):
    """qkv: (B*S, 3E) fused projection; returns (B*S, E)."""
    if E % 128 == 0:
        # Read Q/K/V straight from the fused projection via column block index
        # (no HBM split / head transpose).
        qkv3 = qkv.reshape(B, S, 3 * E)
        args = (qkv3, qkv3, qkv3)
        in_specs = [pl.BlockSpec((1, S, E), lambda b: (b, 0, 0)),
                    pl.BlockSpec((1, S, E), lambda b: (b, 0, 1)),
                    pl.BlockSpec((1, S, E), lambda b: (b, 0, 2))]
    else:
        # Fallback for lane-misaligned E: split in HBM, full-extent blocks.
        q, k, v = jnp.split(qkv, 3, axis=-1)
        args = tuple(t.reshape(B, S, E) for t in (q, k, v))
        spec = pl.BlockSpec((1, S, E), lambda b: (b, 0, 0))
        in_specs = [spec, spec, spec]
    out = _mha_call(args, in_specs, B, S, E, num_heads, scale, qkv.dtype)
    return out.reshape(B * S, E)


def pallas_cross_attention(q2d, kv, B, S, E, num_heads, scale):
    """q2d: (B*S, E); kv: (Ntok, 2E) fused K/V projection of the word embedding.
    K/V block index is constant -> fetched once, shared by every batch step."""
    Ntok = kv.shape[0]
    q3 = q2d.reshape(B, S, E)
    q_spec = pl.BlockSpec((1, S, E), lambda b: (b, 0, 0))
    if E % 128 == 0:
        kv3 = kv.reshape(1, Ntok, 2 * E)
        args = (q3, kv3, kv3)
        in_specs = [q_spec,
                    pl.BlockSpec((1, Ntok, E), lambda b: (0, 0, 0)),
                    pl.BlockSpec((1, Ntok, E), lambda b: (0, 0, 1))]
    else:
        kc, vc = jnp.split(kv, 2, axis=-1)
        args = (q3, kc.reshape(1, Ntok, E), vc.reshape(1, Ntok, E))
        kv_spec = pl.BlockSpec((1, Ntok, E), lambda b: (0, 0, 0))
        in_specs = [q_spec, kv_spec, kv_spec]
    out = _mha_call(args, in_specs, B, S, E, num_heads, scale, q2d.dtype)
    return out.reshape(B * S, E)


# ---------------------------------------------------------------------------
# pure-JAX references (mirror the bf16-at-MXU-boundary math of the kernels)
# ---------------------------------------------------------------------------
def ref_linear(x, w, b, activation=None):
    y = jnp.dot(x.astype(jnp.bfloat16), w.astype(jnp.bfloat16),
                preferred_element_type=jnp.float32) + b
    return jnp.maximum(y, 0.0) if activation == "relu" else y


def ref_linear_add_ln(x, w, b, res, gamma, beta, *, eps=1e-5):
    h = jnp.dot(x.astype(jnp.bfloat16), w.astype(jnp.bfloat16),
                preferred_element_type=jnp.float32) + b + res
    m = jnp.mean(h, axis=-1, keepdims=True)
    v = jnp.mean(jnp.square(h - m), axis=-1, keepdims=True)
    return (h - m) * jax.lax.rsqrt(v + eps) * gamma + beta


def _ref_mha(q3, k3, v3, num_heads, scale):
    B, S, E = q3.shape
    Bk, Sk, _ = k3.shape
    Dh = E // num_heads
    qh = q3.reshape(B, S, num_heads, Dh).transpose(0, 2, 1, 3).astype(jnp.bfloat16)
    kh = k3.reshape(Bk, Sk, num_heads, Dh).transpose(0, 2, 1, 3).astype(jnp.bfloat16)
    vh = v3.reshape(Bk, Sk, num_heads, Dh).transpose(0, 2, 1, 3).astype(jnp.bfloat16)
    if Bk != B:
        kh = jnp.broadcast_to(kh, (B,) + kh.shape[1:])
        vh = jnp.broadcast_to(vh, (B,) + vh.shape[1:])
    s = jnp.einsum("bhqd,bhkd->bhqk", qh, kh,
                   preferred_element_type=jnp.float32) * scale
    p = jax.nn.softmax(s, axis=-1)
    o = jnp.einsum("bhqk,bhkd->bhqd", p.astype(jnp.bfloat16), vh,
                   preferred_element_type=jnp.float32)
    return o.transpose(0, 2, 1, 3).reshape(B * S, E).astype(q3.dtype)


def ref_self_attention(qkv, B, S, E, num_heads, scale):
    q, k, v = jnp.split(qkv, 3, axis=-1)
    return _ref_mha(q.reshape(B, S, E), k.reshape(B, S, E), v.reshape(B, S, E),
                    num_heads, scale)


def ref_cross_attention(q2d, kv, B, S, E, num_heads, scale):
    Ntok = kv.shape[0]
    kc, vc = jnp.split(kv, 2, axis=-1)
    return _ref_mha(q2d.reshape(B, S, E), kc.reshape(1, Ntok, E),
                    vc.reshape(1, Ntok, E), num_heads, scale)


# ---------------------------------------------------------------------------
# Encoder_PCA forward
# ---------------------------------------------------------------------------
def encoder_pca_forward(params, x, *, num_heads, use_pallas=True):
    B, S, _ = x.shape
    we = params["word_embedding_T"]                  # (Ntok, E) == word_embedding.T
    Ntok, E = we.shape
    H = num_heads
    scale = 1.0 / math.sqrt(E // H)

    if use_pallas:
        lin, lin_ln = pallas_linear, pallas_linear_add_ln
        sattn, cattn = pallas_self_attention, pallas_cross_attention
    else:
        lin, lin_ln = ref_linear, ref_linear_add_ln
        sattn, cattn = ref_self_attention, ref_cross_attention

    # ---- 1. input projection ----
    h = lin(x.reshape(B * S, -1), params["w_in"], params["b_in"])

    # ---- 2. transformer encoder layer (post-norm, eval mode) ----
    # TODO(synk): dropout (train-mode only) omitted; eval-mode dropout == identity.
    qkv = lin(h, params["sa_in_w"], params["sa_in_b"])           # fused QKV proj
    attn = sattn(qkv, B, S, E, H, scale)                         # (B*S, E)
    h = lin_ln(attn, params["sa_out_w"], params["sa_out_b"],     # out-proj + add + LN1
               h, params["ln1_g"], params["ln1_b"])
    ff = lin(h, params["ff1_w"], params["ff1_b"], "relu")
    h = lin_ln(ff, params["ff2_w"], params["ff2_b"],             # FFN-2 + add + LN2
               h, params["ln2_g"], params["ln2_b"])
    x_time = h.reshape(B, S, E)

    # ---- 3. cross attention vs. word embedding (K/V shared across the batch) ----
    qc = lin(h, params["ca_q_w"], params["ca_q_b"])              # (B*S, E)
    kv = lin(we, params["ca_kv_w"], params["ca_kv_b"])           # (Ntok, 2E), once
    ca = cattn(qc, kv, B, S, E, H, scale)                        # (B*S, E)
    x_cross = lin(ca, params["ca_out_w"], params["ca_out_b"]).reshape(B, S, E)
    return x_time, x_cross


# ---------------------------------------------------------------------------
# synthetic parameters (deterministic)
# ---------------------------------------------------------------------------
def init_params(key, input_dim, hidden, ffn_dim, num_tokens):
    def nrm(k, shape, s=0.05):
        return s * jax.random.normal(k, shape, jnp.float32)

    ks = iter(jax.random.split(key, 32))
    E, F = hidden, ffn_dim
    word_embedding = nrm(next(ks), (E, num_tokens), s=0.5)       # as passed to __init__
    return {
        "w_in": nrm(next(ks), (input_dim, E)), "b_in": nrm(next(ks), (E,)),
        "sa_in_w": nrm(next(ks), (E, 3 * E)), "sa_in_b": nrm(next(ks), (3 * E,)),
        "sa_out_w": nrm(next(ks), (E, E)), "sa_out_b": nrm(next(ks), (E,)),
        "ln1_g": jnp.ones((E,), jnp.float32), "ln1_b": jnp.zeros((E,), jnp.float32),
        "ff1_w": nrm(next(ks), (E, F)), "ff1_b": nrm(next(ks), (F,)),
        "ff2_w": nrm(next(ks), (F, E)), "ff2_b": nrm(next(ks), (E,)),
        "ln2_g": jnp.ones((E,), jnp.float32), "ln2_b": jnp.zeros((E,), jnp.float32),
        "ca_q_w": nrm(next(ks), (E, E)), "ca_q_b": nrm(next(ks), (E,)),
        "ca_kv_w": nrm(next(ks), (E, 2 * E)), "ca_kv_b": nrm(next(ks), (2 * E,)),
        "ca_out_w": nrm(next(ks), (E, E)), "ca_out_b": nrm(next(ks), (E,)),
        # Encoder_PCA stores `word_embedding.T`  ->  (num_tokens, E)
        "word_embedding_T": word_embedding.T,
    }


if __name__ == "__main__":
    B, S = 2, 8
    INPUT_DIM = 16
    HIDDEN = 128       # d_model   (small, lane-aligned stand-in for 768)
    HEADS = 4          # nhead     (small stand-in for 12)
    FFN_DIM = 256      # dim_feedforward (PyTorch default 2048; kept small here)
    N_TOKENS = 16      # number of word-embedding prototypes

    key = jax.random.PRNGKey(0)
    k_param, k_x = jax.random.split(key)
    params = init_params(k_param, INPUT_DIM, HIDDEN, FFN_DIM, N_TOKENS)
    x = jax.random.normal(k_x, (B, S, INPUT_DIM), jnp.float32)

    fwd = jax.jit(functools.partial(encoder_pca_forward,
                                    num_heads=HEADS, use_pallas=True))
    x_time, x_cross = jax.block_until_ready(fwd(params, x))

    # Pure-JAX reference check of the full forward pass.
    r_time, r_cross = encoder_pca_forward(params, x, num_heads=HEADS,
                                          use_pallas=False)
    assert jnp.allclose(x_time, r_time, atol=1e-2, rtol=1e-2), (
        "x_time max abs diff %e" % float(jnp.max(jnp.abs(x_time - r_time))))
    assert jnp.allclose(x_cross, r_cross, atol=1e-2, rtol=1e-2), (
        "x_cross max abs diff %e" % float(jnp.max(jnp.abs(x_cross - r_cross))))

    print("KERNEL_OK")
</pallas_src>

<mosaic_0001>
module attributes {stable_mosaic.version = 11 : i64} {
  func.func @_linear_kernel(%arg0: i32, %arg1: i32, %arg2: i32, %arg3: memref<16x128xf32, #tpu.memory_space<vmem>>, %arg4: memref<128x384xf32, #tpu.memory_space<vmem>>, %arg5: memref<1x384xf32, #tpu.memory_space<vmem>>, %arg6: memref<16x384xf32, #tpu.memory_space<vmem>>, %arg7: memref<16x384xf32, #tpu.memory_space<vmem>>) attributes {dimension_semantics = [#tpu.dimension_semantics<parallel>, #tpu.dimension_semantics<parallel>, #tpu.dimension_semantics<arbitrary>], iteration_bounds = array<i64: 1, 1, 1>, scalar_prefetch = 0 : i64, scratch_operands = 1 : i64, tpu.core_type = #tpu.core_type<tc>, window_params = [{transform_indices = @transform_0, window_bounds = array<i64: 16, 128>}, {transform_indices = @transform_1, window_bounds = array<i64: 128, 384>}, {transform_indices = @transform_2, window_bounds = array<i64: 1, 384>}, {transform_indices = @transform_3, window_bounds = array<i64: 16, 384>}]} {
    %c0_i32 = arith.constant 0 : i32
    %0 = arith.cmpi eq, %arg2, %c0_i32 : i32
    %1 = arith.extui %0 : i1 to i32
    %c0_i32_0 = arith.constant 0 : i32
    %2 = arith.cmpi ne, %1, %c0_i32_0 : i32
    scf.if %2 {
      %cst_10 = arith.constant 0.000000e+00 : f32
      %14 = vector.broadcast %cst_10 : f32 to vector<16x384xf32>
      %c0_11 = arith.constant 0 : index
      %c0_12 = arith.constant 0 : index
      %15 = vector.load %arg7[%c0_11, %c0_12] : memref<16x384xf32, #tpu.memory_space<vmem>>, vector<16x384xf32>
      tpu.vector_store %arg7[%c0_11, %c0_12], %14 {strides = array<i32>} : memref<16x384xf32, #tpu.memory_space<vmem>>, vector<16x384xf32>,
    } else {
    }
    %c0 = arith.constant 0 : index
    %c0_1 = arith.constant 0 : index
    %3 = vector.load %arg7[%c0, %c0_1] : memref<16x384xf32, #tpu.memory_space<vmem>>, vector<16x384xf32>
    %c0_2 = arith.constant 0 : index
    %c0_3 = arith.constant 0 : index
    %4 = vector.load %arg3[%c0_2, %c0_3] : memref<16x128xf32, #tpu.memory_space<vmem>>, vector<16x128xf32>
    %5 = arith.truncf %4 : vector<16x128xf32> to vector<16x128xbf16>
    %c0_4 = arith.constant 0 : index
    %c0_5 = arith.constant 0 : index
    %6 = vector.load %arg4[%c0_4, %c0_5] : memref<128x384xf32, #tpu.memory_space<vmem>>, vector<128x384xf32>
    %7 = arith.truncf %6 : vector<128x384xf32> to vector<128x384xbf16>
    %cst = arith.constant dense<0.000000e+00> : vector<16x384xf32>
    %8 = tpu.matmul %5, %7, %cst {dimension_numbers = #tpu.dot_dimension_numbers<[1], [0], [0], [1], [0, 0, 1, 1], [], []>} : vector<16x128xbf16>, vector<128x384xbf16>, vector<16x384xf32> -> vector<16x384xf32>
    %9 = arith.addf %3, %8 : vector<16x384xf32>
    %c0_6 = arith.constant 0 : index
    %c0_7 = arith.constant 0 : index
    %10 = vector.load %arg7[%c0_6, %c0_7] : memref<16x384xf32, #tpu.memory_space<vmem>>, vector<16x384xf32>
    tpu.vector_store %arg7[%c0_6, %c0_7], %9 {strides = array<i32>} : memref<16x384xf32, #tpu.memory_space<vmem>>, vector<16x384xf32>,
    %c0_i32_8 = arith.constant 0 : i32
    %11 = arith.cmpi eq, %arg2, %c0_i32_8 : i32
    %12 = arith.extui %11 : i1 to i32
    %c0_i32_9 = arith.constant 0 : i32
    %13 = arith.cmpi ne, %12, %c0_i32_9 : i32
    scf.if %13 {
      %c0_10 = arith.constant 0 : index
      %c0_11 = arith.constant 0 : index
      %14 = vector.load %arg7[%c0_10, %c0_11] : memref<16x384xf32, #tpu.memory_space<vmem>>, vector<16x384xf32>
      %c0_12 = arith.constant 0 : index
      %c0_13 = arith.constant 0 : index
      %15 = vector.load %arg5[%c0_12, %c0_13] : memref<1x384xf32, #tpu.memory_space<vmem>>, vector<1x384xf32>
      %16 = vector.broadcast %15 : vector<1x384xf32> to vector<16x384xf32>
      %17 = arith.addf %14, %16 : vector<16x384xf32>
      %c0_14 = arith.constant 0 : index
      %c0_15 = arith.constant 0 : index
      %18 = vector.load %arg6[%c0_14, %c0_15] : memref<16x384xf32, #tpu.memory_space<vmem>>, vector<16x384xf32>
      tpu.vector_store %arg6[%c0_14, %c0_15], %17 {strides = array<i32>} : memref<16x384xf32, #tpu.memory_space<vmem>>, vector<16x384xf32>,
    } else {
    }
    return
  }
  func.func @transform_0(%arg0: i32, %arg1: i32, %arg2: i32) -> (i32, i32) {
    %c0_i32 = arith.constant 0 : i32
    return %arg0, %arg2 : i32, i32
  }
  func.func @transform_1(%arg0: i32, %arg1: i32, %arg2: i32) -> (i32, i32) {
    %c0_i32 = arith.constant 0 : i32
    return %arg2, %arg1 : i32, i32
  }
  func.func @transform_2(%arg0: i32, %arg1: i32, %arg2: i32) -> (i32, i32) {
    %c0_i32 = arith.constant 0 : i32
    %c0_i32_0 = arith.constant 0 : i32
    return %c0_i32, %arg1 : i32, i32
  }
  func.func @transform_3(%arg0: i32, %arg1: i32, %arg2: i32) -> (i32, i32) {
    %c0_i32 = arith.constant 0 : i32
    return %arg0, %arg1 : i32, i32
  }
}

module attributes {stable_mosaic.version = 11 : i64} {
  func.func @_mha_kernel(%arg0: i32, %arg1: memref<1x8x128xf32, #tpu.memory_space<vmem>>, %arg2: memref<1x8x128xf32, #tpu.memory_space<vmem>>, %arg3: memref<1x8x128xf32, #tpu.memory_space<vmem>>, %arg4: memref<1x8x128xf32, #tpu.memory_space<vmem>>) attributes {dimension_semantics = [#tpu.dimension_semantics<parallel>], iteration_bounds = array<i64: 2>, scalar_prefetch = 0 : i64, scratch_operands = 0 : i64, tpu.core_type = #tpu.core_type<tc>, window_params = [{transform_indices = @transform_0, window_bounds = array<i64: 1, 8, 128>}, {transform_indices = @transform_1, window_bounds = array<i64: 1, 8, 128>}, {transform_indices = @transform_2, window_bounds = array<i64: 1, 8, 128>}, {transform_indices = @transform_3, window_bounds = array<i64: 1, 8, 128>}]} {
    %c0 = arith.constant 0 : index
    %c0_0 = arith.constant 0 : index
    %c0_1 = arith.constant 0 : index
    %0 = vector.load %arg1[%c0, %c0_0, %c0_1] : memref<1x8x128xf32, #tpu.memory_space<vmem>>, vector<1x8x128xf32>
    %1 = vector.shape_cast %0 : vector<1x8x128xf32> to vector<8x128xf32>
    %2 = arith.truncf %1 : vector<8x128xf32> to vector<8x128xbf16>
    %c0_2 = arith.constant 0 : index
    %c0_3 = arith.constant 0 : index
    %c0_4 = arith.constant 0 : index
    %3 = vector.load %arg2[%c0_2, %c0_3, %c0_4] : memref<1x8x128xf32, #tpu.memory_space<vmem>>, vector<1x8x128xf32>
    %4 = vector.shape_cast %3 : vector<1x8x128xf32> to vector<8x128xf32>
    %5 = arith.truncf %4 : vector<8x128xf32> to vector<8x128xbf16>
    %c0_5 = arith.constant 0 : index
    %c0_6 = arith.constant 0 : index
    %c0_7 = arith.constant 0 : index
    %6 = vector.load %arg3[%c0_5, %c0_6, %c0_7] : memref<1x8x128xf32, #tpu.memory_space<vmem>>, vector<1x8x128xf32>
    %7 = vector.shape_cast %6 : vector<1x8x128xf32> to vector<8x128xf32>
    %8 = arith.truncf %7 : vector<8x128xf32> to vector<8x128xbf16>
    %9 = vector.extract_strided_slice %2 {offsets = [0, 0], sizes = [8, 32], strides = [1, 1]} : vector<8x128xbf16> to vector<8x32xbf16>
    %10 = vector.extract_strided_slice %5 {offsets = [0, 0], sizes = [8, 32], strides = [1, 1]} : vector<8x128xbf16> to vector<8x32xbf16>
    %cst = arith.constant dense<0.000000e+00> : vector<8x8xf32>
    %11 = tpu.matmul %9, %10, %cst {dimension_numbers = #tpu.dot_dimension_numbers<[1], [1], [0], [0], [0, 0, 1, 0], [], []>} : vector<8x32xbf16>, vector<8x32xbf16>, vector<8x8xf32> -> vector<8x8xf32>
    %cst_8 = arith.constant 0.176776692 : f32
    %12 = vector.broadcast %cst_8 : f32 to vector<8x8xf32>
    %13 = arith.mulf %11, %12 : vector<8x8xf32>
    %cst_9 = arith.constant dense<0xFF800000> : vector<8xf32>
    %14 = vector.multi_reduction <maximumf>, %13, %cst_9 [1] : vector<8x8xf32> to vector<8xf32>
    %15 = vector.shape_cast %14 : vector<8xf32> to vector<8x1xf32>
    %16 = vector.broadcast %15 : vector<8x1xf32> to vector<8x8xf32>
    %17 = arith.subf %13, %16 : vector<8x8xf32>
    %18 = math.exp %17 : vector<8x8xf32>
    %cst_10 = arith.constant dense<0.000000e+00> : vector<8xf32>
    %19 = vector.multi_reduction <add>, %18, %cst_10 [1] : vector<8x8xf32> to vector<8xf32>
    %20 = vector.shape_cast %19 : vector<8xf32> to vector<8x1xf32>
    %21 = tpu.reciprocal %20 {approx = true} : vector<8x1xf32> -> vector<8x1xf32>
    %22 = vector.broadcast %21 : vector<8x1xf32> to vector<8x8xf32>
    %23 = arith.mulf %18, %22 : vector<8x8xf32>
    %24 = arith.truncf %23 : vector<8x8xf32> to vector<8x8xbf16>
    %25 = vector.extract_strided_slice %8 {offsets = [0, 0], sizes = [8, 32], strides = [1, 1]} : vector<8x128xbf16> to vector<8x32xbf16>
    %cst_11 = arith.constant dense<0.000000e+00> : vector<8x32xf32>
    %26 = tpu.matmul %24, %25, %cst_11 {dimension_numbers = #tpu.dot_dimension_numbers<[1], [0], [0], [1], [0, 0, 1, 1], [], []>} : vector<8x8xbf16>, vector<8x32xbf16>, vector<8x32xf32> -> vector<8x32xf32>
    %27 = vector.extract_strided_slice %2 {offsets = [0, 32], sizes = [8, 32], strides = [1, 1]} : vector<8x128xbf16> to vector<8x32xbf16>
    %28 = vector.extract_strided_slice %5 {offsets = [0, 32], sizes = [8, 32], strides = [1, 1]} : vector<8x128xbf16> to vector<8x32xbf16>
    %cst_12 = arith.constant dense<0.000000e+00> : vector<8x8xf32>
    %29 = tpu.matmul %27, %28, %cst_12 {dimension_numbers = #tpu.dot_dimension_numbers<[1], [1], [0], [0], [0, 0, 1, 0], [], []>} : vector<8x32xbf16>, vector<8x32xbf16>, vector<8x8xf32> -> vector<8x8xf32>
    %cst_13 = arith.constant 0.176776692 : f32
    %30 = vector.broadcast %cst_13 : f32 to vector<8x8xf32>
    %31 = arith.mulf %29, %30 : vector<8x8xf32>
    %cst_14 = arith.constant dense<0xFF800000> : vector<8xf32>
    %32 = vector.multi_reduction <maximumf>, %31, %cst_14 [1] : vector<8x8xf32> to vector<8xf32>
    %33 = vector.shape_cast %32 : vector<8xf32> to vector<8x1xf32>
    %34 = vector.broadcast %33 : vector<8x1xf32> to vector<8x8xf32>
    %35 = arith.subf %31, %34 : vector<8x8xf32>
    %36 = math.exp %35 : vector<8x8xf32>
    %cst_15 = arith.constant dense<0.000000e+00> : vector<8xf32>
    %37 = vector.multi_reduction <add>, %36, %cst_15 [1] : vector<8x8xf32> to vector<8xf32>
    %38 = vector.shape_cast %37 : vector<8xf32> to vector<8x1xf32>
    %39 = tpu.reciprocal %38 {approx = true} : vector<8x1xf32> -> vector<8x1xf32>
    %40 = vector.broadcast %39 : vector<8x1xf32> to vector<8x8xf32>
    %41 = arith.mulf %36, %40 : vector<8x8xf32>
    %42 = arith.truncf %41 : vector<8x8xf32> to vector<8x8xbf16>
    %43 = vector.extract_strided_slice %8 {offsets = [0, 32], sizes = [8, 32], strides = [1, 1]} : vector<8x128xbf16> to vector<8x32xbf16>
    %cst_16 = arith.constant dense<0.000000e+00> : vector<8x32xf32>
    %44 = tpu.matmul %42, %43, %cst_16 {dimension_numbers = #tpu.dot_dimension_numbers<[1], [0], [0], [1], [0, 0, 1, 1], [], []>} : vector<8x8xbf16>, vector<8x32xbf16>, vector<8x32xf32> -> vector<8x32xf32>
    %45 = vector.extract_strided_slice %2 {offsets = [0, 64], sizes = [8, 32], strides = [1, 1]} : vector<8x128xbf16> to vector<8x32xbf16>
    %46 = vector.extract_strided_slice %5 {offsets = [0, 64], sizes = [8, 32], strides = [1, 1]} : vector<8x128xbf16> to vector<8x32xbf16>
    %cst_17 = arith.constant dense<0.000000e+00> : vector<8x8xf32>
    %47 = tpu.matmul %45, %46, %cst_17 {dimension_numbers = #tpu.dot_dimension_numbers<[1], [1], [0], [0], [0, 0, 1, 0], [], []>} : vector<8x32xbf16>, vector<8x32xbf16>, vector<8x8xf32> -> vector<8x8xf32>
    %cst_18 = arith.constant 0.176776692 : f32
    %48 = vector.broadcast %cst_18 : f32 to vector<8x8xf32>
    %49 = arith.mulf %47, %48 : vector<8x8xf32>
    %cst_19 = arith.constant dense<0xFF800000> : vector<8xf32>
    %50 = vector.multi_reduction <maximumf>, %49, %cst_19 [1] : vector<8x8xf32> to vector<8xf32>
    %51 = vector.shape_cast %50 : vector<8xf32> to vector<8x1xf32>
    %52 = vector.broadcast %51 : vector<8x1xf32> to vector<8x8xf32>
    %53 = arith.subf %49, %52 : vector<8x8xf32>
    %54 = math.exp %53 : vector<8x8xf32>
    %cst_20 = arith.constant dense<0.000000e+00> : vector<8xf32>
    %55 = vector.multi_reduction <add>, %54, %cst_20 [1] : vector<8x8xf32> to vector<8xf32>
    %56 = vector.shape_cast %55 : vector<8xf32> to vector<8x1xf32>
    %57 = tpu.reciprocal %56 {approx = true} : vector<8x1xf32> -> vector<8x1xf32>
    %58 = vector.broadcast %57 : vector<8x1xf32> to vector<8x8xf32>
    %59 = arith.mulf %54, %58 : vector<8x8xf32>
    %60 = arith.truncf %59 : vector<8x8xf32> to vector<8x8xbf16>
    %61 = vector.extract_strided_slice %8 {offsets = [0, 64], sizes = [8, 32], strides = [1, 1]} : vector<8x128xbf16> to vector<8x32xbf16>
    %cst_21 = arith.constant dense<0.000000e+00> : vector<8x32xf32>
    %62 = tpu.matmul %60, %61, %cst_21 {dimension_numbers = #tpu.dot_dimension_numbers<[1], [0], [0], [1], [0, 0, 1, 1], [], []>} : vector<8x8xbf16>, vector<8x32xbf16>, vector<8x32xf32> -> vector<8x32xf32>
    %63 = vector.extract_strided_slice %2 {offsets = [0, 96], sizes = [8, 32], strides = [1, 1]} : vector<8x128xbf16> to vector<8x32xbf16>
    %64 = vector.extract_strided_slice %5 {offsets = [0, 96], sizes = [8, 32], strides = [1, 1]} : vector<8x128xbf16> to vector<8x32xbf16>
    %cst_22 = arith.constant dense<0.000000e+00> : vector<8x8xf32>
    %65 = tpu.matmul %63, %64, %cst_22 {dimension_numbers = #tpu.dot_dimension_numbers<[1], [1], [0], [0], [0, 0, 1, 0], [], []>} : vector<8x32xbf16>, vector<8x32xbf16>, vector<8x8xf32> -> vector<8x8xf32>
    %cst_23 = arith.constant 0.176776692 : f32
    %66 = vector.broadcast %cst_23 : f32 to vector<8x8xf32>
    %67 = arith.mulf %65, %66 : vector<8x8xf32>
    %cst_24 = arith.constant dense<0xFF800000> : vector<8xf32>
    %68 = vector.multi_reduction <maximumf>, %67, %cst_24 [1] : vector<8x8xf32> to vector<8xf32>
    %69 = vector.shape_cast %68 : vector<8xf32> to vector<8x1xf32>
    %70 = vector.broadcast %69 : vector<8x1xf32> to vector<8x8xf32>
    %71 = arith.subf %67, %70 : vector<8x8xf32>
    %72 = math.exp %71 : vector<8x8xf32>
    %cst_25 = arith.constant dense<0.000000e+00> : vector<8xf32>
    %73 = vector.multi_reduction <add>, %72, %cst_25 [1] : vector<8x8xf32> to vector<8xf32>
    %74 = vector.shape_cast %73 : vector<8xf32> to vector<8x1xf32>
    %75 = tpu.reciprocal %74 {approx = true} : vector<8x1xf32> -> vector<8x1xf32>
    %76 = vector.broadcast %75 : vector<8x1xf32> to vector<8x8xf32>
    %77 = arith.mulf %72, %76 : vector<8x8xf32>
    %78 = arith.truncf %77 : vector<8x8xf32> to vector<8x8xbf16>
    %79 = vector.extract_strided_slice %8 {offsets = [0, 96], sizes = [8, 32], strides = [1, 1]} : vector<8x128xbf16> to vector<8x32xbf16>
    %cst_26 = arith.constant dense<0.000000e+00> : vector<8x32xf32>
    %80 = tpu.matmul %78, %79, %cst_26 {dimension_numbers = #tpu.dot_dimension_numbers<[1], [0], [0], [1], [0, 0, 1, 1], [], []>} : vector<8x8xbf16>, vector<8x32xbf16>, vector<8x32xf32> -> vector<8x32xf32>
    %81 = tpu.concatenate %26, %44, %62, %80 in 1 : vector<8x32xf32>, vector<8x32xf32>, vector<8x32xf32>, vector<8x32xf32> -> vector<8x128xf32>
    %82 = vector.shape_cast %81 : vector<8x128xf32> to vector<1x8x128xf32>
    %c0_27 = arith.constant 0 : index
    %c0_28 = arith.constant 0 : index
    %c0_29 = arith.constant 0 : index
    %83 = vector.load %arg4[%c0_27, %c0_28, %c0_29] : memref<1x8x128xf32, #tpu.memory_space<vmem>>, vector<1x8x128xf32>
    tpu.vector_store %arg4[%c0_27, %c0_28, %c0_29], %82 {strides = array<i32>} : memref<1x8x128xf32, #tpu.memory_space<vmem>>, vector<1x8x128xf32>,
    return
  }
  func.func @transform_0(%arg0: i32) -> (i32, i32, i32) {
    %c0_i32 = arith.constant 0 : i32
    %c0_i32_0 = arith.constant 0 : i32
    %c0_i32_1 = arith.constant 0 : i32
    return %arg0, %c0_i32, %c0_i32_0 : i32, i32, i32
  }
  func.func @transform_1(%arg0: i32) -> (i32, i32, i32) {
    %c0_i32 = arith.constant 0 : i32
    %c1_i32 = arith.constant 1 : i32
    %c0_i32_0 = arith.constant 0 : i32
    return %arg0, %c0_i32, %c1_i32 : i32, i32, i32
  }
  func.func @transform_2(%arg0: i32) -> (i32, i32, i32) {
    %c0_i32 = arith.constant 0 : i32
    %c2_i32 = arith.constant 2 : i32
    %c0_i32_0 = arith.constant 0 : i32
    return %arg0, %c0_i32, %c2_i32 : i32, i32, i32
  }
  func.func @transform_3(%arg0: i32) -> (i32, i32, i32) {
    %c0_i32 = arith.constant 0 : i32
    %c0_i32_0 = arith.constant 0 : i32
    %c0_i32_1 = arith.constant 0 : i32
    return %arg0, %c0_i32, %c0_i32_0 : i32, i32, i32
  }
}

module attributes {stable_mosaic.version = 11 : i64} {
  func.func @_linear_kernel(%arg0: i32, %arg1: i32, %arg2: i32, %arg3: memref<16x16xf32, #tpu.memory_space<vmem>>, %arg4: memref<16x128xf32, #tpu.memory_space<vmem>>, %arg5: memref<1x128xf32, #tpu.memory_space<vmem>>, %arg6: memref<16x128xf32, #tpu.memory_space<vmem>>, %arg7: memref<16x128xf32, #tpu.memory_space<vmem>>) attributes {dimension_semantics = [#tpu.dimension_semantics<parallel>, #tpu.dimension_semantics<parallel>, #tpu.dimension_semantics<arbitrary>], iteration_bounds = array<i64: 1, 1, 1>, scalar_prefetch = 0 : i64, scratch_operands = 1 : i64, tpu.core_type = #tpu.core_type<tc>, window_params = [{transform_indices = @transform_0, window_bounds = array<i64: 16, 16>}, {transform_indices = @transform_1, window_bounds = array<i64: 16, 128>}, {transform_indices = @transform_2, window_bounds = array<i64: 1, 128>}, {transform_indices = @transform_3, window_bounds = array<i64: 16, 128>}]} {
    %c0_i32 = arith.constant 0 : i32
    %0 = arith.cmpi eq, %arg2, %c0_i32 : i32
    %1 = arith.extui %0 : i1 to i32
    %c0_i32_0 = arith.constant 0 : i32
    %2 = arith.cmpi ne, %1, %c0_i32_0 : i32
    scf.if %2 {
      %cst_10 = arith.constant 0.000000e+00 : f32
      %14 = vector.broadcast %cst_10 : f32 to vector<16x128xf32>
      %c0_11 = arith.constant 0 : index
      %c0_12 = arith.constant 0 : index
      %15 = vector.load %arg7[%c0_11, %c0_12] : memref<16x128xf32, #tpu.memory_space<vmem>>, vector<16x128xf32>
      tpu.vector_store %arg7[%c0_11, %c0_12], %14 {strides = array<i32>} : memref<16x128xf32, #tpu.memory_space<vmem>>, vector<16x128xf32>,
    } else {
    }
    %c0 = arith.constant 0 : index
    %c0_1 = arith.constant 0 : index
    %3 = vector.load %arg7[%c0, %c0_1] : memref<16x128xf32, #tpu.memory_space<vmem>>, vector<16x128xf32>
    %c0_2 = arith.constant 0 : index
    %c0_3 = arith.constant 0 : index
    %4 = vector.load %arg3[%c0_2, %c0_3] : memref<16x16xf32, #tpu.memory_space<vmem>>, vector<16x16xf32>
    %5 = arith.truncf %4 : vector<16x16xf32> to vector<16x16xbf16>
    %c0_4 = arith.constant 0 : index
    %c0_5 = arith.constant 0 : index
    %6 = vector.load %arg4[%c0_4, %c0_5] : memref<16x128xf32, #tpu.memory_space<vmem>>, vector<16x128xf32>
    %7 = arith.truncf %6 : vector<16x128xf32> to vector<16x128xbf16>
    %cst = arith.constant dense<0.000000e+00> : vector<16x128xf32>
    %8 = tpu.matmul %5, %7, %cst {dimension_numbers = #tpu.dot_dimension_numbers<[1], [0], [0], [1], [0, 0, 1, 1], [], []>} : vector<16x16xbf16>, vector<16x128xbf16>, vector<16x128xf32> -> vector<16x128xf32>
    %9 = arith.addf %3, %8 : vector<16x128xf32>
    %c0_6 = arith.constant 0 : index
    %c0_7 = arith.constant 0 : index
    %10 = vector.load %arg7[%c0_6, %c0_7] : memref<16x128xf32, #tpu.memory_space<vmem>>, vector<16x128xf32>
    tpu.vector_store %arg7[%c0_6, %c0_7], %9 {strides = array<i32>} : memref<16x128xf32, #tpu.memory_space<vmem>>, vector<16x128xf32>,
    %c0_i32_8 = arith.constant 0 : i32
    %11 = arith.cmpi eq, %arg2, %c0_i32_8 : i32
    %12 = arith.extui %11 : i1 to i32
    %c0_i32_9 = arith.constant 0 : i32
    %13 = arith.cmpi ne, %12, %c0_i32_9 : i32
    scf.if %13 {
      %c0_10 = arith.constant 0 : index
      %c0_11 = arith.constant 0 : index
      %14 = vector.load %arg7[%c0_10, %c0_11] : memref<16x128xf32, #tpu.memory_space<vmem>>, vector<16x128xf32>
      %c0_12 = arith.constant 0 : index
      %c0_13 = arith.constant 0 : index
      %15 = vector.load %arg5[%c0_12, %c0_13] : memref<1x128xf32, #tpu.memory_space<vmem>>, vector<1x128xf32>
      %16 = vector.broadcast %15 : vector<1x128xf32> to vector<16x128xf32>
      %17 = arith.addf %14, %16 : vector<16x128xf32>
      %c0_14 = arith.constant 0 : index
      %c0_15 = arith.constant 0 : index
      %18 = vector.load %arg6[%c0_14, %c0_15] : memref<16x128xf32, #tpu.memory_space<vmem>>, vector<16x128xf32>
      tpu.vector_store %arg6[%c0_14, %c0_15], %17 {strides = array<i32>} : memref<16x128xf32, #tpu.memory_space<vmem>>, vector<16x128xf32>,
    } else {
    }
    return
  }
  func.func @transform_0(%arg0: i32, %arg1: i32, %arg2: i32) -> (i32, i32) {
    %c0_i32 = arith.constant 0 : i32
    return %arg0, %arg2 : i32, i32
  }
  func.func @transform_1(%arg0: i32, %arg1: i32, %arg2: i32) -> (i32, i32) {
    %c0_i32 = arith.constant 0 : i32
    return %arg2, %arg1 : i32, i32
  }
  func.func @transform_2(%arg0: i32, %arg1: i32, %arg2: i32) -> (i32, i32) {
    %c0_i32 = arith.constant 0 : i32
    %c0_i32_0 = arith.constant 0 : i32
    return %c0_i32, %arg1 : i32, i32
  }
  func.func @transform_3(%arg0: i32, %arg1: i32, %arg2: i32) -> (i32, i32) {
    %c0_i32 = arith.constant 0 : i32
    return %arg0, %arg1 : i32, i32
  }
}

module attributes {stable_mosaic.version = 11 : i64} {
  func.func @_linear_res_ln_kernel(%arg0: i32, %arg1: i32, %arg2: memref<16x128xf32, #tpu.memory_space<vmem>>, %arg3: memref<128x128xf32, #tpu.memory_space<vmem>>, %arg4: memref<1x128xf32, #tpu.memory_space<vmem>>, %arg5: memref<16x128xf32, #tpu.memory_space<vmem>>, %arg6: memref<1x128xf32, #tpu.memory_space<vmem>>, %arg7: memref<1x128xf32, #tpu.memory_space<vmem>>, %arg8: memref<16x128xf32, #tpu.memory_space<vmem>>, %arg9: memref<16x128xf32, #tpu.memory_space<vmem>>) attributes {dimension_semantics = [#tpu.dimension_semantics<parallel>, #tpu.dimension_semantics<arbitrary>], iteration_bounds = array<i64: 1, 1>, scalar_prefetch = 0 : i64, scratch_operands = 1 : i64, tpu.core_type = #tpu.core_type<tc>, window_params = [{transform_indices = @transform_0, window_bounds = array<i64: 16, 128>}, {transform_indices = @transform_1, window_bounds = array<i64: 128, 128>}, {pipeline_mode = #tpu.pipeline_mode<synchronous>, transform_indices = @transform_2, window_bounds = array<i64: 1, 128>}, {transform_indices = @transform_3, window_bounds = array<i64: 16, 128>}, {pipeline_mode = #tpu.pipeline_mode<synchronous>, transform_indices = @transform_4, window_bounds = array<i64: 1, 128>}, {pipeline_mode = #tpu.pipeline_mode<synchronous>, transform_indices = @transform_5, window_bounds = array<i64: 1, 128>}, {transform_indices = @transform_6, window_bounds = array<i64: 16, 128>}]} {
    %c0_i32 = arith.constant 0 : i32
    %0 = arith.cmpi eq, %arg1, %c0_i32 : i32
    %1 = arith.extui %0 : i1 to i32
    %c0_i32_0 = arith.constant 0 : i32
    %2 = arith.cmpi ne, %1, %c0_i32_0 : i32
    scf.if %2 {
      %cst_10 = arith.constant 0.000000e+00 : f32
      %14 = vector.broadcast %cst_10 : f32 to vector<16x128xf32>
      %c0_11 = arith.constant 0 : index
      %c0_12 = arith.constant 0 : index
      %15 = vector.load %arg9[%c0_11, %c0_12] : memref<16x128xf32, #tpu.memory_space<vmem>>, vector<16x128xf32>
      tpu.vector_store %arg9[%c0_11, %c0_12], %14 {strides = array<i32>} : memref<16x128xf32, #tpu.memory_space<vmem>>, vector<16x128xf32>,
    } else {
    }
    %c0 = arith.constant 0 : index
    %c0_1 = arith.constant 0 : index
    %3 = vector.load %arg9[%c0, %c0_1] : memref<16x128xf32, #tpu.memory_space<vmem>>, vector<16x128xf32>
    %c0_2 = arith.constant 0 : index
    %c0_3 = arith.constant 0 : index
    %4 = vector.load %arg2[%c0_2, %c0_3] : memref<16x128xf32, #tpu.memory_space<vmem>>, vector<16x128xf32>
    %5 = arith.truncf %4 : vector<16x128xf32> to vector<16x128xbf16>
    %c0_4 = arith.constant 0 : index
    %c0_5 = arith.constant 0 : index
    %6 = vector.load %arg3[%c0_4, %c0_5] : memref<128x128xf32, #tpu.memory_space<vmem>>, vector<128x128xf32>
    %7 = arith.truncf %6 : vector<128x128xf32> to vector<128x128xbf16>
    %cst = arith.constant dense<0.000000e+00> : vector<16x128xf32>
    %8 = tpu.matmul %5, %7, %cst {dimension_numbers = #tpu.dot_dimension_numbers<[1], [0], [0], [1], [0, 0, 1, 1], [], []>} : vector<16x128xbf16>, vector<128x128xbf16>, vector<16x128xf32> -> vector<16x128xf32>
    %9 = arith.addf %3, %8 : vector<16x128xf32>
    %c0_6 = arith.constant 0 : index
    %c0_7 = arith.constant 0 : index
    %10 = vector.load %arg9[%c0_6, %c0_7] : memref<16x128xf32, #tpu.memory_space<vmem>>, vector<16x128xf32>
    tpu.vector_store %arg9[%c0_6, %c0_7], %9 {strides = array<i32>} : memref<16x128xf32, #tpu.memory_space<vmem>>, vector<16x128xf32>,
    %c0_i32_8 = arith.constant 0 : i32
    %11 = arith.cmpi eq, %arg1, %c0_i32_8 : i32
    %12 = arith.extui %11 : i1 to i32
    %c0_i32_9 = arith.constant 0 : i32
    %13 = arith.cmpi ne, %12, %c0_i32_9 : i32
    scf.if %13 {
      %c0_10 = arith.constant 0 : index
      %c0_11 = arith.constant 0 : index
      %14 = vector.load %arg9[%c0_10, %c0_11] : memref<16x128xf32, #tpu.memory_space<vmem>>, vector<16x128xf32>
      %c0_12 = arith.constant 0 : index
      %c0_13 = arith.constant 0 : index
      %15 = vector.load %arg4[%c0_12, %c0_13] : memref<1x128xf32, #tpu.memory_space<vmem>>, vector<1x128xf32>
      %16 = vector.broadcast %15 : vector<1x128xf32> to vector<16x128xf32>
      %17 = arith.addf %14, %16 : vector<16x128xf32>
      %c0_14 = arith.constant 0 : index
      %c0_15 = arith.constant 0 : index
      %18 = vector.load %arg5[%c0_14, %c0_15] : memref<16x128xf32, #tpu.memory_space<vmem>>, vector<16x128xf32>
      %19 = arith.addf %17, %18 : vector<16x128xf32>
      %cst_16 = arith.constant dense<0.000000e+00> : vector<16xf32>
      %20 = vector.multi_reduction <add>, %19, %cst_16 [1] : vector<16x128xf32> to vector<16xf32>
      %21 = vector.shape_cast %20 : vector<16xf32> to vector<16x1xf32>
      %cst_17 = arith.constant 1.280000e+02 : f32
      %22 = vector.broadcast %cst_17 : f32 to vector<16x1xf32>
      %23 = arith.divf %21, %22 : vector<16x1xf32>
      %24 = vector.broadcast %23 : vector<16x1xf32> to vector<16x128xf32>
      %25 = arith.subf %19, %24 : vector<16x128xf32>
      %26 = arith.mulf %25, %25 : vector<16x128xf32>
      %cst_18 = arith.constant dense<0.000000e+00> : vector<16xf32>
      %27 = vector.multi_reduction <add>, %26, %cst_18 [1] : vector<16x128xf32> to vector<16xf32>
      %28 = vector.shape_cast %27 : vector<16xf32> to vector<16x1xf32>
      %cst_19 = arith.constant 1.280000e+02 : f32
      %29 = vector.broadcast %cst_19 : f32 to vector<16x1xf32>
      %30 = arith.divf %28, %29 : vector<16x1xf32>
      %31 = vector.broadcast %23 : vector<16x1xf32> to vector<16x128xf32>
      %32 = arith.subf %19, %31 : vector<16x128xf32>
      %cst_20 = arith.constant 9.99999974E-6 : f32
      %33 = vector.broadcast %cst_20 : f32 to vector<16x1xf32>
      %34 = arith.addf %30, %33 : vector<16x1xf32>
      %35 = math.rsqrt %34 : vector<16x1xf32>
      %36 = vector.broadcast %35 : vector<16x1xf32> to vector<16x128xf32>
      %37 = arith.mulf %32, %36 : vector<16x128xf32>
      %c0_21 = arith.constant 0 : index
      %c0_22 = arith.constant 0 : index
      %38 = vector.load %arg6[%c0_21, %c0_22] : memref<1x128xf32, #tpu.memory_space<vmem>>, vector<1x128xf32>
      %39 = vector.broadcast %38 : vector<1x128xf32> to vector<16x128xf32>
      %40 = arith.mulf %37, %39 : vector<16x128xf32>
      %c0_23 = arith.constant 0 : index
      %c0_24 = arith.constant 0 : index
      %41 = vector.load %arg7[%c0_23, %c0_24] : memref<1x128xf32, #tpu.memory_space<vmem>>, vector<1x128xf32>
      %42 = vector.broadcast %41 : vector<1x128xf32> to vector<16x128xf32>
      %43 = arith.addf %40, %42 : vector<16x128xf32>
      %c0_25 = arith.constant 0 : index
      %c0_26 = arith.constant 0 : index
      %44 = vector.load %arg8[%c0_25, %c0_26] : memref<16x128xf32, #tpu.memory_space<vmem>>, vector<16x128xf32>
      tpu.vector_store %arg8[%c0_25, %c0_26], %43 {strides = array<i32>} : memref<16x128xf32, #tpu.memory_space<vmem>>, vector<16x128xf32>,
    } else {
    }
    return
  }
  func.func @transform_0(%arg0: i32, %arg1: i32) -> (i32, i32) {
    %c0_i32 = arith.constant 0 : i32
    return %arg0, %arg1 : i32, i32
  }
  func.func @transform_1(%arg0: i32, %arg1: i32) -> (i32, i32) {
    %c0_i32 = arith.constant 0 : i32
    %c0_i32_0 = arith.constant 0 : i32
    return %arg1, %c0_i32 : i32, i32
  }
  func.func @transform_2(%arg0: i32, %arg1: i32) -> (i32, i32) {
    %c0_i32 = arith.constant 0 : i32
    %c0_i32_0 = arith.constant 0 : i32
    %c0_i32_1 = arith.constant 0 : i32
    return %c0_i32, %c0_i32_0 : i32, i32
  }
  func.func @transform_3(%arg0: i32, %arg1: i32) -> (i32, i32) {
    %c0_i32 = arith.constant 0 : i32
    %c0_i32_0 = arith.constant 0 : i32
    return %arg0, %c0_i32 : i32, i32
  }
  func.func @transform_4(%arg0: i32, %arg1: i32) -> (i32, i32) {
    %c0_i32 = arith.constant 0 : i32
    %c0_i32_0 = arith.constant 0 : i32
    %c0_i32_1 = arith.constant 0 : i32
    return %c0_i32, %c0_i32_0 : i32, i32
  }
  func.func @transform_5(%arg0: i32, %arg1: i32) -> (i32, i32) {
    %c0_i32 = arith.constant 0 : i32
    %c0_i32_0 = arith.constant 0 : i32
    %c0_i32_1 = arith.constant 0 : i32
    return %c0_i32, %c0_i32_0 : i32, i32
  }
  func.func @transform_6(%arg0: i32, %arg1: i32) -> (i32, i32) {
    %c0_i32 = arith.constant 0 : i32
    %c0_i32_0 = arith.constant 0 : i32
    return %arg0, %c0_i32 : i32, i32
  }
}

module attributes {stable_mosaic.version = 11 : i64} {
  func.func @_linear_kernel(%arg0: i32, %arg1: i32, %arg2: i32, %arg3: memref<16x128xf32, #tpu.memory_space<vmem>>, %arg4: memref<128x256xf32, #tpu.memory_space<vmem>>, %arg5: memref<1x256xf32, #tpu.memory_space<vmem>>, %arg6: memref<16x256xf32, #tpu.memory_space<vmem>>, %arg7: memref<16x256xf32, #tpu.memory_space<vmem>>) attributes {dimension_semantics = [#tpu.dimension_semantics<parallel>, #tpu.dimension_semantics<parallel>, #tpu.dimension_semantics<arbitrary>], iteration_bounds = array<i64: 1, 1, 1>, scalar_prefetch = 0 : i64, scratch_operands = 1 : i64, tpu.core_type = #tpu.core_type<tc>, window_params = [{transform_indices = @transform_0, window_bounds = array<i64: 16, 128>}, {transform_indices = @transform_1, window_bounds = array<i64: 128, 256>}, {transform_indices = @transform_2, window_bounds = array<i64: 1, 256>}, {transform_indices = @transform_3, window_bounds = array<i64: 16, 256>}]} {
    %c0_i32 = arith.constant 0 : i32
    %0 = arith.cmpi eq, %arg2, %c0_i32 : i32
    %1 = arith.extui %0 : i1 to i32
    %c0_i32_0 = arith.constant 0 : i32
    %2 = arith.cmpi ne, %1, %c0_i32_0 : i32
    scf.if %2 {
      %cst_10 = arith.constant 0.000000e+00 : f32
      %14 = vector.broadcast %cst_10 : f32 to vector<16x256xf32>
      %c0_11 = arith.constant 0 : index
      %c0_12 = arith.constant 0 : index
      %15 = vector.load %arg7[%c0_11, %c0_12] : memref<16x256xf32, #tpu.memory_space<vmem>>, vector<16x256xf32>
      tpu.vector_store %arg7[%c0_11, %c0_12], %14 {strides = array<i32>} : memref<16x256xf32, #tpu.memory_space<vmem>>, vector<16x256xf32>,
    } else {
    }
    %c0 = arith.constant 0 : index
    %c0_1 = arith.constant 0 : index
    %3 = vector.load %arg7[%c0, %c0_1] : memref<16x256xf32, #tpu.memory_space<vmem>>, vector<16x256xf32>
    %c0_2 = arith.constant 0 : index
    %c0_3 = arith.constant 0 : index
    %4 = vector.load %arg3[%c0_2, %c0_3] : memref<16x128xf32, #tpu.memory_space<vmem>>, vector<16x128xf32>
    %5 = arith.truncf %4 : vector<16x128xf32> to vector<16x128xbf16>
    %c0_4 = arith.constant 0 : index
    %c0_5 = arith.constant 0 : index
    %6 = vector.load %arg4[%c0_4, %c0_5] : memref<128x256xf32, #tpu.memory_space<vmem>>, vector<128x256xf32>
    %7 = arith.truncf %6 : vector<128x256xf32> to vector<128x256xbf16>
    %cst = arith.constant dense<0.000000e+00> : vector<16x256xf32>
    %8 = tpu.matmul %5, %7, %cst {dimension_numbers = #tpu.dot_dimension_numbers<[1], [0], [0], [1], [0, 0, 1, 1], [], []>} : vector<16x128xbf16>, vector<128x256xbf16>, vector<16x256xf32> -> vector<16x256xf32>
    %9 = arith.addf %3, %8 : vector<16x256xf32>
    %c0_6 = arith.constant 0 : index
    %c0_7 = arith.constant 0 : index
    %10 = vector.load %arg7[%c0_6, %c0_7] : memref<16x256xf32, #tpu.memory_space<vmem>>, vector<16x256xf32>
    tpu.vector_store %arg7[%c0_6, %c0_7], %9 {strides = array<i32>} : memref<16x256xf32, #tpu.memory_space<vmem>>, vector<16x256xf32>,
    %c0_i32_8 = arith.constant 0 : i32
    %11 = arith.cmpi eq, %arg2, %c0_i32_8 : i32
    %12 = arith.extui %11 : i1 to i32
    %c0_i32_9 = arith.constant 0 : i32
    %13 = arith.cmpi ne, %12, %c0_i32_9 : i32
    scf.if %13 {
      %c0_10 = arith.constant 0 : index
      %c0_11 = arith.constant 0 : index
      %14 = vector.load %arg7[%c0_10, %c0_11] : memref<16x256xf32, #tpu.memory_space<vmem>>, vector<16x256xf32>
      %c0_12 = arith.constant 0 : index
      %c0_13 = arith.constant 0 : index
      %15 = vector.load %arg5[%c0_12, %c0_13] : memref<1x256xf32, #tpu.memory_space<vmem>>, vector<1x256xf32>
      %16 = vector.broadcast %15 : vector<1x256xf32> to vector<16x256xf32>
      %17 = arith.addf %14, %16 : vector<16x256xf32>
      %cst_14 = arith.constant 0.000000e+00 : f32
      %18 = vector.broadcast %cst_14 : f32 to vector<16x256xf32>
      %19 = arith.maximumf %17, %18 : vector<16x256xf32>
      %c0_15 = arith.constant 0 : index
      %c0_16 = arith.constant 0 : index
      %20 = vector.load %arg6[%c0_15, %c0_16] : memref<16x256xf32, #tpu.memory_space<vmem>>, vector<16x256xf32>
      tpu.vector_store %arg6[%c0_15, %c0_16], %19 {strides = array<i32>} : memref<16x256xf32, #tpu.memory_space<vmem>>, vector<16x256xf32>,
    } else {
    }
    return
  }
  func.func @transform_0(%arg0: i32, %arg1: i32, %arg2: i32) -> (i32, i32) {
    %c0_i32 = arith.constant 0 : i32
    return %arg0, %arg2 : i32, i32
  }
  func.func @transform_1(%arg0: i32, %arg1: i32, %arg2: i32) -> (i32, i32) {
    %c0_i32 = arith.constant 0 : i32
    return %arg2, %arg1 : i32, i32
  }
  func.func @transform_2(%arg0: i32, %arg1: i32, %arg2: i32) -> (i32, i32) {
    %c0_i32 = arith.constant 0 : i32
    %c0_i32_0 = arith.constant 0 : i32
    return %c0_i32, %arg1 : i32, i32
  }
  func.func @transform_3(%arg0: i32, %arg1: i32, %arg2: i32) -> (i32, i32) {
    %c0_i32 = arith.constant 0 : i32
    return %arg0, %arg1 : i32, i32
  }
}

module attributes {stable_mosaic.version = 11 : i64} {
  func.func @_linear_res_ln_kernel(%arg0: i32, %arg1: i32, %arg2: memref<16x256xf32, #tpu.memory_space<vmem>>, %arg3: memref<256x128xf32, #tpu.memory_space<vmem>>, %arg4: memref<1x128xf32, #tpu.memory_space<vmem>>, %arg5: memref<16x128xf32, #tpu.memory_space<vmem>>, %arg6: memref<1x128xf32, #tpu.memory_space<vmem>>, %arg7: memref<1x128xf32, #tpu.memory_space<vmem>>, %arg8: memref<16x128xf32, #tpu.memory_space<vmem>>, %arg9: memref<16x128xf32, #tpu.memory_space<vmem>>) attributes {dimension_semantics = [#tpu.dimension_semantics<parallel>, #tpu.dimension_semantics<arbitrary>], iteration_bounds = array<i64: 1, 1>, scalar_prefetch = 0 : i64, scratch_operands = 1 : i64, tpu.core_type = #tpu.core_type<tc>, window_params = [{transform_indices = @transform_0, window_bounds = array<i64: 16, 256>}, {transform_indices = @transform_1, window_bounds = array<i64: 256, 128>}, {pipeline_mode = #tpu.pipeline_mode<synchronous>, transform_indices = @transform_2, window_bounds = array<i64: 1, 128>}, {transform_indices = @transform_3, window_bounds = array<i64: 16, 128>}, {pipeline_mode = #tpu.pipeline_mode<synchronous>, transform_indices = @transform_4, window_bounds = array<i64: 1, 128>}, {pipeline_mode = #tpu.pipeline_mode<synchronous>, transform_indices = @transform_5, window_bounds = array<i64: 1, 128>}, {transform_indices = @transform_6, window_bounds = array<i64: 16, 128>}]} {
    %c0_i32 = arith.constant 0 : i32
    %0 = arith.cmpi eq, %arg1, %c0_i32 : i32
    %1 = arith.extui %0 : i1 to i32
    %c0_i32_0 = arith.constant 0 : i32
    %2 = arith.cmpi ne, %1, %c0_i32_0 : i32
    scf.if %2 {
      %cst_10 = arith.constant 0.000000e+00 : f32
      %14 = vector.broadcast %cst_10 : f32 to vector<16x128xf32>
      %c0_11 = arith.constant 0 : index
      %c0_12 = arith.constant 0 : index
      %15 = vector.load %arg9[%c0_11, %c0_12] : memref<16x128xf32, #tpu.memory_space<vmem>>, vector<16x128xf32>
      tpu.vector_store %arg9[%c0_11, %c0_12], %14 {strides = array<i32>} : memref<16x128xf32, #tpu.memory_space<vmem>>, vector<16x128xf32>,
    } else {
    }
    %c0 = arith.constant 0 : index
    %c0_1 = arith.constant 0 : index
    %3 = vector.load %arg9[%c0, %c0_1] : memref<16x128xf32, #tpu.memory_space<vmem>>, vector<16x128xf32>
    %c0_2 = arith.constant 0 : index
    %c0_3 = arith.constant 0 : index
    %4 = vector.load %arg2[%c0_2, %c0_3] : memref<16x256xf32, #tpu.memory_space<vmem>>, vector<16x256xf32>
    %5 = arith.truncf %4 : vector<16x256xf32> to vector<16x256xbf16>
    %c0_4 = arith.constant 0 : index
    %c0_5 = arith.constant 0 : index
    %6 = vector.load %arg3[%c0_4, %c0_5] : memref<256x128xf32, #tpu.memory_space<vmem>>, vector<256x128xf32>
    %7 = arith.truncf %6 : vector<256x128xf32> to vector<256x128xbf16>
    %cst = arith.constant dense<0.000000e+00> : vector<16x128xf32>
    %8 = tpu.matmul %5, %7, %cst {dimension_numbers = #tpu.dot_dimension_numbers<[1], [0], [0], [1], [0, 0, 1, 1], [], []>} : vector<16x256xbf16>, vector<256x128xbf16>, vector<16x128xf32> -> vector<16x128xf32>
    %9 = arith.addf %3, %8 : vector<16x128xf32>
    %c0_6 = arith.constant 0 : index
    %c0_7 = arith.constant 0 : index
    %10 = vector.load %arg9[%c0_6, %c0_7] : memref<16x128xf32, #tpu.memory_space<vmem>>, vector<16x128xf32>
    tpu.vector_store %arg9[%c0_6, %c0_7], %9 {strides = array<i32>} : memref<16x128xf32, #tpu.memory_space<vmem>>, vector<16x128xf32>,
    %c0_i32_8 = arith.constant 0 : i32
    %11 = arith.cmpi eq, %arg1, %c0_i32_8 : i32
    %12 = arith.extui %11 : i1 to i32
    %c0_i32_9 = arith.constant 0 : i32
    %13 = arith.cmpi ne, %12, %c0_i32_9 : i32
    scf.if %13 {
      %c0_10 = arith.constant 0 : index
      %c0_11 = arith.constant 0 : index
      %14 = vector.load %arg9[%c0_10, %c0_11] : memref<16x128xf32, #tpu.memory_space<vmem>>, vector<16x128xf32>
      %c0_12 = arith.constant 0 : index
      %c0_13 = arith.constant 0 : index
      %15 = vector.load %arg4[%c0_12, %c0_13] : memref<1x128xf32, #tpu.memory_space<vmem>>, vector<1x128xf32>
      %16 = vector.broadcast %15 : vector<1x128xf32> to vector<16x128xf32>
      %17 = arith.addf %14, %16 : vector<16x128xf32>
      %c0_14 = arith.constant 0 : index
      %c0_15 = arith.constant 0 : index
      %18 = vector.load %arg5[%c0_14, %c0_15] : memref<16x128xf32, #tpu.memory_space<vmem>>, vector<16x128xf32>
      %19 = arith.addf %17, %18 : vector<16x128xf32>
      %cst_16 = arith.constant dense<0.000000e+00> : vector<16xf32>
      %20 = vector.multi_reduction <add>, %19, %cst_16 [1] : vector<16x128xf32> to vector<16xf32>
      %21 = vector.shape_cast %20 : vector<16xf32> to vector<16x1xf32>
      %cst_17 = arith.constant 1.280000e+02 : f32
      %22 = vector.broadcast %cst_17 : f32 to vector<16x1xf32>
      %23 = arith.divf %21, %22 : vector<16x1xf32>
      %24 = vector.broadcast %23 : vector<16x1xf32> to vector<16x128xf32>
      %25 = arith.subf %19, %24 : vector<16x128xf32>
      %26 = arith.mulf %25, %25 : vector<16x128xf32>
      %cst_18 = arith.constant dense<0.000000e+00> : vector<16xf32>
      %27 = vector.multi_reduction <add>, %26, %cst_18 [1] : vector<16x128xf32> to vector<16xf32>
      %28 = vector.shape_cast %27 : vector<16xf32> to vector<16x1xf32>
      %cst_19 = arith.constant 1.280000e+02 : f32
      %29 = vector.broadcast %cst_19 : f32 to vector<16x1xf32>
      %30 = arith.divf %28, %29 : vector<16x1xf32>
      %31 = vector.broadcast %23 : vector<16x1xf32> to vector<16x128xf32>
      %32 = arith.subf %19, %31 : vector<16x128xf32>
      %cst_20 = arith.constant 9.99999974E-6 : f32
      %33 = vector.broadcast %cst_20 : f32 to vector<16x1xf32>
      %34 = arith.addf %30, %33 : vector<16x1xf32>
      %35 = math.rsqrt %34 : vector<16x1xf32>
      %36 = vector.broadcast %35 : vector<16x1xf32> to vector<16x128xf32>
      %37 = arith.mulf %32, %36 : vector<16x128xf32>
      %c0_21 = arith.constant 0 : index
      %c0_22 = arith.constant 0 : index
      %38 = vector.load %arg6[%c0_21, %c0_22] : memref<1x128xf32, #tpu.memory_space<vmem>>, vector<1x128xf32>
      %39 = vector.broadcast %38 : vector<1x128xf32> to vector<16x128xf32>
      %40 = arith.mulf %37, %39 : vector<16x128xf32>
      %c0_23 = arith.constant 0 : index
      %c0_24 = arith.constant 0 : index
      %41 = vector.load %arg7[%c0_23, %c0_24] : memref<1x128xf32, #tpu.memory_space<vmem>>, vector<1x128xf32>
      %42 = vector.broadcast %41 : vector<1x128xf32> to vector<16x128xf32>
      %43 = arith.addf %40, %42 : vector<16x128xf32>
      %c0_25 = arith.constant 0 : index
      %c0_26 = arith.constant 0 : index
      %44 = vector.load %arg8[%c0_25, %c0_26] : memref<16x128xf32, #tpu.memory_space<vmem>>, vector<16x128xf32>
      tpu.vector_store %arg8[%c0_25, %c0_26], %43 {strides = array<i32>} : memref<16x128xf32, #tpu.memory_space<vmem>>, vector<16x128xf32>,
    } else {
    }
    return
  }
  func.func @transform_0(%arg0: i32, %arg1: i32) -> (i32, i32) {
    %c0_i32 = arith.constant 0 : i32
    return %arg0, %arg1 : i32, i32
  }
  func.func @transform_1(%arg0: i32, %arg1: i32) -> (i32, i32) {
    %c0_i32 = arith.constant 0 : i32
    %c0_i32_0 = arith.constant 0 : i32
    return %arg1, %c0_i32 : i32, i32
  }
  func.func @transform_2(%arg0: i32, %arg1: i32) -> (i32, i32) {
    %c0_i32 = arith.constant 0 : i32
    %c0_i32_0 = arith.constant 0 : i32
    %c0_i32_1 = arith.constant 0 : i32
    return %c0_i32, %c0_i32_0 : i32, i32
  }
  func.func @transform_3(%arg0: i32, %arg1: i32) -> (i32, i32) {
    %c0_i32 = arith.constant 0 : i32
    %c0_i32_0 = arith.constant 0 : i32
    return %arg0, %c0_i32 : i32, i32
  }
  func.func @transform_4(%arg0: i32, %arg1: i32) -> (i32, i32) {
    %c0_i32 = arith.constant 0 : i32
    %c0_i32_0 = arith.constant 0 : i32
    %c0_i32_1 = arith.constant 0 : i32
    return %c0_i32, %c0_i32_0 : i32, i32
  }
  func.func @transform_5(%arg0: i32, %arg1: i32) -> (i32, i32) {
    %c0_i32 = arith.constant 0 : i32
    %c0_i32_0 = arith.constant 0 : i32
    %c0_i32_1 = arith.constant 0 : i32
    return %c0_i32, %c0_i32_0 : i32, i32
  }
  func.func @transform_6(%arg0: i32, %arg1: i32) -> (i32, i32) {
    %c0_i32 = arith.constant 0 : i32
    %c0_i32_0 = arith.constant 0 : i32
    return %arg0, %c0_i32 : i32, i32
  }
}

module attributes {stable_mosaic.version = 11 : i64} {
  func.func @_linear_kernel(%arg0: i32, %arg1: i32, %arg2: i32, %arg3: memref<16x128xf32, #tpu.memory_space<vmem>>, %arg4: memref<128x128xf32, #tpu.memory_space<vmem>>, %arg5: memref<1x128xf32, #tpu.memory_space<vmem>>, %arg6: memref<16x128xf32, #tpu.memory_space<vmem>>, %arg7: memref<16x128xf32, #tpu.memory_space<vmem>>) attributes {dimension_semantics = [#tpu.dimension_semantics<parallel>, #tpu.dimension_semantics<parallel>, #tpu.dimension_semantics<arbitrary>], iteration_bounds = array<i64: 1, 1, 1>, scalar_prefetch = 0 : i64, scratch_operands = 1 : i64, tpu.core_type = #tpu.core_type<tc>, window_params = [{transform_indices = @transform_0, window_bounds = array<i64: 16, 128>}, {transform_indices = @transform_1, window_bounds = array<i64: 128, 128>}, {transform_indices = @transform_2, window_bounds = array<i64: 1, 128>}, {transform_indices = @transform_3, window_bounds = array<i64: 16, 128>}]} {
    %c0_i32 = arith.constant 0 : i32
    %0 = arith.cmpi eq, %arg2, %c0_i32 : i32
    %1 = arith.extui %0 : i1 to i32
    %c0_i32_0 = arith.constant 0 : i32
    %2 = arith.cmpi ne, %1, %c0_i32_0 : i32
    scf.if %2 {
      %cst_10 = arith.constant 0.000000e+00 : f32
      %14 = vector.broadcast %cst_10 : f32 to vector<16x128xf32>
      %c0_11 = arith.constant 0 : index
      %c0_12 = arith.constant 0 : index
      %15 = vector.load %arg7[%c0_11, %c0_12] : memref<16x128xf32, #tpu.memory_space<vmem>>, vector<16x128xf32>
      tpu.vector_store %arg7[%c0_11, %c0_12], %14 {strides = array<i32>} : memref<16x128xf32, #tpu.memory_space<vmem>>, vector<16x128xf32>,
    } else {
    }
    %c0 = arith.constant 0 : index
    %c0_1 = arith.constant 0 : index
    %3 = vector.load %arg7[%c0, %c0_1] : memref<16x128xf32, #tpu.memory_space<vmem>>, vector<16x128xf32>
    %c0_2 = arith.constant 0 : index
    %c0_3 = arith.constant 0 : index
    %4 = vector.load %arg3[%c0_2, %c0_3] : memref<16x128xf32, #tpu.memory_space<vmem>>, vector<16x128xf32>
    %5 = arith.truncf %4 : vector<16x128xf32> to vector<16x128xbf16>
    %c0_4 = arith.constant 0 : index
    %c0_5 = arith.constant 0 : index
    %6 = vector.load %arg4[%c0_4, %c0_5] : memref<128x128xf32, #tpu.memory_space<vmem>>, vector<128x128xf32>
    %7 = arith.truncf %6 : vector<128x128xf32> to vector<128x128xbf16>
    %cst = arith.constant dense<0.000000e+00> : vector<16x128xf32>
    %8 = tpu.matmul %5, %7, %cst {dimension_numbers = #tpu.dot_dimension_numbers<[1], [0], [0], [1], [0, 0, 1, 1], [], []>} : vector<16x128xbf16>, vector<128x128xbf16>, vector<16x128xf32> -> vector<16x128xf32>
    %9 = arith.addf %3, %8 : vector<16x128xf32>
    %c0_6 = arith.constant 0 : index
    %c0_7 = arith.constant 0 : index
    %10 = vector.load %arg7[%c0_6, %c0_7] : memref<16x128xf32, #tpu.memory_space<vmem>>, vector<16x128xf32>
    tpu.vector_store %arg7[%c0_6, %c0_7], %9 {strides = array<i32>} : memref<16x128xf32, #tpu.memory_space<vmem>>, vector<16x128xf32>,
    %c0_i32_8 = arith.constant 0 : i32
    %11 = arith.cmpi eq, %arg2, %c0_i32_8 : i32
    %12 = arith.extui %11 : i1 to i32
    %c0_i32_9 = arith.constant 0 : i32
    %13 = arith.cmpi ne, %12, %c0_i32_9 : i32
    scf.if %13 {
      %c0_10 = arith.constant 0 : index
      %c0_11 = arith.constant 0 : index
      %14 = vector.load %arg7[%c0_10, %c0_11] : memref<16x128xf32, #tpu.memory_space<vmem>>, vector<16x128xf32>
      %c0_12 = arith.constant 0 : index
      %c0_13 = arith.constant 0 : index
      %15 = vector.load %arg5[%c0_12, %c0_13] : memref<1x128xf32, #tpu.memory_space<vmem>>, vector<1x128xf32>
      %16 = vector.broadcast %15 : vector<1x128xf32> to vector<16x128xf32>
      %17 = arith.addf %14, %16 : vector<16x128xf32>
      %c0_14 = arith.constant 0 : index
      %c0_15 = arith.constant 0 : index
      %18 = vector.load %arg6[%c0_14, %c0_15] : memref<16x128xf32, #tpu.memory_space<vmem>>, vector<16x128xf32>
      tpu.vector_store %arg6[%c0_14, %c0_15], %17 {strides = array<i32>} : memref<16x128xf32, #tpu.memory_space<vmem>>, vector<16x128xf32>,
    } else {
    }
    return
  }
  func.func @transform_0(%arg0: i32, %arg1: i32, %arg2: i32) -> (i32, i32) {
    %c0_i32 = arith.constant 0 : i32
    return %arg0, %arg2 : i32, i32
  }
  func.func @transform_1(%arg0: i32, %arg1: i32, %arg2: i32) -> (i32, i32) {
    %c0_i32 = arith.constant 0 : i32
    return %arg2, %arg1 : i32, i32
  }
  func.func @transform_2(%arg0: i32, %arg1: i32, %arg2: i32) -> (i32, i32) {
    %c0_i32 = arith.constant 0 : i32
    %c0_i32_0 = arith.constant 0 : i32
    return %c0_i32, %arg1 : i32, i32
  }
  func.func @transform_3(%arg0: i32, %arg1: i32, %arg2: i32) -> (i32, i32) {
    %c0_i32 = arith.constant 0 : i32
    return %arg0, %arg1 : i32, i32
  }
}

module attributes {stable_mosaic.version = 11 : i64} {
  func.func @_linear_kernel(%arg0: i32, %arg1: i32, %arg2: i32, %arg3: memref<16x128xf32, #tpu.memory_space<vmem>>, %arg4: memref<128x256xf32, #tpu.memory_space<vmem>>, %arg5: memref<1x256xf32, #tpu.memory_space<vmem>>, %arg6: memref<16x256xf32, #tpu.memory_space<vmem>>, %arg7: memref<16x256xf32, #tpu.memory_space<vmem>>) attributes {dimension_semantics = [#tpu.dimension_semantics<parallel>, #tpu.dimension_semantics<parallel>, #tpu.dimension_semantics<arbitrary>], iteration_bounds = array<i64: 1, 1, 1>, scalar_prefetch = 0 : i64, scratch_operands = 1 : i64, tpu.core_type = #tpu.core_type<tc>, window_params = [{transform_indices = @transform_0, window_bounds = array<i64: 16, 128>}, {transform_indices = @transform_1, window_bounds = array<i64: 128, 256>}, {transform_indices = @transform_2, window_bounds = array<i64: 1, 256>}, {transform_indices = @transform_3, window_bounds = array<i64: 16, 256>}]} {
    %c0_i32 = arith.constant 0 : i32
    %0 = arith.cmpi eq, %arg2, %c0_i32 : i32
    %1 = arith.extui %0 : i1 to i32
    %c0_i32_0 = arith.constant 0 : i32
    %2 = arith.cmpi ne, %1, %c0_i32_0 : i32
    scf.if %2 {
      %cst_10 = arith.constant 0.000000e+00 : f32
      %14 = vector.broadcast %cst_10 : f32 to vector<16x256xf32>
      %c0_11 = arith.constant 0 : index
      %c0_12 = arith.constant 0 : index
      %15 = vector.load %arg7[%c0_11, %c0_12] : memref<16x256xf32, #tpu.memory_space<vmem>>, vector<16x256xf32>
      tpu.vector_store %arg7[%c0_11, %c0_12], %14 {strides = array<i32>} : memref<16x256xf32, #tpu.memory_space<vmem>>, vector<16x256xf32>,
    } else {
    }
    %c0 = arith.constant 0 : index
    %c0_1 = arith.constant 0 : index
    %3 = vector.load %arg7[%c0, %c0_1] : memref<16x256xf32, #tpu.memory_space<vmem>>, vector<16x256xf32>
    %c0_2 = arith.constant 0 : index
    %c0_3 = arith.constant 0 : index
    %4 = vector.load %arg3[%c0_2, %c0_3] : memref<16x128xf32, #tpu.memory_space<vmem>>, vector<16x128xf32>
    %5 = arith.truncf %4 : vector<16x128xf32> to vector<16x128xbf16>
    %c0_4 = arith.constant 0 : index
    %c0_5 = arith.constant 0 : index
    %6 = vector.load %arg4[%c0_4, %c0_5] : memref<128x256xf32, #tpu.memory_space<vmem>>, vector<128x256xf32>
    %7 = arith.truncf %6 : vector<128x256xf32> to vector<128x256xbf16>
    %cst = arith.constant dense<0.000000e+00> : vector<16x256xf32>
    %8 = tpu.matmul %5, %7, %cst {dimension_numbers = #tpu.dot_dimension_numbers<[1], [0], [0], [1], [0, 0, 1, 1], [], []>} : vector<16x128xbf16>, vector<128x256xbf16>, vector<16x256xf32> -> vector<16x256xf32>
    %9 = arith.addf %3, %8 : vector<16x256xf32>
    %c0_6 = arith.constant 0 : index
    %c0_7 = arith.constant 0 : index
    %10 = vector.load %arg7[%c0_6, %c0_7] : memref<16x256xf32, #tpu.memory_space<vmem>>, vector<16x256xf32>
    tpu.vector_store %arg7[%c0_6, %c0_7], %9 {strides = array<i32>} : memref<16x256xf32, #tpu.memory_space<vmem>>, vector<16x256xf32>,
    %c0_i32_8 = arith.constant 0 : i32
    %11 = arith.cmpi eq, %arg2, %c0_i32_8 : i32
    %12 = arith.extui %11 : i1 to i32
    %c0_i32_9 = arith.constant 0 : i32
    %13 = arith.cmpi ne, %12, %c0_i32_9 : i32
    scf.if %13 {
      %c0_10 = arith.constant 0 : index
      %c0_11 = arith.constant 0 : index
      %14 = vector.load %arg7[%c0_10, %c0_11] : memref<16x256xf32, #tpu.memory_space<vmem>>, vector<16x256xf32>
      %c0_12 = arith.constant 0 : index
      %c0_13 = arith.constant 0 : index
      %15 = vector.load %arg5[%c0_12, %c0_13] : memref<1x256xf32, #tpu.memory_space<vmem>>, vector<1x256xf32>
      %16 = vector.broadcast %15 : vector<1x256xf32> to vector<16x256xf32>
      %17 = arith.addf %14, %16 : vector<16x256xf32>
      %c0_14 = arith.constant 0 : index
      %c0_15 = arith.constant 0 : index
      %18 = vector.load %arg6[%c0_14, %c0_15] : memref<16x256xf32, #tpu.memory_space<vmem>>, vector<16x256xf32>
      tpu.vector_store %arg6[%c0_14, %c0_15], %17 {strides = array<i32>} : memref<16x256xf32, #tpu.memory_space<vmem>>, vector<16x256xf32>,
    } else {
    }
    return
  }
  func.func @transform_0(%arg0: i32, %arg1: i32, %arg2: i32) -> (i32, i32) {
    %c0_i32 = arith.constant 0 : i32
    return %arg0, %arg2 : i32, i32
  }
  func.func @transform_1(%arg0: i32, %arg1: i32, %arg2: i32) -> (i32, i32) {
    %c0_i32 = arith.constant 0 : i32
    return %arg2, %arg1 : i32, i32
  }
  func.func @transform_2(%arg0: i32, %arg1: i32, %arg2: i32) -> (i32, i32) {
    %c0_i32 = arith.constant 0 : i32
    %c0_i32_0 = arith.constant 0 : i32
    return %c0_i32, %arg1 : i32, i32
  }
  func.func @transform_3(%arg0: i32, %arg1: i32, %arg2: i32) -> (i32, i32) {
    %c0_i32 = arith.constant 0 : i32
    return %arg0, %arg1 : i32, i32
  }
}

module attributes {stable_mosaic.version = 11 : i64} {
  func.func @_mha_kernel(%arg0: i32, %arg1: memref<1x8x128xf32, #tpu.memory_space<vmem>>, %arg2: memref<1x16x128xf32, #tpu.memory_space<vmem>>, %arg3: memref<1x16x128xf32, #tpu.memory_space<vmem>>, %arg4: memref<1x8x128xf32, #tpu.memory_space<vmem>>) attributes {dimension_semantics = [#tpu.dimension_semantics<parallel>], iteration_bounds = array<i64: 2>, scalar_prefetch = 0 : i64, scratch_operands = 0 : i64, tpu.core_type = #tpu.core_type<tc>, window_params = [{transform_indices = @transform_0, window_bounds = array<i64: 1, 8, 128>}, {transform_indices = @transform_1, window_bounds = array<i64: 1, 16, 128>}, {transform_indices = @transform_2, window_bounds = array<i64: 1, 16, 128>}, {transform_indices = @transform_3, window_bounds = array<i64: 1, 8, 128>}]} {
    %c0 = arith.constant 0 : index
    %c0_0 = arith.constant 0 : index
    %c0_1 = arith.constant 0 : index
    %0 = vector.load %arg1[%c0, %c0_0, %c0_1] : memref<1x8x128xf32, #tpu.memory_space<vmem>>, vector<1x8x128xf32>
    %1 = vector.shape_cast %0 : vector<1x8x128xf32> to vector<8x128xf32>
    %2 = arith.truncf %1 : vector<8x128xf32> to vector<8x128xbf16>
    %c0_2 = arith.constant 0 : index
    %c0_3 = arith.constant 0 : index
    %c0_4 = arith.constant 0 : index
    %3 = vector.load %arg2[%c0_2, %c0_3, %c0_4] : memref<1x16x128xf32, #tpu.memory_space<vmem>>, vector<1x16x128xf32>
    %4 = vector.shape_cast %3 : vector<1x16x128xf32> to vector<16x128xf32>
    %5 = arith.truncf %4 : vector<16x128xf32> to vector<16x128xbf16>
    %c0_5 = arith.constant 0 : index
    %c0_6 = arith.constant 0 : index
    %c0_7 = arith.constant 0 : index
    %6 = vector.load %arg3[%c0_5, %c0_6, %c0_7] : memref<1x16x128xf32, #tpu.memory_space<vmem>>, vector<1x16x128xf32>
    %7 = vector.shape_cast %6 : vector<1x16x128xf32> to vector<16x128xf32>
    %8 = arith.truncf %7 : vector<16x128xf32> to vector<16x128xbf16>
    %9 = vector.extract_strided_slice %2 {offsets = [0, 0], sizes = [8, 32], strides = [1, 1]} : vector<8x128xbf16> to vector<8x32xbf16>
    %10 = vector.extract_strided_slice %5 {offsets = [0, 0], sizes = [16, 32], strides = [1, 1]} : vector<16x128xbf16> to vector<16x32xbf16>
    %cst = arith.constant dense<0.000000e+00> : vector<8x16xf32>
    %11 = tpu.matmul %9, %10, %cst {dimension_numbers = #tpu.dot_dimension_numbers<[1], [1], [0], [0], [0, 0, 1, 0], [], []>} : vector<8x32xbf16>, vector<16x32xbf16>, vector<8x16xf32> -> vector<8x16xf32>
    %cst_8 = arith.constant 0.176776692 : f32
    %12 = vector.broadcast %cst_8 : f32 to vector<8x16xf32>
    %13 = arith.mulf %11, %12 : vector<8x16xf32>
    %cst_9 = arith.constant dense<0xFF800000> : vector<8xf32>
    %14 = vector.multi_reduction <maximumf>, %13, %cst_9 [1] : vector<8x16xf32> to vector<8xf32>
    %15 = vector.shape_cast %14 : vector<8xf32> to vector<8x1xf32>
    %16 = vector.broadcast %15 : vector<8x1xf32> to vector<8x16xf32>
    %17 = arith.subf %13, %16 : vector<8x16xf32>
    %18 = math.exp %17 : vector<8x16xf32>
    %cst_10 = arith.constant dense<0.000000e+00> : vector<8xf32>
    %19 = vector.multi_reduction <add>, %18, %cst_10 [1] : vector<8x16xf32> to vector<8xf32>
    %20 = vector.shape_cast %19 : vector<8xf32> to vector<8x1xf32>
    %21 = tpu.reciprocal %20 {approx = true} : vector<8x1xf32> -> vector<8x1xf32>
    %22 = vector.broadcast %21 : vector<8x1xf32> to vector<8x16xf32>
    %23 = arith.mulf %18, %22 : vector<8x16xf32>
    %24 = arith.truncf %23 : vector<8x16xf32> to vector<8x16xbf16>
    %25 = vector.extract_strided_slice %8 {offsets = [0, 0], sizes = [16, 32], strides = [1, 1]} : vector<16x128xbf16> to vector<16x32xbf16>
    %cst_11 = arith.constant dense<0.000000e+00> : vector<8x32xf32>
    %26 = tpu.matmul %24, %25, %cst_11 {dimension_numbers = #tpu.dot_dimension_numbers<[1], [0], [0], [1], [0, 0, 1, 1], [], []>} : vector<8x16xbf16>, vector<16x32xbf16>, vector<8x32xf32> -> vector<8x32xf32>
    %27 = vector.extract_strided_slice %2 {offsets = [0, 32], sizes = [8, 32], strides = [1, 1]} : vector<8x128xbf16> to vector<8x32xbf16>
    %28 = vector.extract_strided_slice %5 {offsets = [0, 32], sizes = [16, 32], strides = [1, 1]} : vector<16x128xbf16> to vector<16x32xbf16>
    %cst_12 = arith.constant dense<0.000000e+00> : vector<8x16xf32>
    %29 = tpu.matmul %27, %28, %cst_12 {dimension_numbers = #tpu.dot_dimension_numbers<[1], [1], [0], [0], [0, 0, 1, 0], [], []>} : vector<8x32xbf16>, vector<16x32xbf16>, vector<8x16xf32> -> vector<8x16xf32>
    %cst_13 = arith.constant 0.176776692 : f32
    %30 = vector.broadcast %cst_13 : f32 to vector<8x16xf32>
    %31 = arith.mulf %29, %30 : vector<8x16xf32>
    %cst_14 = arith.constant dense<0xFF800000> : vector<8xf32>
    %32 = vector.multi_reduction <maximumf>, %31, %cst_14 [1] : vector<8x16xf32> to vector<8xf32>
    %33 = vector.shape_cast %32 : vector<8xf32> to vector<8x1xf32>
    %34 = vector.broadcast %33 : vector<8x1xf32> to vector<8x16xf32>
    %35 = arith.subf %31, %34 : vector<8x16xf32>
    %36 = math.exp %35 : vector<8x16xf32>
    %cst_15 = arith.constant dense<0.000000e+00> : vector<8xf32>
    %37 = vector.multi_reduction <add>, %36, %cst_15 [1] : vector<8x16xf32> to vector<8xf32>
    %38 = vector.shape_cast %37 : vector<8xf32> to vector<8x1xf32>
    %39 = tpu.reciprocal %38 {approx = true} : vector<8x1xf32> -> vector<8x1xf32>
    %40 = vector.broadcast %39 : vector<8x1xf32> to vector<8x16xf32>
    %41 = arith.mulf %36, %40 : vector<8x16xf32>
    %42 = arith.truncf %41 : vector<8x16xf32> to vector<8x16xbf16>
    %43 = vector.extract_strided_slice %8 {offsets = [0, 32], sizes = [16, 32], strides = [1, 1]} : vector<16x128xbf16> to vector<16x32xbf16>
    %cst_16 = arith.constant dense<0.000000e+00> : vector<8x32xf32>
    %44 = tpu.matmul %42, %43, %cst_16 {dimension_numbers = #tpu.dot_dimension_numbers<[1], [0], [0], [1], [0, 0, 1, 1], [], []>} : vector<8x16xbf16>, vector<16x32xbf16>, vector<8x32xf32> -> vector<8x32xf32>
    %45 = vector.extract_strided_slice %2 {offsets = [0, 64], sizes = [8, 32], strides = [1, 1]} : vector<8x128xbf16> to vector<8x32xbf16>
    %46 = vector.extract_strided_slice %5 {offsets = [0, 64], sizes = [16, 32], strides = [1, 1]} : vector<16x128xbf16> to vector<16x32xbf16>
    %cst_17 = arith.constant dense<0.000000e+00> : vector<8x16xf32>
    %47 = tpu.matmul %45, %46, %cst_17 {dimension_numbers = #tpu.dot_dimension_numbers<[1], [1], [0], [0], [0, 0, 1, 0], [], []>} : vector<8x32xbf16>, vector<16x32xbf16>, vector<8x16xf32> -> vector<8x16xf32>
    %cst_18 = arith.constant 0.176776692 : f32
    %48 = vector.broadcast %cst_18 : f32 to vector<8x16xf32>
    %49 = arith.mulf %47, %48 : vector<8x16xf32>
    %cst_19 = arith.constant dense<0xFF800000> : vector<8xf32>
    %50 = vector.multi_reduction <maximumf>, %49, %cst_19 [1] : vector<8x16xf32> to vector<8xf32>
    %51 = vector.shape_cast %50 : vector<8xf32> to vector<8x1xf32>
    %52 = vector.broadcast %51 : vector<8x1xf32> to vector<8x16xf32>
    %53 = arith.subf %49, %52 : vector<8x16xf32>
    %54 = math.exp %53 : vector<8x16xf32>
    %cst_20 = arith.constant dense<0.000000e+00> : vector<8xf32>
    %55 = vector.multi_reduction <add>, %54, %cst_20 [1] : vector<8x16xf32> to vector<8xf32>
    %56 = vector.shape_cast %55 : vector<8xf32> to vector<8x1xf32>
    %57 = tpu.reciprocal %56 {approx = true} : vector<8x1xf32> -> vector<8x1xf32>
    %58 = vector.broadcast %57 : vector<8x1xf32> to vector<8x16xf32>
    %59 = arith.mulf %54, %58 : vector<8x16xf32>
    %60 = arith.truncf %59 : vector<8x16xf32> to vector<8x16xbf16>
    %61 = vector.extract_strided_slice %8 {offsets = [0, 64], sizes = [16, 32], strides = [1, 1]} : vector<16x128xbf16> to vector<16x32xbf16>
    %cst_21 = arith.constant dense<0.000000e+00> : vector<8x32xf32>
    %62 = tpu.matmul %60, %61, %cst_21 {dimension_numbers = #tpu.dot_dimension_numbers<[1], [0], [0], [1], [0, 0, 1, 1], [], []>} : vector<8x16xbf16>, vector<16x32xbf16>, vector<8x32xf32> -> vector<8x32xf32>
    %63 = vector.extract_strided_slice %2 {offsets = [0, 96], sizes = [8, 32], strides = [1, 1]} : vector<8x128xbf16> to vector<8x32xbf16>
    %64 = vector.extract_strided_slice %5 {offsets = [0, 96], sizes = [16, 32], strides = [1, 1]} : vector<16x128xbf16> to vector<16x32xbf16>
    %cst_22 = arith.constant dense<0.000000e+00> : vector<8x16xf32>
    %65 = tpu.matmul %63, %64, %cst_22 {dimension_numbers = #tpu.dot_dimension_numbers<[1], [1], [0], [0], [0, 0, 1, 0], [], []>} : vector<8x32xbf16>, vector<16x32xbf16>, vector<8x16xf32> -> vector<8x16xf32>
    %cst_23 = arith.constant 0.176776692 : f32
    %66 = vector.broadcast %cst_23 : f32 to vector<8x16xf32>
    %67 = arith.mulf %65, %66 : vector<8x16xf32>
    %cst_24 = arith.constant dense<0xFF800000> : vector<8xf32>
    %68 = vector.multi_reduction <maximumf>, %67, %cst_24 [1] : vector<8x16xf32> to vector<8xf32>
    %69 = vector.shape_cast %68 : vector<8xf32> to vector<8x1xf32>
    %70 = vector.broadcast %69 : vector<8x1xf32> to vector<8x16xf32>
    %71 = arith.subf %67, %70 : vector<8x16xf32>
    %72 = math.exp %71 : vector<8x16xf32>
    %cst_25 = arith.constant dense<0.000000e+00> : vector<8xf32>
    %73 = vector.multi_reduction <add>, %72, %cst_25 [1] : vector<8x16xf32> to vector<8xf32>
    %74 = vector.shape_cast %73 : vector<8xf32> to vector<8x1xf32>
    %75 = tpu.reciprocal %74 {approx = true} : vector<8x1xf32> -> vector<8x1xf32>
    %76 = vector.broadcast %75 : vector<8x1xf32> to vector<8x16xf32>
    %77 = arith.mulf %72, %76 : vector<8x16xf32>
    %78 = arith.truncf %77 : vector<8x16xf32> to vector<8x16xbf16>
    %79 = vector.extract_strided_slice %8 {offsets = [0, 96], sizes = [16, 32], strides = [1, 1]} : vector<16x128xbf16> to vector<16x32xbf16>
    %cst_26 = arith.constant dense<0.000000e+00> : vector<8x32xf32>
    %80 = tpu.matmul %78, %79, %cst_26 {dimension_numbers = #tpu.dot_dimension_numbers<[1], [0], [0], [1], [0, 0, 1, 1], [], []>} : vector<8x16xbf16>, vector<16x32xbf16>, vector<8x32xf32> -> vector<8x32xf32>
    %81 = tpu.concatenate %26, %44, %62, %80 in 1 : vector<8x32xf32>, vector<8x32xf32>, vector<8x32xf32>, vector<8x32xf32> -> vector<8x128xf32>
    %82 = vector.shape_cast %81 : vector<8x128xf32> to vector<1x8x128xf32>
    %c0_27 = arith.constant 0 : index
    %c0_28 = arith.constant 0 : index
    %c0_29 = arith.constant 0 : index
    %83 = vector.load %arg4[%c0_27, %c0_28, %c0_29] : memref<1x8x128xf32, #tpu.memory_space<vmem>>, vector<1x8x128xf32>
    tpu.vector_store %arg4[%c0_27, %c0_28, %c0_29], %82 {strides = array<i32>} : memref<1x8x128xf32, #tpu.memory_space<vmem>>, vector<1x8x128xf32>,
    return
  }
  func.func @transform_0(%arg0: i32) -> (i32, i32, i32) {
    %c0_i32 = arith.constant 0 : i32
    %c0_i32_0 = arith.constant 0 : i32
    %c0_i32_1 = arith.constant 0 : i32
    return %arg0, %c0_i32, %c0_i32_0 : i32, i32, i32
  }
  func.func @transform_1(%arg0: i32) -> (i32, i32, i32) {
    %c0_i32 = arith.constant 0 : i32
    %c0_i32_0 = arith.constant 0 : i32
    %c0_i32_1 = arith.constant 0 : i32
    %c0_i32_2 = arith.constant 0 : i32
    return %c0_i32, %c0_i32_0, %c0_i32_1 : i32, i32, i32
  }
  func.func @transform_2(%arg0: i32) -> (i32, i32, i32) {
    %c0_i32 = arith.constant 0 : i32
    %c0_i32_0 = arith.constant 0 : i32
    %c1_i32 = arith.constant 1 : i32
    %c0_i32_1 = arith.constant 0 : i32
    return %c0_i32, %c0_i32_0, %c1_i32 : i32, i32, i32
  }
  func.func @transform_3(%arg0: i32) -> (i32, i32, i32) {
    %c0_i32 = arith.constant 0 : i32
    %c0_i32_0 = arith.constant 0 : i32
    %c0_i32_1 = arith.constant 0 : i32
    return %arg0, %c0_i32, %c0_i32_0 : i32, i32, i32
  }
}

module attributes {stable_mosaic.version = 11 : i64} {
  func.func @_linear_kernel(%arg0: i32, %arg1: i32, %arg2: i32, %arg3: memref<16x128xf32, #tpu.memory_space<vmem>>, %arg4: memref<128x128xf32, #tpu.memory_space<vmem>>, %arg5: memref<1x128xf32, #tpu.memory_space<vmem>>, %arg6: memref<16x128xf32, #tpu.memory_space<vmem>>, %arg7: memref<16x128xf32, #tpu.memory_space<vmem>>) attributes {dimension_semantics = [#tpu.dimension_semantics<parallel>, #tpu.dimension_semantics<parallel>, #tpu.dimension_semantics<arbitrary>], iteration_bounds = array<i64: 1, 1, 1>, scalar_prefetch = 0 : i64, scratch_operands = 1 : i64, tpu.core_type = #tpu.core_type<tc>, window_params = [{transform_indices = @transform_0, window_bounds = array<i64: 16, 128>}, {transform_indices = @transform_1, window_bounds = array<i64: 128, 128>}, {transform_indices = @transform_2, window_bounds = array<i64: 1, 128>}, {transform_indices = @transform_3, window_bounds = array<i64: 16, 128>}]} {
    %c0_i32 = arith.constant 0 : i32
    %0 = arith.cmpi eq, %arg2, %c0_i32 : i32
    %1 = arith.extui %0 : i1 to i32
    %c0_i32_0 = arith.constant 0 : i32
    %2 = arith.cmpi ne, %1, %c0_i32_0 : i32
    scf.if %2 {
      %cst_10 = arith.constant 0.000000e+00 : f32
      %14 = vector.broadcast %cst_10 : f32 to vector<16x128xf32>
      %c0_11 = arith.constant 0 : index
      %c0_12 = arith.constant 0 : index
      %15 = vector.load %arg7[%c0_11, %c0_12] : memref<16x128xf32, #tpu.memory_space<vmem>>, vector<16x128xf32>
      tpu.vector_store %arg7[%c0_11, %c0_12], %14 {strides = array<i32>} : memref<16x128xf32, #tpu.memory_space<vmem>>, vector<16x128xf32>,
    } else {
    }
    %c0 = arith.constant 0 : index
    %c0_1 = arith.constant 0 : index
    %3 = vector.load %arg7[%c0, %c0_1] : memref<16x128xf32, #tpu.memory_space<vmem>>, vector<16x128xf32>
    %c0_2 = arith.constant 0 : index
    %c0_3 = arith.constant 0 : index
    %4 = vector.load %arg3[%c0_2, %c0_3] : memref<16x128xf32, #tpu.memory_space<vmem>>, vector<16x128xf32>
    %5 = arith.truncf %4 : vector<16x128xf32> to vector<16x128xbf16>
    %c0_4 = arith.constant 0 : index
    %c0_5 = arith.constant 0 : index
    %6 = vector.load %arg4[%c0_4, %c0_5] : memref<128x128xf32, #tpu.memory_space<vmem>>, vector<128x128xf32>
    %7 = arith.truncf %6 : vector<128x128xf32> to vector<128x128xbf16>
    %cst = arith.constant dense<0.000000e+00> : vector<16x128xf32>
    %8 = tpu.matmul %5, %7, %cst {dimension_numbers = #tpu.dot_dimension_numbers<[1], [0], [0], [1], [0, 0, 1, 1], [], []>} : vector<16x128xbf16>, vector<128x128xbf16>, vector<16x128xf32> -> vector<16x128xf32>
    %9 = arith.addf %3, %8 : vector<16x128xf32>
    %c0_6 = arith.constant 0 : index
    %c0_7 = arith.constant 0 : index
    %10 = vector.load %arg7[%c0_6, %c0_7] : memref<16x128xf32, #tpu.memory_space<vmem>>, vector<16x128xf32>
    tpu.vector_store %arg7[%c0_6, %c0_7], %9 {strides = array<i32>} : memref<16x128xf32, #tpu.memory_space<vmem>>, vector<16x128xf32>,
    %c0_i32_8 = arith.constant 0 : i32
    %11 = arith.cmpi eq, %arg2, %c0_i32_8 : i32
    %12 = arith.extui %11 : i1 to i32
    %c0_i32_9 = arith.constant 0 : i32
    %13 = arith.cmpi ne, %12, %c0_i32_9 : i32
    scf.if %13 {
      %c0_10 = arith.constant 0 : index
      %c0_11 = arith.constant 0 : index
      %14 = vector.load %arg7[%c0_10, %c0_11] : memref<16x128xf32, #tpu.memory_space<vmem>>, vector<16x128xf32>
      %c0_12 = arith.constant 0 : index
      %c0_13 = arith.constant 0 : index
      %15 = vector.load %arg5[%c0_12, %c0_13] : memref<1x128xf32, #tpu.memory_space<vmem>>, vector<1x128xf32>
      %16 = vector.broadcast %15 : vector<1x128xf32> to vector<16x128xf32>
      %17 = arith.addf %14, %16 : vector<16x128xf32>
      %c0_14 = arith.constant 0 : index
      %c0_15 = arith.constant 0 : index
      %18 = vector.load %arg6[%c0_14, %c0_15] : memref<16x128xf32, #tpu.memory_space<vmem>>, vector<16x128xf32>
      tpu.vector_store %arg6[%c0_14, %c0_15], %17 {strides = array<i32>} : memref<16x128xf32, #tpu.memory_space<vmem>>, vector<16x128xf32>,
    } else {
    }
    return
  }
  func.func @transform_0(%arg0: i32, %arg1: i32, %arg2: i32) -> (i32, i32) {
    %c0_i32 = arith.constant 0 : i32
    return %arg0, %arg2 : i32, i32
  }
  func.func @transform_1(%arg0: i32, %arg1: i32, %arg2: i32) -> (i32, i32) {
    %c0_i32 = arith.constant 0 : i32
    return %arg2, %arg1 : i32, i32
  }
  func.func @transform_2(%arg0: i32, %arg1: i32, %arg2: i32) -> (i32, i32) {
    %c0_i32 = arith.constant 0 : i32
    %c0_i32_0 = arith.constant 0 : i32
    return %c0_i32, %arg1 : i32, i32
  }
  func.func @transform_3(%arg0: i32, %arg1: i32, %arg2: i32) -> (i32, i32) {
    %c0_i32 = arith.constant 0 : i32
    return %arg0, %arg1 : i32, i32
  }
}

</mosaic_0001>

<bundles_post_ra>
// kernel: encoder_pca_forward.10
= control target key start
LH: loop header
LB: loop body
LE: loop exit
PB: predicated region body
PF: predicated region fallthrough
CT: control target
= control target key end

     0   :  { %8 = vsyncpa [#allocation4], 0  ;;  %s116_s15 = smov [#allocation3]   ;;  %s117_s17 = smov 128   ;;  %s157_s0 = inlined_call_operand.vmem [shape: f32[16,16], index: 0, kind: input, shape index: {}]   ;;  %s158_s1 = inlined_call_operand.hbm [shape: f32[16,128], index: 1, kind: input, shape index: {}]   ;;  %s159_s2 = inlined_call_operand.vmem [shape: f32[1,128], index: 2, kind: input, shape index: {}]   ;;  %s160_s3 = inlined_call_operand.vmem [shape: f32[16,128], index: 3, kind: output, shape index: {}]  }
   0x1   :  { %s15_s14 = sshll.u32 %s158_s1, 4  ;;  %s17_s16 = sshll.u32 %s116_s15, 4  ;;  %s16_s14 = int_to_ptr.hbm [resolvable:$true] %s15_s14  ;;  %s18_s16 = int_to_ptr.vmem [resolvable:$true] %s17_s16 }
   0x2   :  { %s118_s18 = smov 8  }
   0x3   :  { %23 = dma.hbm_to_vmem [thread:$0]  %s16_s14, 256, %s18_s16, [#allocation4], %s117_s17, %s117_s17, %s118_s18  }
   0x4   :  { %114 = dma.done.wait [#allocation4], 256  }
   0x5   :  { %115 = vsyncadd [#allocation4], 4294967040  ;;  %v42_v0 = vld [vmem:[#allocation3] sm:$0xff]  ;;  %v43_v1 = vld [vmem:[#allocation3 + $0x8] sm:$0xff]  ;;  %vm45_vm0 = vcmask 130048  }
   0x6   :  { %v39_v2 = vld [vmem:[%s157_s0] sm:$0xff]  ;;  %v44_v3 = vpack.c.bf16 %v43_v1, %v42_v0  ;;  %v40_v4 = vld [vmem:[%s157_s0 + $0x8] sm:$0xff] }
   0x7   :  { %v41_v5 = vpack.c.bf16 %v40_v4, %v39_v2  ;;  %v89_v6 = vld [vmem:[%s159_s2] ss:$0 sm:$0xff] }
   0x8   :  { %56 = vmatpush.bf16.msra.mxu0 %v44_v3 }
   0xb   :  { %85 = vmatmul.msk.bf16.vlgmr.msra.gmra.mxu0 %vm45_vm0, %v41_v5 }
  0x88   :  { %v58_v7 = vpop.f32.mrf.mxu0 }
  0x89   :  { %v76_v8 = vadd.f32 %v89_v6, %v58_v7 }
  0x8b   :  { %78 = vst [vmem:[%s160_s3] sm:$0xff] %v76_v8 }
  0x90   :  { %v60_v9 = vpop.f32.mrf.mxu0 }
  0x91   :  { %v77_v10 = vadd.f32 %v89_v6, %v60_v9 }
  0x93   :  { %79 = vst [vmem:[%s160_s3 + $0x8] sm:$0xff] %v77_v10 }
  0x94   :  { %84 = vsyncpa [#allocation4], 1 }

// kernel: encoder_pca_forward.11
= control target key start
LH: loop header
LB: loop body
LE: loop exit
PB: predicated region body
PF: predicated region fallthrough
CT: control target
= control target key end

     0   :  { %8 = vsyncpa [#allocation4], 0  ;;  %s238_s15 = smov [#allocation3]   ;;  %s239_s17 = smov 384   ;;  %s291_s0 = inlined_call_operand.vmem [shape: f32[16,128], index: 0, kind: input, shape index: {}]   ;;  %s292_s1 = inlined_call_operand.hbm [shape: f32[128,384], index: 1, kind: input, shape index: {}]   ;;  %s293_s2 = inlined_call_operand.vmem [shape: f32[1,384], index: 2, kind: input, shape index: {}]   ;;  %s294_s3 = inlined_call_operand.vmem [shape: f32[16,384], index: 3, kind: output, shape index: {}]  }
   0x1   :  { %s15_s14 = sshll.u32 %s292_s1, 4  ;;  %s17_s16 = sshll.u32 %s238_s15, 4  ;;  %s16_s14 = int_to_ptr.hbm [resolvable:$true] %s15_s14  ;;  %s18_s16 = int_to_ptr.vmem [resolvable:$true] %s17_s16 }
   0x2   :  { %s240_s18 = smov 24  }
   0x3   :  { %23 = dma.hbm_to_vmem [thread:$0]  %s16_s14, 6144, %s18_s16, [#allocation4], %s239_s17, %s239_s17, %s240_s18  }
   0x4   :  { %236 = dma.done.wait [#allocation4], 6144  }
   0x5   :  { %237 = vsyncadd [#allocation4], 4294961152  ;;  %v91_v0 = vld [vmem:[#allocation3 + $0x150] sm:$0xff]  ;;  %v94_v1 = vld [vmem:[#allocation3 + $0x168] sm:$0xff] }
   0x6   :  { %v92_v2 = vld [vmem:[#allocation3 + $0x158] sm:$0xff]  ;;  %v118_v3 = vpack.c.bf16 %v94_v1, %v91_v0  ;;  %v95_v4 = vld [vmem:[#allocation3 + $0x170] sm:$0xff]  ;;  %v93_v5 = vld [vmem:[#allocation3 + $0x160] sm:$0xff] }
   0x7   :  { %v96_v6 = vld [vmem:[#allocation3 + $0x178] sm:$0xff]  ;;  %v119_v7 = vpack.c.bf16 %v95_v4, %v92_v2  ;;  %v85_v9 = vld [vmem:[#allocation3 + $0x120] sm:$0xff]  ;;  %v86_v11 = vld [vmem:[#allocation3 + $0x128] sm:$0xff] }
   0x8   :  { %v120_v8 = vpack.c.bf16 %v96_v6, %v93_v5  ;;  %v88_v10 = vld [vmem:[#allocation3 + $0x138] sm:$0xff]  ;;  %121 = vmatpush.bf16.msra.mxu0 %v118_v3  ;;  %v89_v13 = vld [vmem:[#allocation3 + $0x140] sm:$0xff]  ;;  %v87_v14 = vld [vmem:[#allocation3 + $0x130] sm:$0xff] }
   0x9   :  { %v115_v12 = vpack.c.bf16 %v88_v10, %v85_v9  ;;  %v90_v15 = vld [vmem:[#allocation3 + $0x148] sm:$0xff]  ;;  %135 = vmatpush.bf16.msra.mxu1 %v119_v7  ;;  %v116_v16 = vpack.c.bf16 %v89_v13, %v86_v11  ;;  %v79_v18 = vld [vmem:[#allocation3 + $0xf0] sm:$0xff]  ;;  %v80_v20 = vld [vmem:[#allocation3 + $0xf8] sm:$0xff] }
   0xa   :  { %149 = vmatpush.bf16.msra.mxu2 %v120_v8  ;;  %v117_v17 = vpack.c.bf16 %v90_v15, %v87_v14  ;;  %v82_v19 = vld [vmem:[#allocation3 + $0x108] sm:$0xff]  ;;  %v83_v21 = vld [vmem:[#allocation3 + $0x110] sm:$0xff]  ;;  %v81_v22 = vld [vmem:[#allocation3 + $0x100] sm:$0xff] }
   0xb   :  { %v84_v23 = vld [vmem:[#allocation3 + $0x118] sm:$0xff]  ;;  %v112_v24 = vpack.c.bf16 %v82_v19, %v79_v18  ;;  %v113_v25 = vpack.c.bf16 %v83_v21, %v80_v20  ;;  %v73_v27 = vld [vmem:[#allocation3 + $0xc0] sm:$0xff]  ;;  %v74_v29 = vld [vmem:[#allocation3 + $0xc8] sm:$0xff] }
   0xc   :  { %122 = vmatpush.bf16.msra.mxu0 %v115_v12  ;;  %v114_v26 = vpack.c.bf16 %v84_v23, %v81_v22  ;;  %v76_v28 = vld [vmem:[#allocation3 + $0xd8] sm:$0xff]  ;;  %v77_v30 = vld [vmem:[#allocation3 + $0xe0] sm:$0xff]  ;;  %v75_v31 = vld [vmem:[#allocation3 + $0xd0] sm:$0xff] }
   0xd   :  { %136 = vmatpush.bf16.msra.mxu1 %v116_v16  ;;  %v78_v32 = vld [vmem:[#allocation3 + $0xe8] sm:$0xff]  ;;  %v109_v33 = vpack.c.bf16 %v76_v28, %v73_v27  ;;  %v110_v34 = vpack.c.bf16 %v77_v30, %v74_v29  ;;  %v67_v36 = vld [vmem:[#allocation3 + $0x90] sm:$0xff]  ;;  %v68_v38 = vld [vmem:[#allocation3 + $0x98] sm:$0xff] }
   0xe   :  { %150 = vmatpush.bf16.msra.mxu2 %v117_v17  ;;  %v111_v35 = vpack.c.bf16 %v78_v32, %v75_v31  ;;  %v70_v37 = vld [vmem:[#allocation3 + $0xa8] sm:$0xff]  ;;  %v71_v39 = vld [vmem:[#allocation3 + $0xb0] sm:$0xff]  ;;  %v69_v40 = vld [vmem:[#allocation3 + $0xa0] sm:$0xff] }
   0xf   :  { %v72_v41 = vld [vmem:[#allocation3 + $0xb8] sm:$0xff]  ;;  %v106_v42 = vpack.c.bf16 %v70_v37, %v67_v36  ;;  %v107_v43 = vpack.c.bf16 %v71_v39, %v68_v38  ;;  %v61_v45 = vld [vmem:[#allocation3 + $0x60] sm:$0xff]  ;;  %v62_v47 = vld [vmem:[#allocation3 + $0x68] sm:$0xff] }
  0x10   :  { %123 = vmatpush.bf16.msra.mxu0 %v112_v24  ;;  %v108_v44 = vpack.c.bf16 %v72_v41, %v69_v40  ;;  %v64_v46 = vld [vmem:[#allocation3 + $0x78] sm:$0xff]  ;;  %v65_v48 = vld [vmem:[#allocation3 + $0x80] sm:$0xff]  ;;  %v63_v49 = vld [vmem:[#allocation3 + $0x70] sm:$0xff] }
  0x11   :  { %137 = vmatpush.bf16.msra.mxu1 %v113_v25  ;;  %v66_v50 = vld [vmem:[#allocation3 + $0x88] sm:$0xff]  ;;  %v103_v51 = vpack.c.bf16 %v64_v46, %v61_v45  ;;  %v104_v52 = vpack.c.bf16 %v65_v48, %v62_v47  ;;  %v55_v54 = vld [vmem:[#allocation3 + $0x30] sm:$0xff]  ;;  %v56_v56 = vld [vmem:[#allocation3 + $0x38] sm:$0xff] }
  0x12   :  { %151 = vmatpush.bf16.msra.mxu2 %v114_v26  ;;  %v105_v53 = vpack.c.bf16 %v66_v50, %v63_v49  ;;  %v58_v55 = vld [vmem:[#allocation3 + $0x48] sm:$0xff]  ;;  %v59_v57 = vld [vmem:[#allocation3 + $0x50] sm:$0xff]  ;;  %v57_v58 = vld [vmem:[#allocation3 + $0x40] sm:$0xff] }
  0x13   :  { %v60_v59 = vld [vmem:[#allocation3 + $0x58] sm:$0xff]  ;;  %v100_v60 = vpack.c.bf16 %v58_v55, %v55_v54  ;;  %v101_v61 = vpack.c.bf16 %v59_v57, %v56_v56  ;;  %v49_v63 = vld [vmem:[#allocation3] sm:$0xff]  ;;  %v50_v1 = vld [vmem:[#allocation3 + $0x8] sm:$0xff] }
  0x14   :  { %124 = vmatpush.bf16.msra.mxu0 %v109_v33  ;;  %v102_v62 = vpack.c.bf16 %v60_v59, %v57_v58  ;;  %v52_v0 = vld [vmem:[#allocation3 + $0x18] sm:$0xff]  ;;  %v53_v2 = vld [vmem:[#allocation3 + $0x20] sm:$0xff]  ;;  %v51_v3 = vld [vmem:[#allocation3 + $0x10] sm:$0xff] }
  0x15   :  { %138 = vmatpush.bf16.msra.mxu1 %v110_v34  ;;  %v54_v4 = vld [vmem:[#allocation3 + $0x28] sm:$0xff]  ;;  %v97_v5 = vpack.c.bf16 %v52_v0, %v49_v63  ;;  %v46_v6 = vld [vmem:[%s291_s0] sm:$0xff]  ;;  %v98_v8 = vpack.c.bf16 %v53_v2, %v50_v1 }
  0x16   :  { %152 = vmatpush.bf16.msra.mxu2 %v111_v35  ;;  %v47_v7 = vld [vmem:[%s291_s0 + $0x8] sm:$0xff]  ;;  %v99_v9 = vpack.c.bf16 %v54_v4, %v51_v3  ;;  %v184_v11 = vld [vmem:[%s293_s2] sm:$0x7] }
  0x17   :  { %v48_v10 = vpack.c.bf16 %v47_v7, %v46_v6  ;;  %v186_v12 = vperm.slane %v184_v11, 0  ;;  %v187_v13 = vperm.slane %v184_v11, 1  ;;  %v188_v18 = vperm.slane %v184_v11, 2 }
  0x18   :  { %125 = vmatpush.bf16.msra.mxu0 %v106_v42 }
  0x19   :  { %139 = vmatpush.bf16.msra.mxu1 %v107_v43 }
  0x1a   :  { %153 = vmatpush.bf16.msra.mxu2 %v108_v44 }
  0x1c   :  { %126 = vmatpush.bf16.msra.mxu0 %v103_v51 }
  0x1d   :  { %140 = vmatpush.bf16.msra.mxu1 %v104_v52 }
  0x1e   :  { %154 = vmatpush.bf16.msra.mxu2 %v105_v53 }
  0x20   :  { %127 = vmatpush.bf16.msra.mxu0 %v100_v60 }
  0x21   :  { %141 = vmatpush.bf16.msra.mxu1 %v101_v61 }
  0x22   :  { %155 = vmatpush.bf16.msra.mxu2 %v102_v62 }
  0x24   :  { %128 = vmatpush.bf16.msra.mxu0 %v97_v5 }
  0x25   :  { %142 = vmatpush.bf16.msra.mxu1 %v98_v8 }
  0x26   :  { %156 = vmatpush.bf16.msra.mxu2 %v99_v9 }
  0x27   :  { %129 = vmatmul.bf16.vlgmr.msra.gmra.mxu0 %v48_v10 }
  0x28   :  { %143 = vmatmul.bf16.vlgmr.msra.gmra.mxu1 %v48_v10 }
  0x29   :  { %157 = vmatmul.bf16.vlgmr.msra.gmra.mxu2 %v48_v10 }
  0xa4   :  { %v130_v14 = vpop.f32.mrf.mxu0 }
  0xa5   :  { %v192_v15 = vadd.f32 %v186_v12, %v130_v14  ;;  %v144_v16 = vpop.f32.mrf.mxu1 }
  0xa6   :  { %v193_v17 = vadd.f32 %v187_v13, %v144_v16 }
  0xa7   :  { %198 = vst [vmem:[%s294_s3] sm:$0xff] %v192_v15 }
  0xa8   :  { %199 = vst [vmem:[%s294_s3 + $0x8] sm:$0xff] %v193_v17 }
  0xac   :  { %v158_v19 = vpop.f32.mrf.mxu2  ;;  %v132_v21 = vpop.f32.mrf.mxu0 }
  0xad   :  { %v194_v20 = vadd.f32 %v188_v18, %v158_v19  ;;  %v195_v22 = vadd.f32 %v186_v12, %v132_v21  ;;  %v146_v23 = vpop.f32.mrf.mxu1 }
  0xae   :  { %v196_v24 = vadd.f32 %v187_v13, %v146_v23 }
  0xaf   :  { %200 = vst [vmem:[%s294_s3 + $0x10] sm:$0xff] %v194_v20 }
  0xb0   :  { %201 = vst [vmem:[%s294_s3 + $0x18] sm:$0xff] %v195_v22 }
  0xb1   :  { %202 = vst [vmem:[%s294_s3 + $0x20] sm:$0xff] %v196_v24 }
  0xb4   :  { %v160_v25 = vpop.f32.mrf.mxu2 }
  0xb5   :  { %v197_v26 = vadd.f32 %v188_v18, %v160_v25 }
  0xb7   :  { %203 = vst [vmem:[%s294_s3 + $0x28] sm:$0xff] %v197_v26 }
  0xb8   :  { %208 = vsyncpa [#allocation4], 1 }

// kernel: encoder_pca_forward.12
= control target key start
LH: loop header
LB: loop body
LE: loop exit
PB: predicated region body
PF: predicated region fallthrough
CT: control target
= control target key end

     0   :  { %s643_s12 = smov 0   ;;  %s715_s0 = inlined_call_operand.vmem [shape: f32[2,8,384], index: 0, kind: input, shape index: {}, may-alias: {0,1,2}]   ;;  %s716_s1 = inlined_call_operand.vmem [shape: f32[2,8,384], index: 1, kind: input, shape index: {}, may-alias: {0,1,2}]   ;;  %s717_s2 = inlined_call_operand.vmem [shape: f32[2,8,384], index: 2, kind: input, shape index: {}, may-alias: {0,1,2}]   ;;  %s718_s3 = inlined_call_operand.vmem [shape: f32[2,8,128], index: 3, kind: output, shape index: {}]  }
   0x1 LB: > { %s563_s13 = sadd.s32 4294967295, %s618_s12   ;;  %p567_p0 = scmp.ge.s32.totalorder %s618_s12, 1  ;;  %s618_s12 = sphi %s643_s12, %s13_s12  }
   0x2   : > { %p159_p1 = scmp.lt.s32.totalorder %s618_s12, 3 }
   0x4   : > { %p160_p2 = pnand %p567_p0, %p159_p1 }
   0x5   : > { %p194_p3 = scmp.lt.s32.totalorder (!%p160_p2), %s563_s13, 1  ;;  %s620_s21 = smov (!%p160_p2), 64  }
   0x6   : > { %163 = sbr.rel (%p160_p2) target bundleno = 1082 (0x43a), region = 32  ;;  %s621_s22 = smov (!%p160_p2), 32  }
   0x7   : > { %s622_s23 = smov (!%p160_p2), 96  }
   0xb   : > { %s720_s13 = smov (!%p194_p3, %s563_s13), 1  ;;  %vm222_vm0 = vcmask 261120   ;;  %vm243_vm1 = vcmask 64512   ;;  %vm259_vm2 = vcmask 1043456   ;;  %vm469_vm3 = vcmask 523264  }
   0xc   : > { %s654_s14 = smul.u32 24, %s720_s13  ;;  %s571_s27 = sshll.u32 %s720_s13, 3  ;;  %vm471_vm4 = vcmask 785408  }
   0xd   : > { %s214_s30 = scalar_lea.vmem %s718_s3, %s571_s27 }
   0xe   : > { %s519_s17 = scalar_lea.vmem %s716_s1, %s654_s14  ;;  %s198_s20 = scalar_lea.vmem %s715_s0, %s654_s14 }
   0xf   : > { %v572_v0 = vld [vmem:[%s519_s17 + $0x8] sm:$0xff]  ;;  %v216_v3 = vld [vmem:[%s198_s20] sm:$0xff]  ;;  %s523_s26 = scalar_lea.vmem %s717_s2, %s654_s14 }
  0x10   : > { %v219_v1 = vpack.c.bf16 %v572_v0, %v572_v0  ;;  %v217_v4 = vpack.c.bf16 %v216_v3, %v216_v3  ;;  %v573_v23 = vld [vmem:[%s523_s26 + $0x10] sm:$0xff] }
  0x11   : > { %v221_v24 = vpack.c.bf16 %v573_v23, %v573_v23 }
  0x12   : > { %v227_v2 = vsel %vm222_vm0, %v219_v1, 0  ;;  %v282_v5 = vunpack.c.l.b16 %v219_v1  ;;  %v277_v7 = vunpack.c.l.b16 %v217_v4 }
  0x13   : > { %236 = vmatpush.bf16.xpose.msra.mxu0 %v227_v2  ;;  %v261_v25 = vsel %vm259_vm2, %v221_v24, 0  ;;  %v319_v48 = vunpack.c.l.b16 %v221_v24 }
  0x14   : > { %v283_v6 = vpack.c.b16 %v282_v5, %v282_v5  ;;  %v278_v8 = vpack.c.b16 %v277_v7, %v277_v7  ;;  %270 = vmatpush.bf16.msra.mxu1 %v261_v25 }
  0x15   : > { %v320_v49 = vpack.c.b16 %v319_v48, %v319_v48 }
  0x16   : > { %344 = vrot.lane.b32.xlu2 %v283_v6, %s620_s21 }
  0x1a   : > { %574 = vmatmul.msk.bf16.vlgmr.msra.gmra.mxu0 %vm222_vm0, %v217_v4 }
  0x1e   : > { %401 = vrot.lane.b32.xlu2 %v283_v6, %s621_s22 }
  0x26   : > { %342 = vrot.lane.b32.xlu2 %v278_v8, %s620_s21 }
  0x2e   : > { %399 = vrot.lane.b32.xlu2 %v278_v8, %s621_s22 }
  0x70   : > { %v345_v13 = vpop.permute.xlu2 %344 }
  0x71   : > { %v350_v26 = vsel %vm222_vm0, %v345_v13, 0 }
  0x72   : > { %359 = vmatpush.bf16.xpose.msrb.mxu1 %v350_v26 }
  0x78   : > { %v402_v14 = vpop.permute.xlu2 %401 }
  0x79   : > { %v407_v19 = vsel %vm222_vm0, %v402_v14, 0 }
  0x7a   : > { %416 = vmatpush.bf16.xpose.msrb.mxu0 %v407_v19 }
  0x80   : > { %v343_v18 = vpop.permute.xlu2 %342 }
  0x88   : > { %v400_v22 = vpop.permute.xlu2 %399 }
  0x89   : > { %580 = vmatmul.msk.bf16.vlgmr.msrb.gmra.mxu0 %vm222_vm0, %v400_v22 }
  0x97   : > { %v238_v9 = vpop.f32.mrf.mxu0 }
  0x98   : > { %v242_v10 = vmul.f32 0.17677669, %v238_v9 }
  0x9a   : > { %v244_v11 = vsel %vm243_vm1, %v242_v10, -inf }
  0x9b   : > { %245 = vmax.xlane.f32.xlu0 %v244_v11 }
  0x9f   : > { %v240_v12 = vpop.f32.mrf.mxu0 }
  0xaf   : > { %284 = vrot.lane.b32.xlu0 %v283_v6, %s622_s23 }
 0x106   : > { %v418_v33 = vpop.f32.mrf.mxu0 }
 0x107   : > { %v422_v34 = vmul.f32 0.17677669, %v418_v33 }
 0x109   : > { %v423_v35 = vsel %vm243_vm1, %v422_v34, -inf }
 0x10e   : > { %v246_v15 = vpop.xlane.xlu0 %245  ;;  %v420_v36 = vpop.f32.mrf.mxu0 }
 0x10f   : > { %v247_v16 = vsub.f32 %v242_v10, %v246_v15 }
 0x111   : > { %v248_v17 = vmul.f32 1.442695, %v247_v16 }
 0x113   : > { %596 = vpow2.f32 %v248_v17 }
 0x119   : > { %v597_v20 = vpop.eup %596 }
 0x11a   : > { %v250_v21 = vsel %vm243_vm1, %v597_v20, 0.0 }
 0x11b   : > { %251 = vadd.xlane.f32.xlu1 %v250_v21 }
 0x121   : > { %v285_v27 = vpop.permute.xlu0 %284 }
 0x122   : > { %v290_v28 = vsel %vm222_vm0, %v285_v27, 0 }
 0x123   : > { %299 = vmatpush.bf16.xpose.msra.mxu2 %v290_v28 }
 0x134   : > { %279 = vrot.lane.b32.xlu1 %v278_v8, %s622_s23 }
 0x15e   : > { %424 = vmax.xlane.f32.xlu1 %v423_v35 }
 0x18e   : > { %v252_v29 = vpop.xlane.xlu1 %251 }
 0x18f   : > { %598 = vrcp.f32 %v252_v29 }
 0x195   : > { %v599_v30 = vpop.eup %598 }
 0x196   : > { %v254_v31 = vmul.f32 %v599_v30, %v597_v20 }
 0x198   : > { %v255_v32 = vpack.c.bf16 %v254_v31, %v254_v31 }
 0x19a   : > { %575 = vmatmul.msk.bf16.vlgmr.msra.gmra.mxu1 %vm243_vm1, %v255_v32 }
 0x1a6   : > { %v280_v37 = vpop.permute.xlu1 %279 }
 0x1a7   : > { %576 = vmatmul.msk.bf16.vlgmr.msra.gmra.mxu2 %vm222_vm0, %v280_v37 }
 0x1aa   : > { %578 = vmatmul.msk.bf16.vlgmr.msrb.gmra.mxu1 %vm222_vm0, %v343_v18 }
 0x1d1   : > { %v425_v52 = vpop.xlane.xlu1 %424 }
 0x1d2   : > { %v426_v56 = vsub.f32 %v422_v34, %v425_v52 }
 0x1d4   : > { %v427_v58 = vmul.f32 1.442695, %v426_v56 }
 0x217   : > { %v687_v38 = vpop.f32.mrf.mxu1 }
 0x21f   : > { %v274_v39 = vpop.f32.mrf.mxu1 }
 0x227   : > { %v361_v40 = vpop.f32.mrf.mxu1 }
 0x228   : > { %v365_v41 = vmul.f32 0.17677669, %v361_v40 }
 0x22a   : > { %v301_v42 = vpop.f32.mrf.mxu2  ;;  %v366_v43 = vsel %vm243_vm1, %v365_v41, -inf }
 0x22b   : > { %v305_v44 = vmul.f32 0.17677669, %v301_v42  ;;  %367 = vmax.xlane.f32.xlu2 %v366_v43 }
 0x22d   : > { %v306_v45 = vsel %vm243_vm1, %v305_v44, -inf }
 0x22e   : > { %307 = vmax.xlane.f32.xlu0 %v306_v45 }
 0x22f   : > { %v363_v46 = vpop.f32.mrf.mxu1 }
 0x232   : > { %v303_v47 = vpop.f32.mrf.mxu2 }
 0x243   : > { %321 = vrot.lane.b32.xlu2 %v320_v49, %s622_s23 }
 0x29e   : > { %v368_v50 = vpop.xlane.xlu2 %367 }
 0x29f   : > { %v369_v51 = vsub.f32 %v365_v41, %v368_v50 }
 0x2a1   : > { %v370_v53 = vmul.f32 1.442695, %v369_v51  ;;  %v308_v54 = vpop.xlane.xlu0 %307 }
 0x2a2   : > { %v309_v55 = vsub.f32 %v305_v44, %v308_v54 }
 0x2a3   : > { %600 = vpow2.f32 %v370_v53 }
 0x2a4   : > { %v310_v57 = vmul.f32 1.442695, %v309_v55 }
 0x2a6   : > { %602 = vpow2.f32 %v310_v57  ;;  %v322_v1 = vpop.permute.xlu2 %321 }
 0x2a7   : > { %604 = vpow2.f32 %v427_v58  ;;  %v327_v2 = vsel %vm259_vm2, %v322_v1, 0 }
 0x2a8   : > { %336 = vmatpush.bf16.msra.mxu3 %v327_v2 }
 0x2a9   : > { %v601_v59 = vpop.eup %600 }
 0x2aa   : > { %v372_v60 = vsel %vm243_vm1, %v601_v59, 0.0 }
 0x2ab   : > { %373 = vadd.xlane.f32.xlu1 %v372_v60 }
 0x2ac   : > { %v603_v61 = vpop.eup %602 }
 0x2ad   : > { %v312_v62 = vsel %vm243_vm1, %v603_v61, 0.0  ;;  %v605_v63 = vpop.eup %604 }
 0x2ae   : > { %313 = vadd.xlane.f32.xlu0 %v312_v62  ;;  %v429_v0 = vsel %vm243_vm1, %v605_v63, 0.0 }
 0x2b6   : > { %430 = vadd.xlane.f32.xlu0 %v429_v0 }
 0x2c4   : > { %378 = vrot.lane.b32.xlu1 %v320_v49, %s620_s21 }
 0x2ca   : > { %435 = vrot.lane.b32.xlu0 %v320_v49, %s621_s22 }
 0x31e   : > { %v374_v6 = vpop.xlane.xlu1 %373 }
 0x321   : > { %v314_v3 = vpop.xlane.xlu0 %313 }
 0x322   : > { %606 = vrcp.f32 %v314_v3 }
 0x323   : > { %608 = vrcp.f32 %v374_v6 }
 0x328   : > { %v607_v4 = vpop.eup %606 }
 0x329   : > { %v316_v5 = vmul.f32 %v607_v4, %v603_v61  ;;  %v431_v8 = vpop.xlane.xlu0 %430  ;;  %v609_v9 = vpop.eup %608 }
 0x32a   : > { %610 = vrcp.f32 %v431_v8  ;;  %v376_v11 = vmul.f32 %v609_v9, %v601_v59 }
 0x32b   : > { %v317_v7 = vpack.c.bf16 %v316_v5, %v316_v5 }
 0x32c   : > { %v377_v15 = vpack.c.bf16 %v376_v11, %v376_v11 }
 0x32d   : > { %577 = vmatmul.msk.bf16.vlgmr.msra.gmra.mxu3 %vm243_vm1, %v317_v7 }
 0x330   : > { %v611_v13 = vpop.eup %610 }
 0x331   : > { %v433_v14 = vmul.f32 %v611_v13, %v605_v63 }
 0x333   : > { %v434_v18 = vpack.c.bf16 %v433_v14, %v433_v14 }
 0x336   : > { %v379_v10 = vpop.permute.xlu1 %378 }
 0x337   : > { %v384_v12 = vsel %vm259_vm2, %v379_v10, 0 }
 0x338   : > { %393 = vmatpush.bf16.msrb.mxu3 %v384_v12 }
 0x33c   : > { %v436_v16 = vpop.permute.xlu0 %435 }
 0x33d   : > { %579 = vmatmul.msk.bf16.vlgmr.msrb.gmra.mxu3 %vm243_vm1, %v377_v15  ;;  %v441_v17 = vsel %vm259_vm2, %v436_v16, 0 }
 0x33e   : > { %450 = vmatpush.bf16.msrb.mxu2 %v441_v17 }
 0x341   : > { %581 = vmatmul.msk.bf16.vlgmr.msrb.gmra.mxu2 %vm243_vm1, %v434_v18 }
 0x3b0   : > { %v338_v19 = vpop.f32.mrf.mxu3 }
 0x3b1   : > { %457 = vrot.lane.b32.xlu2 %v338_v19, %s621_s22 }
 0x3b8   : > { %v340_v20 = vpop.f32.mrf.mxu3 }
 0x3c0   : > { %v395_v21 = vpop.f32.mrf.mxu3 }
 0x3c1   : > { %461 = vrot.lane.b32.xlu2 %v395_v21, %s620_s21 }
 0x3c4   : > { %v452_v22 = vpop.f32.mrf.mxu2 }
 0x3c5   : > { %465 = vrot.lane.b32.xlu0 %v452_v22, %s622_s23 }
 0x3c8   : > { %v397_v23 = vpop.f32.mrf.mxu3 }
 0x3cc   : > { %v454_v24 = vpop.f32.mrf.mxu2 }
 0x40b   : > { %v458_v25 = vpop.permute.xlu2 %457 }
 0x40c   : > { %v468_v27 = vsel %vm222_vm0, %v687_v38, %v458_v25 }
 0x41b   : > { %v462_v26 = vpop.permute.xlu2 %461 }
 0x41c   : > { %v470_v28 = vsel %vm469_vm3, %v468_v27, %v462_v26 }
 0x437   : > { %v466_v29 = vpop.permute.xlu0 %465 }
 0x438   : > { %v472_v30 = vsel %vm471_vm4, %v470_v28, %v466_v29 }
 0x439   : > { %473 = vst [vmem:[%s214_s30] sm:$0xff] %v472_v30 }
 0x43a PF: > { %s13_s12 = sadd.s32 1, %s618_s12  }
 0x43b   : > { %p10_p4 = scmp.ge.s32.totalorder %s13_s12, 4  }
 0x43d   :  { %12 = sbr.rel (!%p10_p4) target bundleno = 1 (0x1), region = 68 }

// kernel: encoder_pca_forward.13
= control target key start
LH: loop header
LB: loop body
LE: loop exit
PB: predicated region body
PF: predicated region fallthrough
CT: control target
= control target key end

     0   :  { %v166_v36 = vmov 128.0   ;;  %s277_s1 = inlined_call_operand.vmem [shape: f32[128,128], index: 1, kind: input, shape index: {}]   ;;  %s278_s2 = inlined_call_operand.vmem [shape: f32[1,128], index: 2, kind: input, shape index: {}]   ;;  %s279_s0 = inlined_call_operand.vmem [shape: f32[16,128], index: 0, kind: input, shape index: {}]   ;;  %s280_s3 = inlined_call_operand.vmem [shape: f32[16,128], index: 3, kind: input, shape index: {}]   ;;  %s281_s4 = inlined_call_operand.vmem [shape: f32[1,128], index: 4, kind: input, shape index: {}]   ;;  %s282_s5 = inlined_call_operand.vmem [shape: f32[1,128], index: 5, kind: input, shape index: {}]   ;;  %s283_s6 = inlined_call_operand.vmem [shape: f32[16,128], index: 6, kind: output, shape index: {}]  }
   0x1   :  { %v48_v0 = vld [vmem:[%s277_s1 + $0x70] sm:$0xff]  ;;  %v49_v1 = vld [vmem:[%s277_s1 + $0x78] sm:$0xff]  ;;  %v46_v2 = vld [vmem:[%s277_s1 + $0x60] sm:$0xff]  ;;  %160 = vrcp.f32 %v166_v36 }
   0x2   :  { %v57_v3 = vpack.c.bf16 %v49_v1, %v48_v0  ;;  %v47_v4 = vld [vmem:[%s277_s1 + $0x68] sm:$0xff]  ;;  %v44_v6 = vld [vmem:[%s277_s1 + $0x50] sm:$0xff]  ;;  %v45_v7 = vld [vmem:[%s277_s1 + $0x58] sm:$0xff] }
   0x3   :  { %v56_v5 = vpack.c.bf16 %v47_v4, %v46_v2  ;;  %v55_v8 = vpack.c.bf16 %v45_v7, %v44_v6  ;;  %v42_v9 = vld [vmem:[%s277_s1 + $0x40] sm:$0xff]  ;;  %v43_v10 = vld [vmem:[%s277_s1 + $0x48] sm:$0xff]  ;;  %v40_v12 = vld [vmem:[%s277_s1 + $0x30] sm:$0xff] }
   0x4   :  { %58 = vmatpush.bf16.msra.mxu0 %v57_v3  ;;  %v54_v11 = vpack.c.bf16 %v43_v10, %v42_v9  ;;  %v41_v13 = vld [vmem:[%s277_s1 + $0x38] sm:$0xff]  ;;  %v38_v15 = vld [vmem:[%s277_s1 + $0x20] sm:$0xff]  ;;  %v39_v16 = vld [vmem:[%s277_s1 + $0x28] sm:$0xff] }
   0x5   :  { %v53_v14 = vpack.c.bf16 %v41_v13, %v40_v12  ;;  %v52_v17 = vpack.c.bf16 %v39_v16, %v38_v15  ;;  %v36_v18 = vld [vmem:[%s277_s1 + $0x10] sm:$0xff]  ;;  %v37_v19 = vld [vmem:[%s277_s1 + $0x18] sm:$0xff]  ;;  %v34_v21 = vld [vmem:[%s277_s1] sm:$0xff] }
   0x6   :  { %v51_v20 = vpack.c.bf16 %v37_v19, %v36_v18  ;;  %v35_v22 = vld [vmem:[%s277_s1 + $0x8] sm:$0xff]  ;;  %v31_v24 = vld [vmem:[%s279_s0] sm:$0xff] }
   0x7   :  { %v50_v23 = vpack.c.bf16 %v35_v22, %v34_v21  ;;  %v32_v25 = vld [vmem:[%s279_s0 + $0x8] sm:$0xff]  ;;  %v157_v27 = vld [vmem:[%s278_s2] ss:$0 sm:$0xff]  ;;  %v161_v37 = vpop.eup %160 }
   0x8   :  { %59 = vmatpush.bf16.msra.mxu0 %v56_v5  ;;  %v33_v26 = vpack.c.bf16 %v32_v25, %v31_v24  ;;  %v87_v29 = vld [vmem:[%s280_s3] sm:$0xff]  ;;  %v88_v33 = vld [vmem:[%s280_s3 + $0x8] sm:$0xff]  ;;  %v96_v38 = vmul.f32 128.0, %v161_v37  ;;  %vm100_vm0 = vweird.f32 %v161_v37 }
   0x9   :  { %v158_v1 = vld [vmem:[%s281_s4] ss:$0 sm:$0xff] }
   0xa   :  { %v97_v39 = vsub.f32 1.0, %v96_v38  ;;  %v159_v4 = vld [vmem:[%s282_s5] ss:$0 sm:$0xff] }
   0xc   :  { %60 = vmatpush.bf16.msra.mxu0 %v55_v8  ;;  %v98_v40 = vmul.f32 %v161_v37, %v97_v39 }
   0xe   :  { %v99_v41 = vadd.f32 %v161_v37, %v98_v40 }
  0x10   :  { %61 = vmatpush.bf16.msra.mxu0 %v54_v11  ;;  %v101_v42 = vsel %vm100_vm0, %v161_v37, %v99_v41 }
  0x14   :  { %62 = vmatpush.bf16.msra.mxu0 %v53_v14 }
  0x18   :  { %63 = vmatpush.bf16.msra.mxu0 %v52_v17 }
  0x1c   :  { %64 = vmatpush.bf16.msra.mxu0 %v51_v20 }
  0x20   :  { %65 = vmatpush.bf16.msra.mxu0 %v50_v23 }
  0x23   :  { %66 = vmatmul.bf16.vlgmr.msra.gmra.mxu0 %v33_v26 }
  0xa0   :  { %v67_v28 = vpop.f32.mrf.mxu0 }
  0xa1   :  { %v85_v30 = vadd.f32 %v157_v27, %v67_v28 }
  0xa3   :  { %v89_v31 = vadd.f32 %v87_v29, %v85_v30 }
  0xa5   :  { %91 = vadd.xlane.f32.xlu0 %v89_v31 }
  0xa8   :  { %v69_v32 = vpop.f32.mrf.mxu0 }
  0xa9   :  { %v86_v34 = vadd.f32 %v157_v27, %v69_v32 }
  0xab   :  { %v90_v35 = vadd.f32 %v88_v33, %v86_v34 }
  0xad   :  { %93 = vadd.xlane.f32.xlu0 %v90_v35 }
 0x118   :  { %v92_v43 = vpop.xlane.xlu0 %91 }
 0x119   :  { %v102_v44 = vmul.f32 %v101_v42, %v92_v43 }
 0x11b   :  { %v104_v45 = vsub.f32 %v89_v31, %v102_v44 }
 0x11d   :  { %v106_v46 = vmul.f32 %v104_v45, %v104_v45 }
 0x11f   :  { %108 = vadd.xlane.f32.xlu1 %v106_v46 }
 0x120   :  { %v94_v47 = vpop.xlane.xlu0 %93 }
 0x121   :  { %v103_v48 = vmul.f32 %v101_v42, %v94_v47 }
 0x123   :  { %v105_v49 = vsub.f32 %v90_v35, %v103_v48 }
 0x125   :  { %v107_v50 = vmul.f32 %v105_v49, %v105_v49 }
 0x127   :  { %110 = vadd.xlane.f32.xlu1 %v107_v50 }
 0x192   :  { %v109_v51 = vpop.xlane.xlu1 %108 }
 0x193   :  { %v112_v52 = vmul.f32 %v109_v51, %v101_v42 }
 0x195   :  { %v114_v53 = vadd.f32 1e-05, %v112_v52 }
 0x197   :  { %162 = vrsqrt.f32 %v114_v53  ;;  %vm122_vm2 = vweird.f32 %v114_v53 }
 0x19a   :  { %v111_v54 = vpop.xlane.xlu1 %110 }
 0x19b   :  { %v113_v55 = vmul.f32 %v111_v54, %v101_v42 }
 0x19d   :  { %v163_v56 = vpop.eup %162  ;;  %v115_v57 = vadd.f32 1e-05, %v113_v55 }
 0x19e   :  { %v117_v58 = vmul.f32 %v163_v56, %v114_v53  ;;  %vm123_vm1 = vweird.f32 %v163_v56 }
 0x19f   :  { %164 = vrsqrt.f32 %v115_v57  ;;  %vm124_vm3 = vmor %vm122_vm2, %vm123_vm1  ;;  %vm132_vm5 = vweird.f32 %v115_v57 }
 0x1a0   :  { %v118_v59 = vmul.f32 %v163_v56, %v117_v58 }
 0x1a2   :  { %v119_v60 = vmul.f32 0.5, %v118_v59 }
 0x1a4   :  { %v120_v61 = vsub.f32 1.5, %v119_v60 }
 0x1a5   :  { %v165_v62 = vpop.eup %164 }
 0x1a6   :  { %v121_v63 = vmul.f32 %v163_v56, %v120_v61  ;;  %v127_v0 = vmul.f32 %v165_v62, %v115_v57  ;;  %vm133_vm4 = vweird.f32 %v165_v62 }
 0x1a7   :  { %vm134_vm6 = vmor %vm132_vm5, %vm133_vm4 }
 0x1a8   :  { %v125_v2 = vsel %vm124_vm3, %v163_v56, %v121_v63  ;;  %v128_v3 = vmul.f32 %v165_v62, %v127_v0 }
 0x1a9   :  { %v136_v5 = vmul.f32 %v125_v2, %v104_v45 }
 0x1aa   :  { %v129_v6 = vmul.f32 0.5, %v128_v3 }
 0x1ab   :  { %v142_v7 = vmul.f32 %v158_v1, %v136_v5 }
 0x1ac   :  { %v130_v8 = vsub.f32 1.5, %v129_v6 }
 0x1ad   :  { %v148_v9 = vadd.f32 %v159_v4, %v142_v7 }
 0x1ae   :  { %v131_v10 = vmul.f32 %v165_v62, %v130_v8 }
 0x1af   :  { %150 = vst [vmem:[%s283_s6] sm:$0xff] %v148_v9 }
 0x1b0   :  { %v135_v11 = vsel %vm134_vm6, %v165_v62, %v131_v10 }
 0x1b1   :  { %v137_v12 = vmul.f32 %v135_v11, %v105_v49 }
 0x1b3   :  { %v143_v13 = vmul.f32 %v158_v1, %v137_v12 }
 0x1b5   :  { %v149_v14 = vadd.f32 %v159_v4, %v143_v13 }
 0x1b7   :  { %151 = vst [vmem:[%s283_s6 + $0x8] sm:$0xff] %v149_v14 }

// kernel: encoder_pca_forward.14
= control target key start
LH: loop header
LB: loop body
LE: loop exit
PB: predicated region body
PF: predicated region fallthrough
CT: control target
= control target key end

     0   :  { %s279_s1 = inlined_call_operand.vmem [shape: f32[128,256], index: 1, kind: input, shape index: {}]   ;;  %s280_s0 = inlined_call_operand.vmem [shape: f32[16,128], index: 0, kind: input, shape index: {}]   ;;  %s281_s2 = inlined_call_operand.vmem [shape: f32[1,256], index: 2, kind: input, shape index: {}]   ;;  %s282_s3 = inlined_call_operand.vmem [shape: f32[16,256], index: 3, kind: output, shape index: {}]  }
   0x1   :  { %v57_v0 = vld [vmem:[%s279_s1 + $0xe0] sm:$0xff]  ;;  %v59_v1 = vld [vmem:[%s279_s1 + $0xf0] sm:$0xff]  ;;  %v58_v2 = vld [vmem:[%s279_s1 + $0xe8] sm:$0xff] }
   0x2   :  { %v75_v3 = vpack.c.bf16 %v59_v1, %v57_v0  ;;  %v60_v4 = vld [vmem:[%s279_s1 + $0xf8] sm:$0xff]  ;;  %v53_v5 = vld [vmem:[%s279_s1 + $0xc0] sm:$0xff]  ;;  %v55_v6 = vld [vmem:[%s279_s1 + $0xd0] sm:$0xff] }
   0x3   :  { %v76_v7 = vpack.c.bf16 %v60_v4, %v58_v2  ;;  %v54_v8 = vld [vmem:[%s279_s1 + $0xc8] sm:$0xff]  ;;  %v56_v9 = vld [vmem:[%s279_s1 + $0xd8] sm:$0xff]  ;;  %v73_v10 = vpack.c.bf16 %v55_v6, %v53_v5  ;;  %v49_v12 = vld [vmem:[%s279_s1 + $0xa0] sm:$0xff] }
   0x4   :  { %77 = vmatpush.bf16.msra.mxu0 %v75_v3  ;;  %v74_v11 = vpack.c.bf16 %v56_v9, %v54_v8  ;;  %v51_v13 = vld [vmem:[%s279_s1 + $0xb0] sm:$0xff]  ;;  %v50_v14 = vld [vmem:[%s279_s1 + $0xa8] sm:$0xff]  ;;  %v52_v15 = vld [vmem:[%s279_s1 + $0xb8] sm:$0xff] }
   0x5   :  { %91 = vmatpush.bf16.msra.mxu1 %v76_v7  ;;  %v71_v16 = vpack.c.bf16 %v51_v13, %v49_v12  ;;  %v72_v17 = vpack.c.bf16 %v52_v15, %v50_v14  ;;  %v45_v18 = vld [vmem:[%s279_s1 + $0x80] sm:$0xff]  ;;  %v47_v19 = vld [vmem:[%s279_s1 + $0x90] sm:$0xff]  ;;  %v46_v20 = vld [vmem:[%s279_s1 + $0x88] sm:$0xff] }
   0x6   :  { %v48_v21 = vld [vmem:[%s279_s1 + $0x98] sm:$0xff]  ;;  %v69_v22 = vpack.c.bf16 %v47_v19, %v45_v18  ;;  %v41_v24 = vld [vmem:[%s279_s1 + $0x60] sm:$0xff]  ;;  %v43_v25 = vld [vmem:[%s279_s1 + $0x70] sm:$0xff] }
   0x7   :  { %v70_v23 = vpack.c.bf16 %v48_v21, %v46_v20  ;;  %v42_v26 = vld [vmem:[%s279_s1 + $0x68] sm:$0xff]  ;;  %v44_v27 = vld [vmem:[%s279_s1 + $0x78] sm:$0xff]  ;;  %v67_v28 = vpack.c.bf16 %v43_v25, %v41_v24  ;;  %v37_v30 = vld [vmem:[%s279_s1 + $0x40] sm:$0xff] }
   0x8   :  { %78 = vmatpush.bf16.msra.mxu0 %v73_v10  ;;  %v68_v29 = vpack.c.bf16 %v44_v27, %v42_v26  ;;  %v39_v31 = vld [vmem:[%s279_s1 + $0x50] sm:$0xff]  ;;  %v38_v32 = vld [vmem:[%s279_s1 + $0x48] sm:$0xff]  ;;  %v40_v33 = vld [vmem:[%s279_s1 + $0x58] sm:$0xff] }
   0x9   :  { %92 = vmatpush.bf16.msra.mxu1 %v74_v11  ;;  %v65_v34 = vpack.c.bf16 %v39_v31, %v37_v30  ;;  %v66_v35 = vpack.c.bf16 %v40_v33, %v38_v32  ;;  %v33_v36 = vld [vmem:[%s279_s1 + $0x20] sm:$0xff]  ;;  %v35_v37 = vld [vmem:[%s279_s1 + $0x30] sm:$0xff]  ;;  %v34_v38 = vld [vmem:[%s279_s1 + $0x28] sm:$0xff] }
   0xa   :  { %v36_v39 = vld [vmem:[%s279_s1 + $0x38] sm:$0xff]  ;;  %v63_v40 = vpack.c.bf16 %v35_v37, %v33_v36  ;;  %v29_v42 = vld [vmem:[%s279_s1] sm:$0xff]  ;;  %v31_v43 = vld [vmem:[%s279_s1 + $0x10] sm:$0xff] }
   0xb   :  { %v64_v41 = vpack.c.bf16 %v36_v39, %v34_v38  ;;  %v30_v44 = vld [vmem:[%s279_s1 + $0x8] sm:$0xff]  ;;  %v32_v45 = vld [vmem:[%s279_s1 + $0x18] sm:$0xff]  ;;  %v61_v46 = vpack.c.bf16 %v31_v43, %v29_v42  ;;  %v26_v47 = vld [vmem:[%s280_s0] sm:$0xff] }
   0xc   :  { %79 = vmatpush.bf16.msra.mxu0 %v71_v16  ;;  %v27_v48 = vld [vmem:[%s280_s0 + $0x8] sm:$0xff]  ;;  %v62_v49 = vpack.c.bf16 %v32_v45, %v30_v44  ;;  %v120_v51 = vld [vmem:[%s281_s2] sm:$0x3] }
   0xd   :  { %93 = vmatpush.bf16.msra.mxu1 %v72_v17  ;;  %v28_v50 = vpack.c.bf16 %v27_v48, %v26_v47  ;;  %v122_v52 = vperm.slane %v120_v51, 0  ;;  %v123_v53 = vperm.slane %v120_v51, 1 }
  0x10   :  { %80 = vmatpush.bf16.msra.mxu0 %v69_v22 }
  0x11   :  { %94 = vmatpush.bf16.msra.mxu1 %v70_v23 }
  0x14   :  { %81 = vmatpush.bf16.msra.mxu0 %v67_v28 }
  0x15   :  { %95 = vmatpush.bf16.msra.mxu1 %v68_v29 }
  0x18   :  { %82 = vmatpush.bf16.msra.mxu0 %v65_v34 }
  0x19   :  { %96 = vmatpush.bf16.msra.mxu1 %v66_v35 }
  0x1c   :  { %83 = vmatpush.bf16.msra.mxu0 %v63_v40 }
  0x1d   :  { %97 = vmatpush.bf16.msra.mxu1 %v64_v41 }
  0x20   :  { %84 = vmatpush.bf16.msra.mxu0 %v61_v46 }
  0x21   :  { %98 = vmatpush.bf16.msra.mxu1 %v62_v49 }
  0x23   :  { %85 = vmatmul.bf16.vlgmr.msra.gmra.mxu0 %v28_v50 }
  0x24   :  { %99 = vmatmul.bf16.vlgmr.msra.gmra.mxu1 %v28_v50 }
  0xa0   :  { %v86_v54 = vpop.f32.mrf.mxu0 }
  0xa1   :  { %v126_v55 = vadd.f32 %v122_v52, %v86_v54  ;;  %v100_v56 = vpop.f32.mrf.mxu1 }
  0xa2   :  { %v127_v57 = vadd.f32 %v123_v53, %v100_v56 }
  0xa3   :  { %v130_v58 = vmax.f32 %v126_v55, 0.0 }
  0xa4   :  { %v131_v59 = vmax.f32 %v127_v57, 0.0 }
  0xa5   :  { %134 = vst [vmem:[%s282_s3] sm:$0xff] %v130_v58 }
  0xa6   :  { %135 = vst [vmem:[%s282_s3 + $0x8] sm:$0xff] %v131_v59 }
  0xa8   :  { %v88_v60 = vpop.f32.mrf.mxu0 }
  0xa9   :  { %v128_v61 = vadd.f32 %v122_v52, %v88_v60  ;;  %v102_v62 = vpop.f32.mrf.mxu1 }
  0xaa   :  { %v129_v63 = vadd.f32 %v123_v53, %v102_v62 }
  0xab   :  { %v132_v0 = vmax.f32 %v128_v61, 0.0 }
  0xac   :  { %v133_v1 = vmax.f32 %v129_v63, 0.0 }
  0xad   :  { %136 = vst [vmem:[%s282_s3 + $0x10] sm:$0xff] %v132_v0 }
  0xae   :  { %137 = vst [vmem:[%s282_s3 + $0x18] sm:$0xff] %v133_v1 }

// kernel: encoder_pca_forward.16
= control target key start
LH: loop header
LB: loop body
LE: loop exit
PB: predicated region body
PF: predicated region fallthrough
CT: control target
= control target key end

     0   :  { %s168_s1 = inlined_call_operand.vmem [shape: f32[128,128], index: 1, kind: input, shape index: {}]   ;;  %s169_s2 = inlined_call_operand.vmem [shape: f32[1,128], index: 2, kind: input, shape index: {}]   ;;  %s170_s0 = inlined_call_operand.vmem [shape: f32[16,128], index: 0, kind: input, shape index: {}]   ;;  %s171_s3 = inlined_call_operand.vmem [shape: f32[16,128], index: 3, kind: output, shape index: {}]  }
   0x1   :  { %v39_v0 = vld [vmem:[%s168_s1 + $0x70] sm:$0xff]  ;;  %v40_v1 = vld [vmem:[%s168_s1 + $0x78] sm:$0xff]  ;;  %v37_v2 = vld [vmem:[%s168_s1 + $0x60] sm:$0xff] }
   0x2   :  { %v48_v3 = vpack.c.bf16 %v40_v1, %v39_v0  ;;  %v38_v4 = vld [vmem:[%s168_s1 + $0x68] sm:$0xff]  ;;  %v35_v6 = vld [vmem:[%s168_s1 + $0x50] sm:$0xff]  ;;  %v36_v7 = vld [vmem:[%s168_s1 + $0x58] sm:$0xff] }
   0x3   :  { %v47_v5 = vpack.c.bf16 %v38_v4, %v37_v2  ;;  %v46_v8 = vpack.c.bf16 %v36_v7, %v35_v6  ;;  %v33_v9 = vld [vmem:[%s168_s1 + $0x40] sm:$0xff]  ;;  %v34_v10 = vld [vmem:[%s168_s1 + $0x48] sm:$0xff]  ;;  %v31_v12 = vld [vmem:[%s168_s1 + $0x30] sm:$0xff] }
   0x4   :  { %49 = vmatpush.bf16.msra.mxu0 %v48_v3  ;;  %v45_v11 = vpack.c.bf16 %v34_v10, %v33_v9  ;;  %v32_v13 = vld [vmem:[%s168_s1 + $0x38] sm:$0xff]  ;;  %v29_v15 = vld [vmem:[%s168_s1 + $0x20] sm:$0xff]  ;;  %v30_v16 = vld [vmem:[%s168_s1 + $0x28] sm:$0xff] }
   0x5   :  { %v44_v14 = vpack.c.bf16 %v32_v13, %v31_v12  ;;  %v43_v17 = vpack.c.bf16 %v30_v16, %v29_v15  ;;  %v27_v18 = vld [vmem:[%s168_s1 + $0x10] sm:$0xff]  ;;  %v28_v19 = vld [vmem:[%s168_s1 + $0x18] sm:$0xff]  ;;  %v25_v21 = vld [vmem:[%s168_s1] sm:$0xff] }
   0x6   :  { %v42_v20 = vpack.c.bf16 %v28_v19, %v27_v18  ;;  %v26_v22 = vld [vmem:[%s168_s1 + $0x8] sm:$0xff]  ;;  %v22_v24 = vld [vmem:[%s170_s0] sm:$0xff] }
   0x7   :  { %v41_v23 = vpack.c.bf16 %v26_v22, %v25_v21  ;;  %v23_v25 = vld [vmem:[%s170_s0 + $0x8] sm:$0xff]  ;;  %v84_v27 = vld [vmem:[%s169_s2] ss:$0 sm:$0xff] }
   0x8   :  { %50 = vmatpush.bf16.msra.mxu0 %v47_v5  ;;  %v24_v26 = vpack.c.bf16 %v23_v25, %v22_v24 }
   0xc   :  { %51 = vmatpush.bf16.msra.mxu0 %v46_v8 }
  0x10   :  { %52 = vmatpush.bf16.msra.mxu0 %v45_v11 }
  0x14   :  { %53 = vmatpush.bf16.msra.mxu0 %v44_v14 }
  0x18   :  { %54 = vmatpush.bf16.msra.mxu0 %v43_v17 }
  0x1c   :  { %55 = vmatpush.bf16.msra.mxu0 %v42_v20 }
  0x20   :  { %56 = vmatpush.bf16.msra.mxu0 %v41_v23 }
  0x23   :  { %57 = vmatmul.bf16.vlgmr.msra.gmra.mxu0 %v24_v26 }
  0xa0   :  { %v58_v28 = vpop.f32.mrf.mxu0 }
  0xa1   :  { %v76_v29 = vadd.f32 %v84_v27, %v58_v28 }
  0xa3   :  { %78 = vst [vmem:[%s171_s3] sm:$0xff] %v76_v29 }
  0xa8   :  { %v60_v30 = vpop.f32.mrf.mxu0 }
  0xa9   :  { %v77_v31 = vadd.f32 %v84_v27, %v60_v30 }
  0xab   :  { %79 = vst [vmem:[%s171_s3 + $0x8] sm:$0xff] %v77_v31 }

// kernel: encoder_pca_forward.15
= control target key start
LH: loop header
LB: loop body
LE: loop exit
PB: predicated region body
PF: predicated region fallthrough
CT: control target
= control target key end

     0   :  { %s372_s1 = inlined_call_operand.vmem [shape: f32[256,128], index: 1, kind: input, shape index: {}]   ;;  %s373_s0 = inlined_call_operand.vmem [shape: f32[16,256], index: 0, kind: input, shape index: {}]   ;;  %s374_s2 = inlined_call_operand.vmem [shape: f32[1,128], index: 2, kind: input, shape index: {}]   ;;  %s375_s3 = inlined_call_operand.vmem [shape: f32[16,128], index: 3, kind: input, shape index: {}]   ;;  %s376_s4 = inlined_call_operand.vmem [shape: f32[1,128], index: 4, kind: input, shape index: {}]   ;;  %s377_s5 = inlined_call_operand.vmem [shape: f32[1,128], index: 5, kind: input, shape index: {}]   ;;  %s378_s6 = inlined_call_operand.vmem [shape: f32[16,128], index: 6, kind: output, shape index: {}]  }
   0x1   :  { %v51_v0 = vld [vmem:[%s372_s1 + $0x70] sm:$0xff]  ;;  %v52_v1 = vld [vmem:[%s372_s1 + $0x78] sm:$0xff]  ;;  %v49_v5 = vld [vmem:[%s372_s1 + $0x60] sm:$0xff] }
   0x2   :  { %v67_v2 = vld [vmem:[%s372_s1 + $0xf0] sm:$0xff]  ;;  %v76_v3 = vpack.c.bf16 %v52_v1, %v51_v0  ;;  %v68_v4 = vld [vmem:[%s372_s1 + $0xf8] sm:$0xff]  ;;  %v50_v6 = vld [vmem:[%s372_s1 + $0x68] sm:$0xff] }
   0x3   :  { %v84_v7 = vpack.c.bf16 %v68_v4, %v67_v2  ;;  %v65_v8 = vld [vmem:[%s372_s1 + $0xe0] sm:$0xff]  ;;  %v66_v9 = vld [vmem:[%s372_s1 + $0xe8] sm:$0xff]  ;;  %v75_v10 = vpack.c.bf16 %v50_v6, %v49_v5  ;;  %v47_v12 = vld [vmem:[%s372_s1 + $0x50] sm:$0xff] }
   0x4   :  { %85 = vmatpush.bf16.msra.mxu0 %v76_v3  ;;  %v83_v11 = vpack.c.bf16 %v66_v9, %v65_v8  ;;  %v48_v13 = vld [vmem:[%s372_s1 + $0x58] sm:$0xff]  ;;  %v63_v14 = vld [vmem:[%s372_s1 + $0xd0] sm:$0xff]  ;;  %v45_v18 = vld [vmem:[%s372_s1 + $0x40] sm:$0xff]  ;;  %v207_v3 = vmov 128.0  }
   0x5   :  { %99 = vmatpush.bf16.msra.mxu1 %v84_v7  ;;  %v64_v15 = vld [vmem:[%s372_s1 + $0xd8] sm:$0xff]  ;;  %v74_v16 = vpack.c.bf16 %v48_v13, %v47_v12  ;;  %v46_v19 = vld [vmem:[%s372_s1 + $0x48] sm:$0xff]  ;;  %v61_v20 = vld [vmem:[%s372_s1 + $0xc0] sm:$0xff]  ;;  %201 = vrcp.f32 %v207_v3 }
   0x6   :  { %v82_v17 = vpack.c.bf16 %v64_v15, %v63_v14  ;;  %v62_v21 = vld [vmem:[%s372_s1 + $0xc8] sm:$0xff]  ;;  %v73_v22 = vpack.c.bf16 %v46_v19, %v45_v18  ;;  %v43_v24 = vld [vmem:[%s372_s1 + $0x30] sm:$0xff]  ;;  %v44_v25 = vld [vmem:[%s372_s1 + $0x38] sm:$0xff] }
   0x7   :  { %v81_v23 = vpack.c.bf16 %v62_v21, %v61_v20  ;;  %v59_v26 = vld [vmem:[%s372_s1 + $0xb0] sm:$0xff]  ;;  %v60_v27 = vld [vmem:[%s372_s1 + $0xb8] sm:$0xff]  ;;  %v72_v28 = vpack.c.bf16 %v44_v25, %v43_v24  ;;  %v41_v30 = vld [vmem:[%s372_s1 + $0x20] sm:$0xff] }
   0x8   :  { %86 = vmatpush.bf16.msra.mxu0 %v75_v10  ;;  %v80_v29 = vpack.c.bf16 %v60_v27, %v59_v26  ;;  %v42_v31 = vld [vmem:[%s372_s1 + $0x28] sm:$0xff]  ;;  %v57_v32 = vld [vmem:[%s372_s1 + $0xa0] sm:$0xff]  ;;  %v39_v36 = vld [vmem:[%s372_s1 + $0x10] sm:$0xff] }
   0x9   :  { %100 = vmatpush.bf16.msra.mxu1 %v83_v11  ;;  %v58_v33 = vld [vmem:[%s372_s1 + $0xa8] sm:$0xff]  ;;  %v71_v34 = vpack.c.bf16 %v42_v31, %v41_v30  ;;  %v40_v37 = vld [vmem:[%s372_s1 + $0x18] sm:$0xff]  ;;  %v55_v38 = vld [vmem:[%s372_s1 + $0x90] sm:$0xff] }
   0xa   :  { %v79_v35 = vpack.c.bf16 %v58_v33, %v57_v32  ;;  %v56_v39 = vld [vmem:[%s372_s1 + $0x98] sm:$0xff]  ;;  %v70_v40 = vpack.c.bf16 %v40_v37, %v39_v36  ;;  %v37_v42 = vld [vmem:[%s372_s1] sm:$0xff]  ;;  %v38_v43 = vld [vmem:[%s372_s1 + $0x8] sm:$0xff] }
   0xb   :  { %v78_v41 = vpack.c.bf16 %v56_v39, %v55_v38  ;;  %v53_v44 = vld [vmem:[%s372_s1 + $0x80] sm:$0xff]  ;;  %v54_v45 = vld [vmem:[%s372_s1 + $0x88] sm:$0xff]  ;;  %v69_v46 = vpack.c.bf16 %v38_v43, %v37_v42  ;;  %v33_v48 = vld [vmem:[%s373_s0 + $0x10] sm:$0xff]  ;;  %v202_v4 = vpop.eup %201 }
   0xc   :  { %87 = vmatpush.bf16.msra.mxu0 %v74_v16  ;;  %v31_v47 = vld [vmem:[%s373_s0] sm:$0xff]  ;;  %v77_v49 = vpack.c.bf16 %v54_v45, %v53_v44  ;;  %v32_v50 = vld [vmem:[%s373_s0 + $0x8] sm:$0xff]  ;;  %v34_v51 = vld [vmem:[%s373_s0 + $0x18] sm:$0xff]  ;;  %v137_v5 = vmul.f32 128.0, %v202_v4  ;;  %vm141_vm0 = vweird.f32 %v202_v4 }
   0xd   :  { %101 = vmatpush.bf16.msra.mxu1 %v82_v17  ;;  %v35_v52 = vpack.c.bf16 %v33_v48, %v31_v47  ;;  %v36_v53 = vpack.c.bf16 %v34_v51, %v32_v50  ;;  %v198_v55 = vld [vmem:[%s374_s2] ss:$0 sm:$0xff]  ;;  %v129_v0 = vld [vmem:[%s375_s3 + $0x8] sm:$0xff] }
   0xe   :  { %v128_v58 = vld [vmem:[%s375_s3] sm:$0xff]  ;;  %v138_v6 = vsub.f32 1.0, %v137_v5 }
   0xf   :  { %v199_v32 = vld [vmem:[%s376_s4] ss:$0 sm:$0xff] }
  0x10   :  { %88 = vmatpush.bf16.msra.mxu0 %v73_v22  ;;  %v139_v7 = vmul.f32 %v202_v4, %v138_v6 }
  0x11   :  { %102 = vmatpush.bf16.msra.mxu1 %v81_v23 }
  0x12   :  { %v140_v8 = vadd.f32 %v202_v4, %v139_v7 }
  0x14   :  { %89 = vmatpush.bf16.msra.mxu0 %v72_v28  ;;  %v142_v9 = vsel %vm141_vm0, %v202_v4, %v140_v8 }
  0x15   :  { %103 = vmatpush.bf16.msra.mxu1 %v80_v29 }
  0x18   :  { %90 = vmatpush.bf16.msra.mxu0 %v71_v34 }
  0x19   :  { %104 = vmatpush.bf16.msra.mxu1 %v79_v35  ;;  %v200_v35 = vld [vmem:[%s377_s5] ss:$0 sm:$0xff] }
  0x1c   :  { %91 = vmatpush.bf16.msra.mxu0 %v70_v40 }
  0x1d   :  { %105 = vmatpush.bf16.msra.mxu1 %v78_v41 }
  0x20   :  { %92 = vmatpush.bf16.msra.mxu0 %v69_v46 }
  0x21   :  { %106 = vmatpush.bf16.msra.mxu1 %v77_v49 }
  0x23   :  { %93 = vmatmul.bf16.vlgmr.msra.gmra.mxu0 %v35_v52 }
  0x24   :  { %107 = vmatmul.bf16.vlgmr.msra.gmra.mxu1 %v36_v53 }
  0xa0   :  { %v94_v54 = vpop.f32.mrf.mxu0 }
  0xa1   :  { %v108_v56 = vpop.f32.mrf.mxu1 }
  0xa2   :  { %v109_v57 = vadd.f32 %v108_v56, %v94_v54 }
  0xa4   :  { %v126_v59 = vadd.f32 %v198_v55, %v109_v57 }
  0xa6   :  { %v130_v60 = vadd.f32 %v128_v58, %v126_v59 }
  0xa8   :  { %132 = vadd.xlane.f32.xlu0 %v130_v60  ;;  %v96_v61 = vpop.f32.mrf.mxu0 }
  0xa9   :  { %v110_v62 = vpop.f32.mrf.mxu1 }
  0xaa   :  { %v111_v63 = vadd.f32 %v110_v62, %v96_v61 }
  0xac   :  { %v127_v1 = vadd.f32 %v198_v55, %v111_v63 }
  0xae   :  { %v131_v2 = vadd.f32 %v129_v0, %v127_v1 }
  0xb0   :  { %134 = vadd.xlane.f32.xlu0 %v131_v2 }
 0x11b   :  { %v133_v10 = vpop.xlane.xlu0 %132 }
 0x11c   :  { %v143_v11 = vmul.f32 %v142_v9, %v133_v10 }
 0x11e   :  { %v145_v12 = vsub.f32 %v130_v60, %v143_v11 }
 0x120   :  { %v147_v13 = vmul.f32 %v145_v12, %v145_v12 }
 0x122   :  { %149 = vadd.xlane.f32.xlu1 %v147_v13 }
 0x123   :  { %v135_v14 = vpop.xlane.xlu0 %134 }
 0x124   :  { %v144_v15 = vmul.f32 %v142_v9, %v135_v14 }
 0x126   :  { %v146_v16 = vsub.f32 %v131_v2, %v144_v15 }
 0x128   :  { %v148_v17 = vmul.f32 %v146_v16, %v146_v16 }
 0x12a   :  { %151 = vadd.xlane.f32.xlu1 %v148_v17 }
 0x195   :  { %v150_v18 = vpop.xlane.xlu1 %149 }
 0x196   :  { %v153_v19 = vmul.f32 %v150_v18, %v142_v9 }
 0x198   :  { %v155_v20 = vadd.f32 1e-05, %v153_v19 }
 0x19a   :  { %203 = vrsqrt.f32 %v155_v20  ;;  %vm163_vm2 = vweird.f32 %v155_v20 }
 0x19d   :  { %v152_v21 = vpop.xlane.xlu1 %151 }
 0x19e   :  { %v154_v22 = vmul.f32 %v152_v21, %v142_v9 }
 0x1a0   :  { %v204_v23 = vpop.eup %203  ;;  %v156_v24 = vadd.f32 1e-05, %v154_v22 }
 0x1a1   :  { %v158_v25 = vmul.f32 %v204_v23, %v155_v20  ;;  %vm164_vm1 = vweird.f32 %v204_v23 }
 0x1a2   :  { %205 = vrsqrt.f32 %v156_v24  ;;  %vm165_vm3 = vmor %vm163_vm2, %vm164_vm1  ;;  %vm173_vm5 = vweird.f32 %v156_v24 }
 0x1a3   :  { %v159_v26 = vmul.f32 %v204_v23, %v158_v25 }
 0x1a5   :  { %v160_v27 = vmul.f32 0.5, %v159_v26 }
 0x1a7   :  { %v161_v28 = vsub.f32 1.5, %v160_v27 }
 0x1a8   :  { %v206_v29 = vpop.eup %205 }
 0x1a9   :  { %v162_v30 = vmul.f32 %v204_v23, %v161_v28  ;;  %v168_v31 = vmul.f32 %v206_v29, %v156_v24  ;;  %vm174_vm4 = vweird.f32 %v206_v29 }
 0x1aa   :  { %vm175_vm6 = vmor %vm173_vm5, %vm174_vm4 }
 0x1ab   :  { %v166_v33 = vsel %vm165_vm3, %v204_v23, %v162_v30  ;;  %v169_v34 = vmul.f32 %v206_v29, %v168_v31 }
 0x1ac   :  { %v177_v36 = vmul.f32 %v166_v33, %v145_v12 }
 0x1ad   :  { %v170_v37 = vmul.f32 0.5, %v169_v34 }
 0x1ae   :  { %v183_v38 = vmul.f32 %v199_v32, %v177_v36 }
 0x1af   :  { %v171_v39 = vsub.f32 1.5, %v170_v37 }
 0x1b0   :  { %v189_v40 = vadd.f32 %v200_v35, %v183_v38 }
 0x1b1   :  { %v172_v41 = vmul.f32 %v206_v29, %v171_v39 }
 0x1b2   :  { %191 = vst [vmem:[%s378_s6] sm:$0xff] %v189_v40 }
 0x1b3   :  { %v176_v42 = vsel %vm175_vm6, %v206_v29, %v172_v41 }
 0x1b4   :  { %v178_v43 = vmul.f32 %v176_v42, %v146_v16 }
 0x1b6   :  { %v184_v44 = vmul.f32 %v199_v32, %v178_v43 }
 0x1b8   :  { %v190_v45 = vadd.f32 %v200_v35, %v184_v44 }
 0x1ba   :  { %192 = vst [vmem:[%s378_s6 + $0x8] sm:$0xff] %v190_v45 }

// kernel: encoder_pca_forward.17
= control target key start
LH: loop header
LB: loop body
LE: loop exit
PB: predicated region body
PF: predicated region fallthrough
CT: control target
= control target key end

     0   :  { %s275_s1 = inlined_call_operand.vmem [shape: f32[128,256], index: 1, kind: input, shape index: {}]   ;;  %s276_s0 = inlined_call_operand.vmem [shape: f32[16,128], index: 0, kind: input, shape index: {}]   ;;  %s277_s2 = inlined_call_operand.vmem [shape: f32[1,256], index: 2, kind: input, shape index: {}]   ;;  %s278_s3 = inlined_call_operand.vmem [shape: f32[16,256], index: 3, kind: output, shape index: {}]  }
   0x1   :  { %v57_v0 = vld [vmem:[%s275_s1 + $0xe0] sm:$0xff]  ;;  %v59_v1 = vld [vmem:[%s275_s1 + $0xf0] sm:$0xff]  ;;  %v58_v2 = vld [vmem:[%s275_s1 + $0xe8] sm:$0xff] }
   0x2   :  { %v75_v3 = vpack.c.bf16 %v59_v1, %v57_v0  ;;  %v60_v4 = vld [vmem:[%s275_s1 + $0xf8] sm:$0xff]  ;;  %v53_v5 = vld [vmem:[%s275_s1 + $0xc0] sm:$0xff]  ;;  %v55_v6 = vld [vmem:[%s275_s1 + $0xd0] sm:$0xff] }
   0x3   :  { %v76_v7 = vpack.c.bf16 %v60_v4, %v58_v2  ;;  %v54_v8 = vld [vmem:[%s275_s1 + $0xc8] sm:$0xff]  ;;  %v56_v9 = vld [vmem:[%s275_s1 + $0xd8] sm:$0xff]  ;;  %v73_v10 = vpack.c.bf16 %v55_v6, %v53_v5  ;;  %v49_v12 = vld [vmem:[%s275_s1 + $0xa0] sm:$0xff] }
   0x4   :  { %77 = vmatpush.bf16.msra.mxu0 %v75_v3  ;;  %v74_v11 = vpack.c.bf16 %v56_v9, %v54_v8  ;;  %v51_v13 = vld [vmem:[%s275_s1 + $0xb0] sm:$0xff]  ;;  %v50_v14 = vld [vmem:[%s275_s1 + $0xa8] sm:$0xff]  ;;  %v52_v15 = vld [vmem:[%s275_s1 + $0xb8] sm:$0xff] }
   0x5   :  { %91 = vmatpush.bf16.msra.mxu1 %v76_v7  ;;  %v71_v16 = vpack.c.bf16 %v51_v13, %v49_v12  ;;  %v72_v17 = vpack.c.bf16 %v52_v15, %v50_v14  ;;  %v45_v18 = vld [vmem:[%s275_s1 + $0x80] sm:$0xff]  ;;  %v47_v19 = vld [vmem:[%s275_s1 + $0x90] sm:$0xff]  ;;  %v46_v20 = vld [vmem:[%s275_s1 + $0x88] sm:$0xff] }
   0x6   :  { %v48_v21 = vld [vmem:[%s275_s1 + $0x98] sm:$0xff]  ;;  %v69_v22 = vpack.c.bf16 %v47_v19, %v45_v18  ;;  %v41_v24 = vld [vmem:[%s275_s1 + $0x60] sm:$0xff]  ;;  %v43_v25 = vld [vmem:[%s275_s1 + $0x70] sm:$0xff] }
   0x7   :  { %v70_v23 = vpack.c.bf16 %v48_v21, %v46_v20  ;;  %v42_v26 = vld [vmem:[%s275_s1 + $0x68] sm:$0xff]  ;;  %v44_v27 = vld [vmem:[%s275_s1 + $0x78] sm:$0xff]  ;;  %v67_v28 = vpack.c.bf16 %v43_v25, %v41_v24  ;;  %v37_v30 = vld [vmem:[%s275_s1 + $0x40] sm:$0xff] }
   0x8   :  { %78 = vmatpush.bf16.msra.mxu0 %v73_v10  ;;  %v68_v29 = vpack.c.bf16 %v44_v27, %v42_v26  ;;  %v39_v31 = vld [vmem:[%s275_s1 + $0x50] sm:$0xff]  ;;  %v38_v32 = vld [vmem:[%s275_s1 + $0x48] sm:$0xff]  ;;  %v40_v33 = vld [vmem:[%s275_s1 + $0x58] sm:$0xff] }
   0x9   :  { %92 = vmatpush.bf16.msra.mxu1 %v74_v11  ;;  %v65_v34 = vpack.c.bf16 %v39_v31, %v37_v30  ;;  %v66_v35 = vpack.c.bf16 %v40_v33, %v38_v32  ;;  %v33_v36 = vld [vmem:[%s275_s1 + $0x20] sm:$0xff]  ;;  %v35_v37 = vld [vmem:[%s275_s1 + $0x30] sm:$0xff]  ;;  %v34_v38 = vld [vmem:[%s275_s1 + $0x28] sm:$0xff] }
   0xa   :  { %v36_v39 = vld [vmem:[%s275_s1 + $0x38] sm:$0xff]  ;;  %v63_v40 = vpack.c.bf16 %v35_v37, %v33_v36  ;;  %v29_v42 = vld [vmem:[%s275_s1] sm:$0xff]  ;;  %v31_v43 = vld [vmem:[%s275_s1 + $0x10] sm:$0xff] }
   0xb   :  { %v64_v41 = vpack.c.bf16 %v36_v39, %v34_v38  ;;  %v30_v44 = vld [vmem:[%s275_s1 + $0x8] sm:$0xff]  ;;  %v32_v45 = vld [vmem:[%s275_s1 + $0x18] sm:$0xff]  ;;  %v61_v46 = vpack.c.bf16 %v31_v43, %v29_v42  ;;  %v26_v47 = vld [vmem:[%s276_s0] sm:$0xff] }
   0xc   :  { %79 = vmatpush.bf16.msra.mxu0 %v71_v16  ;;  %v27_v48 = vld [vmem:[%s276_s0 + $0x8] sm:$0xff]  ;;  %v62_v49 = vpack.c.bf16 %v32_v45, %v30_v44  ;;  %v120_v51 = vld [vmem:[%s277_s2] sm:$0x3] }
   0xd   :  { %93 = vmatpush.bf16.msra.mxu1 %v72_v17  ;;  %v28_v50 = vpack.c.bf16 %v27_v48, %v26_v47  ;;  %v122_v52 = vperm.slane %v120_v51, 0  ;;  %v123_v53 = vperm.slane %v120_v51, 1 }
  0x10   :  { %80 = vmatpush.bf16.msra.mxu0 %v69_v22 }
  0x11   :  { %94 = vmatpush.bf16.msra.mxu1 %v70_v23 }
  0x14   :  { %81 = vmatpush.bf16.msra.mxu0 %v67_v28 }
  0x15   :  { %95 = vmatpush.bf16.msra.mxu1 %v68_v29 }
  0x18   :  { %82 = vmatpush.bf16.msra.mxu0 %v65_v34 }
  0x19   :  { %96 = vmatpush.bf16.msra.mxu1 %v66_v35 }
  0x1c   :  { %83 = vmatpush.bf16.msra.mxu0 %v63_v40 }
  0x1d   :  { %97 = vmatpush.bf16.msra.mxu1 %v64_v41 }
  0x20   :  { %84 = vmatpush.bf16.msra.mxu0 %v61_v46 }
  0x21   :  { %98 = vmatpush.bf16.msra.mxu1 %v62_v49 }
  0x23   :  { %85 = vmatmul.bf16.vlgmr.msra.gmra.mxu0 %v28_v50 }
  0x24   :  { %99 = vmatmul.bf16.vlgmr.msra.gmra.mxu1 %v28_v50 }
  0xa0   :  { %v86_v54 = vpop.f32.mrf.mxu0 }
  0xa1   :  { %v126_v55 = vadd.f32 %v122_v52, %v86_v54  ;;  %v100_v56 = vpop.f32.mrf.mxu1 }
  0xa2   :  { %v127_v57 = vadd.f32 %v123_v53, %v100_v56 }
  0xa3   :  { %130 = vst [vmem:[%s278_s3] sm:$0xff] %v126_v55 }
  0xa4   :  { %131 = vst [vmem:[%s278_s3 + $0x8] sm:$0xff] %v127_v57 }
  0xa8   :  { %v88_v58 = vpop.f32.mrf.mxu0 }
  0xa9   :  { %v128_v59 = vadd.f32 %v122_v52, %v88_v58  ;;  %v102_v60 = vpop.f32.mrf.mxu1 }
  0xaa   :  { %v129_v61 = vadd.f32 %v123_v53, %v102_v60 }
  0xab   :  { %132 = vst [vmem:[%s278_s3 + $0x10] sm:$0xff] %v128_v59 }
  0xac   :  { %133 = vst [vmem:[%s278_s3 + $0x18] sm:$0xff] %v129_v61 }

// kernel: encoder_pca_forward.19
= control target key start
LH: loop header
LB: loop body
LE: loop exit
PB: predicated region body
PF: predicated region fallthrough
CT: control target
= control target key end

     0   :  { %s212_s0 = inlined_call_operand.vmem [shape: f32[16,128], index: 0, kind: input, shape index: {}]   ;;  %s213_s1 = inlined_call_operand.vmem [shape: f32[128,128], index: 1, kind: input, shape index: {}]   ;;  %s214_s2 = inlined_call_operand.vmem [shape: f32[1,128], index: 2, kind: input, shape index: {}]   ;;  %s215_s3 = inlined_call_operand.hbm [shape: f32[16,128], index: 3, kind: output, shape index: {}]  }
   0x1   :  { %v40_v0 = vld [vmem:[%s213_s1 + $0x70] sm:$0xff]  ;;  %v41_v1 = vld [vmem:[%s213_s1 + $0x78] sm:$0xff]  ;;  %v38_v2 = vld [vmem:[%s213_s1 + $0x60] sm:$0xff] }
   0x2   :  { %v49_v3 = vpack.c.bf16 %v41_v1, %v40_v0  ;;  %v39_v4 = vld [vmem:[%s213_s1 + $0x68] sm:$0xff]  ;;  %v36_v6 = vld [vmem:[%s213_s1 + $0x50] sm:$0xff]  ;;  %v37_v7 = vld [vmem:[%s213_s1 + $0x58] sm:$0xff] }
   0x3   :  { %v48_v5 = vpack.c.bf16 %v39_v4, %v38_v2 }
   0x4   :  { %50 = vmatpush.bf16.msra.mxu0 %v49_v3 }
   0x5   :  { %8 = vsyncpa [#allocation4], 0  ;;  %v47_v8 = vpack.c.bf16 %v37_v7, %v36_v6  ;;  %v34_v9 = vld [vmem:[%s213_s1 + $0x40] sm:$0xff]  ;;  %v35_v10 = vld [vmem:[%s213_s1 + $0x48] sm:$0xff]  ;;  %s87_s26 = sshll.u32 %s215_s3, 4  ;;  %s131_s27 = smov 8   ;;  %s88_s26 = int_to_ptr.hbm [resolvable:$true] %s87_s26 }
   0x6   :  { %v46_v11 = vpack.c.bf16 %v35_v10, %v34_v9  ;;  %v32_v12 = vld [vmem:[%s213_s1 + $0x30] sm:$0xff]  ;;  %v33_v13 = vld [vmem:[%s213_s1 + $0x38] sm:$0xff]  ;;  %v30_v15 = vld [vmem:[%s213_s1 + $0x20] sm:$0xff] }
   0x7   :  { %v45_v14 = vpack.c.bf16 %v33_v13, %v32_v12  ;;  %v31_v16 = vld [vmem:[%s213_s1 + $0x28] sm:$0xff]  ;;  %v28_v18 = vld [vmem:[%s213_s1 + $0x10] sm:$0xff]  ;;  %v29_v19 = vld [vmem:[%s213_s1 + $0x18] sm:$0xff] }
   0x8   :  { %51 = vmatpush.bf16.msra.mxu0 %v48_v5  ;;  %v44_v17 = vpack.c.bf16 %v31_v16, %v30_v15  ;;  %v43_v20 = vpack.c.bf16 %v29_v19, %v28_v18  ;;  %v26_v21 = vld [vmem:[%s213_s1] sm:$0xff]  ;;  %v27_v22 = vld [vmem:[%s213_s1 + $0x8] sm:$0xff]  ;;  %s129_s1 = smov [#allocation3]  }
   0x9   :  { %v42_v23 = vpack.c.bf16 %v27_v22, %v26_v21  ;;  %v23_v24 = vld [vmem:[%s212_s0] sm:$0xff]  ;;  %v24_v25 = vld [vmem:[%s212_s0 + $0x8] sm:$0xff]  ;;  %s85_s23 = sshll.u32 %s129_s1, 4  ;;  %s130_s0 = smov 128   ;;  %s86_s23 = int_to_ptr.vmem [resolvable:$true] %s85_s23 }
   0xa   :  { %v25_v26 = vpack.c.bf16 %v24_v25, %v23_v24  ;;  %v102_v27 = vld [vmem:[%s214_s2] ss:$0 sm:$0xff] }
   0xc   :  { %52 = vmatpush.bf16.msra.mxu0 %v47_v8 }
  0x10   :  { %53 = vmatpush.bf16.msra.mxu0 %v46_v11 }
  0x14   :  { %54 = vmatpush.bf16.msra.mxu0 %v45_v14 }
  0x18   :  { %55 = vmatpush.bf16.msra.mxu0 %v44_v17 }
  0x1c   :  { %56 = vmatpush.bf16.msra.mxu0 %v43_v20 }
  0x20   :  { %57 = vmatpush.bf16.msra.mxu0 %v42_v23 }
  0x23   :  { %58 = vmatmul.bf16.vlgmr.msra.gmra.mxu0 %v25_v26 }
  0xa0   :  { %v59_v28 = vpop.f32.mrf.mxu0 }
  0xa1   :  { %v77_v29 = vadd.f32 %v102_v27, %v59_v28 }
  0xa3   :  { %79 = vst [vmem:[#allocation3] sm:$0xff] %v77_v29 }
  0xa8   :  { %v61_v30 = vpop.f32.mrf.mxu0 }
  0xa9   :  { %v78_v31 = vadd.f32 %v102_v27, %v61_v30 }
  0xab   :  { %80 = vst [vmem:[#allocation3 + $0x8] sm:$0xff] %v78_v31 }
  0xac   :  { %93 = dma.vmem_to_hbm [thread:$0]  %s86_s23, 256, %s88_s26, [#allocation4], %s130_s0, %s130_s0, %s131_s27  }
  0xad   :  { %127 = dma.done.wait [#allocation4], 256  }
  0xae   :  { %128 = vsyncadd [#allocation4], 4294967040 }
  0xaf   :  { %98 = vsyncpa [#allocation4], 1 }

// kernel: encoder_pca_forward.18
= control target key start
LH: loop header
LB: loop body
LE: loop exit
PB: predicated region body
PF: predicated region fallthrough
CT: control target
= control target key end

     0   :  { %s663_s12 = smov 0   ;;  %s743_s0 = inlined_call_operand.vmem [shape: f32[2,8,128], index: 0, kind: input, shape index: {}]   ;;  %s744_s1 = inlined_call_operand.vmem [shape: f32[1,16,256], index: 1, kind: input, shape index: {}, may-alias: {1,2}]   ;;  %s745_s2 = inlined_call_operand.vmem [shape: f32[1,16,256], index: 2, kind: input, shape index: {}, may-alias: {1,2}]   ;;  %s746_s3 = inlined_call_operand.vmem [shape: f32[2,8,128], index: 3, kind: output, shape index: {}]  }
   0x1 LB: > { %s584_s13 = sadd.s32 4294967295, %s638_s12   ;;  %p586_p0 = scmp.ge.s32.totalorder %s638_s12, 1  ;;  %s638_s12 = sphi %s663_s12, %s13_s12  }
   0x2   : > { %p112_p1 = scmp.lt.s32.totalorder %s638_s12, 3 }
   0x4   : > { %p671_p2 = pnand %p586_p0, %p112_p1 }
   0x5   : > { %p587_p3 = scmp.ne.s32.totalorder (!%p671_p2), %s584_s13, 0 }
   0x6   : > { %116 = sbr.rel (%p671_p2) target bundleno = 27 (0x1b), region = 12 }
   0xb   : > { %120 = sbr.rel (%p587_p3) target bundleno = 19 (0x13), region = 16 }
  0x10   : > { %v151_v0 = vld [vmem:[%s744_s1] sm:$0xff]  ;;  %v153_v1 = vld [vmem:[%s744_s1 + $0x10] sm:$0xff] }
  0x11   : > { %152 = vst [vmem:[#allocation2] sm:$0xff] %v151_v0 }
  0x12   : > { %154 = vst [vmem:[#allocation2 + $0x8] sm:$0xff] %v153_v1 }
  0x13 PF: > { %160 = sbr.rel (%p587_p3) target bundleno = 27 (0x1b), region = 54 }
  0x18   : > { %v589_v2 = vld [vmem:[%s745_s2 + $0x8] sm:$0xff]  ;;  %v590_v3 = vld [vmem:[%s745_s2 + $0x18] sm:$0xff] }
  0x19   : > { %193 = vst [vmem:[#allocation3 + $0x8] sm:$0xff] %v589_v2 }
  0x1a   : > { %195 = vst [vmem:[#allocation3] sm:$0xff] %v590_v3 }
  0x1b PF: > { %215 = sbr.rel (%p671_p2) target bundleno = 1102 (0x44e), region = 100  ;;  %p239_p4 = scmp.lt.s32.totalorder (!%p671_p2), %s584_s13, 1 }
  0x1c   : > { %s640_s27 = smov (!%p671_p2), 64   ;;  %s641_s28 = smov (!%p671_p2), 32  }
  0x1d   : > { %s642_s29 = smov (!%p671_p2), 96  }
  0x20   : > { %v250_v4 = vld [vmem:[#allocation2] sm:$0xff]  ;;  %v251_v5 = vld [vmem:[#allocation2 + $0x8] sm:$0xff]  ;;  %s749_s13 = smov (!%p239_p4, %s584_s13), 1  ;;  %vm263_vm0 = vcmask 261120   ;;  %vm284_vm1 = vcmask 130048   ;;  %v254_v30 = vld [vmem:[#allocation3 + $0x8] sm:$0xff] }
  0x21   : > { %v252_v6 = vpack.c.bf16 %v250_v4, %v250_v4  ;;  %v253_v7 = vpack.c.bf16 %v251_v5, %v251_v5  ;;  %s593_s23 = sshll.u32 %s749_s13, 3  ;;  %v255_v31 = vld [vmem:[#allocation3] sm:$0xff]  ;;  %v256_v32 = vpack.c.bf16 %v254_v30, %v254_v30  ;;  %vm500_vm2 = vcmask 523264  }
  0x22   : > { %s242_s26 = scalar_lea.vmem %s743_s0, %s593_s23  ;;  %v257_v33 = vpack.c.bf16 %v255_v31, %v255_v31  ;;  %vm502_vm3 = vcmask 785408   ;;  %s246_s5 = scalar_lea.vmem %s746_s3, %s593_s23 }
  0x23   : > { %v260_v8 = vunpack.c.l.b16 %v252_v6  ;;  %v261_v9 = vunpack.c.l.b16 %v253_v7  ;;  %v248_v12 = vld [vmem:[%s242_s26] sm:$0xff]  ;;  %v299_v34 = vunpack.c.l.b16 %v256_v32 }
  0x24   : > { %v249_v13 = vpack.c.bf16 %v248_v12, %v248_v12  ;;  %v300_v35 = vunpack.c.l.b16 %v257_v33 }
  0x25   : > { %v262_v10 = vpack.c.b16 %v261_v9, %v260_v8 }
  0x26   : > { %v320_v14 = vunpack.c.l.b16 %v249_v13  ;;  %v301_v36 = vpack.c.b16 %v300_v35, %v299_v34 }
  0x27   : > { %v268_v11 = vsel %vm263_vm0, %v262_v10, 0  ;;  %379 = vrot.lane.b32.xlu2 %v262_v10, %s640_s27 }
  0x28   : > { %277 = vmatpush.bf16.xpose.msra.mxu0 %v268_v11  ;;  %v321_v15 = vpack.c.b16 %v320_v14, %v320_v14  ;;  %313 = vmatpush.bf16.msra.mxu1 %v301_v36 }
  0x2f   : > { %595 = vmatmul.msk.bf16.vlgmr.msra.gmra.mxu0 %vm263_vm0, %v249_v13  ;;  %434 = vrot.lane.b32.xlu2 %v262_v10, %s641_s28 }
  0x37   : > { %377 = vrot.lane.b32.xlu2 %v321_v15, %s640_s27 }
  0x3f   : > { %432 = vrot.lane.b32.xlu2 %v321_v15, %s641_s28 }
  0x81   : > { %v380_v20 = vpop.permute.xlu2 %379 }
  0x82   : > { %v385_v37 = vsel %vm263_vm0, %v380_v20, 0 }
  0x83   : > { %394 = vmatpush.bf16.xpose.msrb.mxu1 %v385_v37 }
  0x89   : > { %v435_v21 = vpop.permute.xlu2 %434 }
  0x8a   : > { %v440_v26 = vsel %vm263_vm0, %v435_v21, 0 }
  0x8b   : > { %449 = vmatpush.bf16.xpose.msrb.mxu0 %v440_v26 }
  0x91   : > { %v378_v25 = vpop.permute.xlu2 %377 }
  0x99   : > { %v433_v29 = vpop.permute.xlu2 %432 }
  0x9a   : > { %601 = vmatmul.msk.bf16.vlgmr.msrb.gmra.mxu0 %vm263_vm0, %v433_v29 }
  0xac   : > { %v279_v16 = vpop.f32.mrf.mxu0 }
  0xad   : > { %v283_v17 = vmul.f32 0.17677669, %v279_v16 }
  0xaf   : > { %v285_v18 = vsel %vm284_vm1, %v283_v17, -inf }
  0xb0   : > { %286 = vmax.xlane.f32.xlu0 %v285_v18 }
  0xb4   : > { %v281_v19 = vpop.f32.mrf.mxu0 }
  0xc4   : > { %324 = vrot.lane.b32.xlu0 %v262_v10, %s642_s29 }
 0x117   : > { %v451_v44 = vpop.f32.mrf.mxu0 }
 0x118   : > { %v455_v45 = vmul.f32 0.17677669, %v451_v44 }
 0x11a   : > { %v456_v46 = vsel %vm284_vm1, %v455_v45, -inf }
 0x11f   : > { %v453_v47 = vpop.f32.mrf.mxu0 }
 0x123   : > { %v287_v22 = vpop.xlane.xlu0 %286 }
 0x124   : > { %v288_v23 = vsub.f32 %v283_v17, %v287_v22 }
 0x126   : > { %v289_v24 = vmul.f32 1.442695, %v288_v23 }
 0x128   : > { %616 = vpow2.f32 %v289_v24 }
 0x12e   : > { %v617_v27 = vpop.eup %616 }
 0x12f   : > { %v291_v28 = vsel %vm284_vm1, %v617_v27, 0.0 }
 0x130   : > { %292 = vadd.xlane.f32.xlu1 %v291_v28 }
 0x136   : > { %v325_v38 = vpop.permute.xlu0 %324 }
 0x137   : > { %v330_v39 = vsel %vm263_vm0, %v325_v38, 0 }
 0x138   : > { %339 = vmatpush.bf16.xpose.msra.mxu2 %v330_v39 }
 0x149   : > { %322 = vrot.lane.b32.xlu1 %v321_v15, %s642_s29 }
 0x173   : > { %457 = vmax.xlane.f32.xlu1 %v456_v46 }
 0x1a3   : > { %v293_v40 = vpop.xlane.xlu1 %292 }
 0x1a4   : > { %618 = vrcp.f32 %v293_v40 }
 0x1aa   : > { %v619_v41 = vpop.eup %618 }
 0x1ab   : > { %v295_v42 = vmul.f32 %v619_v41, %v617_v27 }
 0x1ad   : > { %v296_v43 = vpack.c.bf16 %v295_v42, %v295_v42 }
 0x1af   : > { %596 = vmatmul.msk.bf16.vlgmr.msra.gmra.mxu1 %vm284_vm1, %v296_v43 }
 0x1bb   : > { %v323_v48 = vpop.permute.xlu1 %322 }
 0x1bc   : > { %597 = vmatmul.msk.bf16.vlgmr.msra.gmra.mxu2 %vm263_vm0, %v323_v48 }
 0x1bf   : > { %599 = vmatmul.msk.bf16.vlgmr.msrb.gmra.mxu1 %vm263_vm0, %v378_v25 }
 0x1e6   : > { %v458_v61 = vpop.xlane.xlu1 %457 }
 0x1e7   : > { %v459_v1 = vsub.f32 %v455_v45, %v458_v61 }
 0x1e9   : > { %v460_v3 = vmul.f32 1.442695, %v459_v1 }
 0x22c   : > { %v717_v49 = vpop.f32.mrf.mxu1 }
 0x234   : > { %v317_v50 = vpop.f32.mrf.mxu1 }
 0x23c   : > { %v396_v51 = vpop.f32.mrf.mxu1 }
 0x23d   : > { %v400_v52 = vmul.f32 0.17677669, %v396_v51 }
 0x23f   : > { %v341_v53 = vpop.f32.mrf.mxu2  ;;  %v401_v54 = vsel %vm284_vm1, %v400_v52, -inf }
 0x240   : > { %v345_v55 = vmul.f32 0.17677669, %v341_v53  ;;  %402 = vmax.xlane.f32.xlu2 %v401_v54 }
 0x242   : > { %v346_v56 = vsel %vm284_vm1, %v345_v55, -inf }
 0x243   : > { %347 = vmax.xlane.f32.xlu0 %v346_v56 }
 0x244   : > { %v398_v57 = vpop.f32.mrf.mxu1 }
 0x247   : > { %v343_v58 = vpop.f32.mrf.mxu2 }
 0x258   : > { %358 = vrot.lane.b32.xlu2 %v301_v36, %s642_s29 }
 0x2b3   : > { %v403_v59 = vpop.xlane.xlu2 %402 }
 0x2b4   : > { %v404_v60 = vsub.f32 %v400_v52, %v403_v59 }
 0x2b6   : > { %v405_v62 = vmul.f32 1.442695, %v404_v60  ;;  %v348_v63 = vpop.xlane.xlu0 %347 }
 0x2b7   : > { %v349_v0 = vsub.f32 %v345_v55, %v348_v63 }
 0x2b8   : > { %620 = vpow2.f32 %v405_v62 }
 0x2b9   : > { %v350_v2 = vmul.f32 1.442695, %v349_v0 }
 0x2bb   : > { %622 = vpow2.f32 %v350_v2  ;;  %v359_v10 = vpop.permute.xlu2 %358 }
 0x2bc   : > { %624 = vpow2.f32 %v460_v3  ;;  %371 = vmatpush.bf16.msra.mxu3 %v359_v10 }
 0x2be   : > { %v621_v4 = vpop.eup %620 }
 0x2bf   : > { %v407_v5 = vsel %vm284_vm1, %v621_v4, 0.0 }
 0x2c0   : > { %408 = vadd.xlane.f32.xlu1 %v407_v5 }
 0x2c1   : > { %v623_v6 = vpop.eup %622 }
 0x2c2   : > { %v352_v7 = vsel %vm284_vm1, %v623_v6, 0.0  ;;  %v625_v8 = vpop.eup %624 }
 0x2c3   : > { %353 = vadd.xlane.f32.xlu0 %v352_v7  ;;  %v462_v9 = vsel %vm284_vm1, %v625_v8, 0.0 }
 0x2cb   : > { %463 = vadd.xlane.f32.xlu0 %v462_v9 }
 0x2d9   : > { %413 = vrot.lane.b32.xlu1 %v301_v36, %s640_s27 }
 0x2df   : > { %468 = vrot.lane.b32.xlu0 %v301_v36, %s641_s28 }
 0x333   : > { %v409_v14 = vpop.xlane.xlu1 %408 }
 0x336   : > { %v354_v11 = vpop.xlane.xlu0 %353 }
 0x337   : > { %626 = vrcp.f32 %v354_v11 }
 0x338   : > { %628 = vrcp.f32 %v409_v14 }
 0x33d   : > { %v627_v12 = vpop.eup %626 }
 0x33e   : > { %v356_v13 = vmul.f32 %v627_v12, %v623_v6  ;;  %v464_v16 = vpop.xlane.xlu0 %463  ;;  %v629_v17 = vpop.eup %628 }
 0x33f   : > { %630 = vrcp.f32 %v464_v16  ;;  %v411_v20 = vmul.f32 %v629_v17, %v621_v4 }
 0x340   : > { %v357_v15 = vpack.c.bf16 %v356_v13, %v356_v13 }
 0x341   : > { %v412_v22 = vpack.c.bf16 %v411_v20, %v411_v20 }
 0x342   : > { %598 = vmatmul.msk.bf16.vlgmr.msra.gmra.mxu3 %vm284_vm1, %v357_v15 }
 0x345   : > { %v631_v19 = vpop.eup %630 }
 0x346   : > { %v466_v21 = vmul.f32 %v631_v19, %v625_v8 }
 0x348   : > { %v467_v24 = vpack.c.bf16 %v466_v21, %v466_v21 }
 0x34b   : > { %v414_v18 = vpop.permute.xlu1 %413 }
 0x34c   : > { %426 = vmatpush.bf16.msrb.mxu3 %v414_v18 }
 0x351   : > { %v469_v23 = vpop.permute.xlu0 %468 }
 0x352   : > { %600 = vmatmul.msk.bf16.vlgmr.msrb.gmra.mxu3 %vm284_vm1, %v412_v22  ;;  %481 = vmatpush.bf16.msrb.mxu2 %v469_v23 }
 0x355   : > { %602 = vmatmul.msk.bf16.vlgmr.msrb.gmra.mxu2 %vm284_vm1, %v467_v24 }
 0x3c5   : > { %v373_v25 = vpop.f32.mrf.mxu3 }
 0x3c6   : > { %488 = vrot.lane.b32.xlu2 %v373_v25, %s641_s28 }
 0x3cd   : > { %v375_v26 = vpop.f32.mrf.mxu3 }
 0x3d5   : > { %v428_v27 = vpop.f32.mrf.mxu3 }
 0x3d6   : > { %492 = vrot.lane.b32.xlu2 %v428_v27, %s640_s27 }
 0x3d8   : > { %v483_v28 = vpop.f32.mrf.mxu2 }
 0x3d9   : > { %496 = vrot.lane.b32.xlu0 %v483_v28, %s642_s29 }
 0x3dd   : > { %v430_v29 = vpop.f32.mrf.mxu3 }
 0x3e0   : > { %v485_v30 = vpop.f32.mrf.mxu2 }
 0x420   : > { %v489_v31 = vpop.permute.xlu2 %488 }
 0x421   : > { %v499_v33 = vsel %vm263_vm0, %v717_v49, %v489_v31 }
 0x430   : > { %v493_v32 = vpop.permute.xlu2 %492 }
 0x431   : > { %v501_v34 = vsel %vm500_vm2, %v499_v33, %v493_v32 }
 0x44b   : > { %v497_v35 = vpop.permute.xlu0 %496 }
 0x44c   : > { %v503_v36 = vsel %vm502_vm3, %v501_v34, %v497_v35 }
 0x44d   : > { %504 = vst [vmem:[%s246_s5] sm:$0xff] %v503_v36 }
 0x44e PF: > { %s13_s12 = sadd.s32 1, %s638_s12  }
 0x44f   : > { %p10_p5 = scmp.ge.s32.totalorder %s13_s12, 4  }
 0x451   :  { %12 = sbr.rel (!%p10_p5) target bundleno = 1 (0x1), region = 147 }

</bundles_post_ra>
